<compile_context>
chip_gen: v6e
topology: v6e:2x2x1
jax: 0.10.0
libtpu: 0.0.40
codegen_flags: <defaults>
</compile_context>

<pallas_src>
import functools
import math

import numpy as np
import jax
import jax.numpy as jnp
from jax.experimental import pallas as pl
from jax.experimental.pallas import tpu as pltpu


# -----------------------------------------------------------------------------
# Small, deterministic stand-ins for `args` / BertConfig of the PyTorch module
# -----------------------------------------------------------------------------
class Cfg:
    BATCH_SIZE = 2          # bsi
    NUM_IMGS = 8            # transformer sequence length
    ANGLES = 16             # num_angles
    TRM_LAYER = 2           # number of BERT layers
    TRM_NEIGHBOR = 2        # neighbor window of the attention mask
    HEATMAP_OFFSET = 3      # rotation of the angle axis at the end


HIDDEN = 128                # stands in for hidden_dim = 768
N_HEADS = 4                 # stands in for num_attention_heads = 12
HEAD_DIM = HIDDEN // N_HEADS
INTERMEDIATE = 4 * HIDDEN   # BERT FFN expansion
N_CLASSES = 4               # stands in for n_classes = 12
LN_EPS = 1e-12              # BertConfig.layer_norm_eps
RGB_FEAT = (32, 7, 7)       # scaled-down stand-in for (2048, 7, 7)
DEPTH_FEAT = (16, 4, 4)     # scaled-down stand-in for (128, 4, 4)

# MXU operand dtype: bf16 inputs, f32 accumulation.
MXU_DTYPE = jnp.bfloat16


# -----------------------------------------------------------------------------
# In-kernel helpers (all elementwise math stays in f32)
# -----------------------------------------------------------------------------
def _mxu_dot(a, b):
    return jnp.dot(a.astype(MXU_DTYPE), b.astype(MXU_DTYPE),
                   preferred_element_type=jnp.float32)


def _gelu(x):
    # tanh-approx GELU. TODO(synk): BERT's default nn.GELU is the erf form;
    # the tanh approximation differs at ~1e-3 relative level.
    return 0.5 * x * (1.0 + jnp.tanh(0.7978845608028654 *
                                     (x + 0.044715 * x * x * x)))


def _layernorm(y, gamma, beta, eps):
    mu = jnp.mean(y, axis=-1, keepdims=True)
    var = jnp.mean(jnp.square(y - mu), axis=-1, keepdims=True)
    return (y - mu) * jax.lax.rsqrt(var + eps) * gamma + beta


# -----------------------------------------------------------------------------
# Generic K-streamed Linear (+bias, +optional activation) -- input stem
# -----------------------------------------------------------------------------
def _linear_kernel(x_ref, w_ref, b_ref, o_ref, *, activation):
    """o = act(x @ W + b); o block is resident across the K ("arbitrary") axis."""
    k = pl.program_id(0)

    @pl.when(k == 0)
    def _():
        o_ref[...] = jnp.zeros_like(o_ref)

    o_ref[...] += _mxu_dot(x_ref[...], w_ref[...])

    @pl.when(k == pl.num_programs(0) - 1)
    def _():
        acc = o_ref[...] + b_ref[...]
        if activation == "relu":
            acc = jnp.maximum(acc, 0.0)
        elif activation == "gelu":
            acc = _gelu(acc)
        o_ref[...] = acc


def _pick_tk(K, N, tk_max=2048):
    """Largest divisor of K that is a multiple of 128 and <= tk_max; guarded
    single-block fallback for toy / non-128-divisible K."""
    for t in range(tk_max, 127, -128):
        if K % t == 0:
            return t
    # Fallback: single K block.  Guard so we never stage a huge weight slab.
    assert K * N * 2 <= 12 * 2 ** 20, (
        f"linear(): K={K} has no 128-multiple divisor <= {tk_max} and the "
        f"single-block weight ({K}x{N}) would not fit VMEM")
    return K


def linear(x, w, b, activation="none", tk_max=2048):
    """x:(M,K) @ w:(K,N) + b:(1,N) with K streamed in tk chunks."""
    M, K = x.shape
    N = w.shape[1]
    tk = _pick_tk(K, N, tk_max)
    return pl.pallas_call(
        functools.partial(_linear_kernel, activation=activation),
        out_shape=jax.ShapeDtypeStruct((M, N), jnp.float32),
        grid=(K // tk,),
        in_specs=[
            pl.BlockSpec((M, tk), lambda k: (0, k)),
            pl.BlockSpec((tk, N), lambda k: (k, 0)),
            pl.BlockSpec((1, N), lambda k: (0, 0)),
        ],
        out_specs=pl.BlockSpec((M, N), lambda k: (0, 0)),
        compiler_params=pltpu.CompilerParams(
            dimension_semantics=("arbitrary",)),
    )(x, w, b)


# -----------------------------------------------------------------------------
# Fused stem merge: relu(rgb_x @ W_top + depth_x @ W_bot + b)
# (equivalent to Linear(concat([rgb, depth])) without the concat / HBM round-trip)
# -----------------------------------------------------------------------------
def _merge_kernel(r_ref, d_ref, wr_ref, wd_ref, b_ref, o_ref):
    acc = (_mxu_dot(r_ref[...], wr_ref[...]) +
           _mxu_dot(d_ref[...], wd_ref[...]) + b_ref[...])
    o_ref[...] = jnp.maximum(acc, 0.0)


def merge(rgb_x, depth_x, w_rgb, w_depth, b):
    M, H = rgb_x.shape
    N = w_rgb.shape[1]
    return pl.pallas_call(
        _merge_kernel,
        out_shape=jax.ShapeDtypeStruct((M, N), jnp.float32),
        grid=(1,),
        in_specs=[
            pl.BlockSpec((M, H), lambda i: (0, 0)),
            pl.BlockSpec((M, H), lambda i: (0, 0)),
            pl.BlockSpec((H, N), lambda i: (0, 0)),
            pl.BlockSpec((H, N), lambda i: (0, 0)),
            pl.BlockSpec((1, N), lambda i: (0, 0)),
        ],
        out_specs=pl.BlockSpec((M, N), lambda i: (0, 0)),
    )(rgb_x, depth_x, w_rgb, w_depth, b)


# -----------------------------------------------------------------------------
# Whole-encoder kernel: grid=(L,) streams stacked per-layer weights (auto
# double-buffered); the residual state h lives in the resident output block.
# Per grid step: QKV proj -> MHA (block-diag mask) -> out proj -> add+LN ->
#                FFN (GELU) -> add+LN.   The (B, 4H) intermediate stays in VMEM.
# -----------------------------------------------------------------------------
def _encoder_layer_kernel(h0_ref, m_ref,
                          wqkv_ref, bqkv_ref, wo_ref, bo_ref, g1_ref, be1_ref,
                          wi_ref, bi_ref, wf_ref, bf_ref, g2_ref, be2_ref,
                          o_ref, *, n_heads, head_dim, eps):
    l = pl.program_id(0)

    @pl.when(l == 0)
    def _():
        o_ref[...] = h0_ref[...]          # residual state lives in o_ref across layers

    h = o_ref[...]                        # (Btot, H) f32
    hid = n_heads * head_dim

    # ---- self-attention (1/sqrt(head_dim) already folded into wqkv/bqkv Q part) ----
    qkv = _mxu_dot(h, wqkv_ref[...]) + bqkv_ref[...]          # (Btot, 3H) f32
    qkv_b = qkv.astype(MXU_DTYPE)                             # single hoisted cast
    m = m_ref[...]                                            # (Btot, Btot) additive

    ctx_heads = []
    for hh in range(n_heads):
        q0 = hh * head_dim
        qh = qkv_b[:, q0:q0 + head_dim]
        kh = qkv_b[:, hid + q0:hid + q0 + head_dim]
        vh = qkv_b[:, 2 * hid + q0:2 * hid + q0 + head_dim]
        s = jax.lax.dot_general(qh, kh, (((1,), (1,)), ((), ())),
                                preferred_element_type=jnp.float32)
        s = s + m
        s = s - jnp.max(s, axis=-1, keepdims=True)
        p = jnp.exp(s)
        p = p * pl.reciprocal(jnp.sum(p, axis=-1, keepdims=True), approx=True)
        ctx_heads.append(jnp.dot(p.astype(MXU_DTYPE), vh,
                                 preferred_element_type=jnp.float32))
    ctx = jnp.concatenate(ctx_heads, axis=-1)                 # (Btot, H), lane-dense

    attn = _mxu_dot(ctx, wo_ref[...]) + bo_ref[...]
    h1 = _layernorm(attn + h, g1_ref[...], be1_ref[...], eps)

    # ---- FFN ----
    t = _gelu(_mxu_dot(h1, wi_ref[...]) + bi_ref[...])        # (Btot, 4H) stays on-chip
    f = _mxu_dot(t, wf_ref[...]) + bf_ref[...]
    o_ref[...] = _layernorm(f + h1, g2_ref[...], be2_ref[...], eps)


def encoder(h0, add_mask, p):
    Btot, H = h0.shape
    L = p["wqkv"].shape[0]
    I = p["wi"].shape[2]

    # VMEM budget: double-buffered streamed layer weights (bf16) + activations,
    # capped at 48 MiB so the prod-scale (hidden=768) config fits v7x's 64 MiB
    # physical VMEM and clears v5e's 16 MiB default scoped limit.
    wbytes = 2 * 2 * (H * 3 * H + H * H + H * I + I * H)        # bf16, 2-deep
    act = 4 * (4 * Btot * H + Btot * Btot + Btot * 3 * H + Btot * I)
    vmem_limit = int(min(48 * 2 ** 20, max(8 * 2 ** 20, 2 * (wbytes + act))))

    def w3(shape):
        # leading layer dim streamed (and squeezed out of the kernel ref)
        return pl.BlockSpec((None,) + shape, lambda l: (l, 0, 0))

    kern = functools.partial(_encoder_layer_kernel, n_heads=N_HEADS,
                             head_dim=HEAD_DIM, eps=LN_EPS)
    return pl.pallas_call(
        kern,
        out_shape=jax.ShapeDtypeStruct((Btot, H), jnp.float32),
        grid=(L,),
        in_specs=[
            pl.BlockSpec((Btot, H), lambda l: (0, 0)),          # h0 (used at l==0)
            pl.BlockSpec((Btot, Btot), lambda l: (0, 0)),       # block-diag mask
            w3((H, 3 * H)), w3((1, 3 * H)),                     # wqkv, bqkv
            w3((H, H)), w3((1, H)), w3((1, H)), w3((1, H)),     # wo, bo, ln1_g, ln1_b
            w3((H, I)), w3((1, I)),                             # wi, bi
            w3((I, H)), w3((1, H)), w3((1, H)), w3((1, H)),     # wf, bf, ln2_g, ln2_b
        ],
        out_specs=pl.BlockSpec((Btot, H), lambda l: (0, 0)),
        compiler_params=pltpu.CompilerParams(
            dimension_semantics=("arbitrary",),
            vmem_limit_bytes=vmem_limit),
    )(h0, add_mask,
      p["wqkv"], p["bqkv"], p["wo"], p["bo"], p["ln1_g"], p["ln1_b"],
      p["wi"], p["bi"], p["wf"], p["bf"], p["ln2_g"], p["ln2_b"])


# -----------------------------------------------------------------------------
# Fused classifier: Linear -> ReLU -> Linear
# -----------------------------------------------------------------------------
def _classifier_kernel(x_ref, w1_ref, b1_ref, w2_ref, b2_ref, o_ref):
    t = jnp.maximum(_mxu_dot(x_ref[...], w1_ref[...]) + b1_ref[...], 0.0)
    o_ref[...] = _mxu_dot(t, w2_ref[...]) + b2_ref[...]


def classifier(x, w1, b1, w2, b2):
    M, H = x.shape
    N = w2.shape[1]
    return pl.pallas_call(
        _classifier_kernel,
        out_shape=jax.ShapeDtypeStruct((M, N), jnp.float32),
        grid=(1,),
        in_specs=[
            pl.BlockSpec((M, H), lambda i: (0, 0)),
            pl.BlockSpec((H, H), lambda i: (0, 0)),
            pl.BlockSpec((1, H), lambda i: (0, 0)),
            pl.BlockSpec((H, N), lambda i: (0, 0)),
            pl.BlockSpec((1, N), lambda i: (0, 0)),
        ],
        out_specs=pl.BlockSpec((M, N), lambda i: (0, 0)),
    )(x, w1, b1, w2, b2)


# -----------------------------------------------------------------------------
# Masks, parameters, forward
# -----------------------------------------------------------------------------
def get_attention_mask(num_imgs, neighbor):
    """Circular neighbor mask (1 = may attend), same as utils.get_attention_mask."""
    mask = np.zeros((num_imgs, num_imgs), dtype=np.float32)
    t = np.zeros(num_imgs, dtype=np.float32)
    t[: neighbor + 1] = 1.0
    if neighbor != 0:
        t[-neighbor:] = 1.0
    for ri in range(num_imgs):
        mask[ri] = t
        t = np.roll(t, 1)
    return mask


def build_additive_mask(bsi, num_imgs, neighbor):
    """Block-diagonal additive mask for the batch-folded (bsi*S, bsi*S) attention."""
    nb = get_attention_mask(num_imgs, neighbor)
    big = np.zeros((bsi * num_imgs, bsi * num_imgs), dtype=np.float32)
    for b in range(bsi):
        s0 = b * num_imgs
        big[s0:s0 + num_imgs, s0:s0 + num_imgs] = nb
    return jnp.asarray((1.0 - big) * -10000.0, jnp.float32)


def init_params(key):
    keys = iter(jax.random.split(key, 32))

    def w(shape):
        return jax.random.normal(next(keys), shape, jnp.float32) * 0.02

    p = {}
    # stem (visual_fc_rgb / visual_fc_depth / visual_merge)
    p["rgb_w"] = w((int(np.prod(RGB_FEAT)), HIDDEN)).astype(MXU_DTYPE)
    p["rgb_b"] = jnp.zeros((1, HIDDEN), jnp.float32)
    p["depth_w"] = w((int(np.prod(DEPTH_FEAT)), HIDDEN)).astype(MXU_DTYPE)
    p["depth_b"] = jnp.zeros((1, HIDDEN), jnp.float32)
    wm = w((2 * HIDDEN, HIDDEN))                 # visual_merge weight split in two
    p["merge_w_rgb"] = wm[:HIDDEN].astype(MXU_DTYPE)
    p["merge_w_depth"] = wm[HIDDEN:].astype(MXU_DTYPE)
    p["merge_b"] = jnp.zeros((1, HIDDEN), jnp.float32)

    # waypoint_TRM: stacked per-layer weights for the whole-encoder kernel
    L = Cfg.TRM_LAYER
    scale = 1.0 / math.sqrt(HEAD_DIM)
    wqkv = w((L, HIDDEN, 3 * HIDDEN))
    wqkv = wqkv.at[:, :, :HIDDEN].multiply(scale)       # fold 1/sqrt(d) into Q
    p["wqkv"] = wqkv.astype(MXU_DTYPE)
    bqkv = jnp.zeros((L, 1, 3 * HIDDEN), jnp.float32)
    p["bqkv"] = bqkv.at[:, :, :HIDDEN].multiply(scale)  # (no-op for zero bias)
    p["wo"] = w((L, HIDDEN, HIDDEN)).astype(MXU_DTYPE)
    p["bo"] = jnp.zeros((L, 1, HIDDEN), jnp.float32)
    p["ln1_g"] = jnp.ones((L, 1, HIDDEN), jnp.float32)
    p["ln1_b"] = jnp.zeros((L, 1, HIDDEN), jnp.float32)
    p["wi"] = w((L, HIDDEN, INTERMEDIATE)).astype(MXU_DTYPE)
    p["bi"] = jnp.zeros((L, 1, INTERMEDIATE), jnp.float32)
    p["wf"] = w((L, INTERMEDIATE, HIDDEN)).astype(MXU_DTYPE)
    p["bf"] = jnp.zeros((L, 1, HIDDEN), jnp.float32)
    p["ln2_g"] = jnp.ones((L, 1, HIDDEN), jnp.float32)
    p["ln2_b"] = jnp.zeros((L, 1, HIDDEN), jnp.float32)

    # vis_classifier
    n_per_img = int(N_CLASSES * (Cfg.ANGLES / Cfg.NUM_IMGS))
    p["cls1_w"] = w((HIDDEN, HIDDEN)).astype(MXU_DTYPE)
    p["cls1_b"] = jnp.zeros((1, HIDDEN), jnp.float32)
    p["cls2_w"] = w((HIDDEN, n_per_img)).astype(MXU_DTYPE)
    p["cls2_b"] = jnp.zeros((1, n_per_img), jnp.float32)
    return p


def forward(params, rgb_feats, depth_feats):
    B = rgb_feats.shape[0]            # bsi * NUM_IMGS
    S = Cfg.NUM_IMGS
    bsi = B // S

    # visual_fc_rgb / visual_fc_depth : Flatten -> Linear -> ReLU (K-streamed)
    rgb_x = linear(rgb_feats.reshape(B, -1), params["rgb_w"], params["rgb_b"], "relu")
    depth_x = linear(depth_feats.reshape(B, -1), params["depth_w"], params["depth_b"], "relu")

    # visual_merge (fused: no concat, no extra HBM activation)
    vis_x = merge(rgb_x, depth_x, params["merge_w_rgb"], params["merge_w_depth"],
                  params["merge_b"])                                   # (B, HIDDEN)

    # WaypointBert: whole encoder in one pallas_call, batch folded into one block.
    add_mask = build_additive_mask(bsi, S, Cfg.TRM_NEIGHBOR)           # (B, B)
    h = encoder(vis_x, add_mask, params)                               # (B, HIDDEN)

    # vis_classifier : Linear -> ReLU -> Linear (fused)
    logits = classifier(h, params["cls1_w"], params["cls1_b"],
                        params["cls2_w"], params["cls2_b"])            # (B, n_per_img)

    vis_logits = logits.reshape(bsi, Cfg.ANGLES, N_CLASSES)
    off = Cfg.HEATMAP_OFFSET
    vis_logits = jnp.concatenate(
        [vis_logits[:, off:, :], vis_logits[:, :off, :]], axis=1)
    return vis_logits


# -----------------------------------------------------------------------------
if __name__ == "__main__":
    key = jax.random.PRNGKey(0)
    kp, kr, kd = jax.random.split(key, 3)

    params = init_params(kp)
    B = Cfg.BATCH_SIZE * Cfg.NUM_IMGS
    rgb_feats = jax.random.normal(kr, (B,) + RGB_FEAT, jnp.float32)       # NCHW
    depth_feats = jax.random.normal(kd, (B,) + DEPTH_FEAT, jnp.float32)   # NCHW

    out = jax.jit(forward)(params, rgb_feats, depth_feats)
    out = jax.block_until_ready(out)

    assert out.shape == (Cfg.BATCH_SIZE, Cfg.ANGLES, N_CLASSES), out.shape
    assert bool(jnp.all(jnp.isfinite(out)))
    print("KERNEL_OK")
</pallas_src>

<mosaic_0001>
module attributes {stable_mosaic.version = 11 : i64} {
  func.func @_linear_kernel(%arg0: i32, %arg1: memref<16x1568xf32, #tpu.memory_space<vmem>>, %arg2: memref<1568x128xbf16, #tpu.memory_space<vmem>>, %arg3: memref<1x128xf32, #tpu.memory_space<vmem>>, %arg4: memref<16x128xf32, #tpu.memory_space<vmem>>) attributes {dimension_semantics = [#tpu.dimension_semantics<arbitrary>], iteration_bounds = array<i64: 1>, scalar_prefetch = 0 : i64, scratch_operands = 0 : i64, tpu.core_type = #tpu.core_type<tc>, window_params = [{transform_indices = @transform_0, window_bounds = array<i64: 16, 1568>}, {transform_indices = @transform_1, window_bounds = array<i64: 1568, 128>}, {pipeline_mode = #tpu.pipeline_mode<synchronous>, transform_indices = @transform_2, window_bounds = array<i64: 1, 128>}, {pipeline_mode = #tpu.pipeline_mode<synchronous>, transform_indices = @transform_3, window_bounds = array<i64: 16, 128>}]} {
    %c0_i32 = arith.constant 0 : i32
    %0 = arith.cmpi eq, %arg0, %c0_i32 : i32
    %1 = arith.extui %0 : i1 to i32
    %c0_i32_0 = arith.constant 0 : i32
    %2 = arith.cmpi ne, %1, %c0_i32_0 : i32
    scf.if %2 {
      %cst_10 = arith.constant 0.000000e+00 : f32
      %13 = vector.broadcast %cst_10 : f32 to vector<16x128xf32>
      %c0_11 = arith.constant 0 : index
      %c0_12 = arith.constant 0 : index
      %14 = vector.load %arg4[%c0_11, %c0_12] : memref<16x128xf32, #tpu.memory_space<vmem>>, vector<16x128xf32>
      tpu.vector_store %arg4[%c0_11, %c0_12], %13 {strides = array<i32>} : memref<16x128xf32, #tpu.memory_space<vmem>>, vector<16x128xf32>,
    } else {
    }
    %c0 = arith.constant 0 : index
    %c0_1 = arith.constant 0 : index
    %3 = vector.load %arg4[%c0, %c0_1] : memref<16x128xf32, #tpu.memory_space<vmem>>, vector<16x128xf32>
    %c0_2 = arith.constant 0 : index
    %c0_3 = arith.constant 0 : index
    %4 = vector.load %arg1[%c0_2, %c0_3] : memref<16x1568xf32, #tpu.memory_space<vmem>>, vector<16x1568xf32>
    %c0_4 = arith.constant 0 : index
    %c0_5 = arith.constant 0 : index
    %5 = vector.load %arg2[%c0_4, %c0_5] : memref<1568x128xbf16, #tpu.memory_space<vmem>>, vector<1568x128xbf16>
    %6 = arith.truncf %4 : vector<16x1568xf32> to vector<16x1568xbf16>
    %cst = arith.constant dense<0.000000e+00> : vector<16x128xf32>
    %7 = tpu.matmul %6, %5, %cst {dimension_numbers = #tpu.dot_dimension_numbers<[1], [0], [0], [1], [0, 0, 1, 1], [], []>} : vector<16x1568xbf16>, vector<1568x128xbf16>, vector<16x128xf32> -> vector<16x128xf32>
    %8 = arith.addf %3, %7 : vector<16x128xf32>
    %c0_6 = arith.constant 0 : index
    %c0_7 = arith.constant 0 : index
    %9 = vector.load %arg4[%c0_6, %c0_7] : memref<16x128xf32, #tpu.memory_space<vmem>>, vector<16x128xf32>
    tpu.vector_store %arg4[%c0_6, %c0_7], %8 {strides = array<i32>} : memref<16x128xf32, #tpu.memory_space<vmem>>, vector<16x128xf32>,
    %c0_i32_8 = arith.constant 0 : i32
    %10 = arith.cmpi eq, %arg0, %c0_i32_8 : i32
    %11 = arith.extui %10 : i1 to i32
    %c0_i32_9 = arith.constant 0 : i32
    %12 = arith.cmpi ne, %11, %c0_i32_9 : i32
    scf.if %12 {
      %c0_10 = arith.constant 0 : index
      %c0_11 = arith.constant 0 : index
      %13 = vector.load %arg4[%c0_10, %c0_11] : memref<16x128xf32, #tpu.memory_space<vmem>>, vector<16x128xf32>
      %c0_12 = arith.constant 0 : index
      %c0_13 = arith.constant 0 : index
      %14 = vector.load %arg3[%c0_12, %c0_13] : memref<1x128xf32, #tpu.memory_space<vmem>>, vector<1x128xf32>
      %15 = vector.broadcast %14 : vector<1x128xf32> to vector<16x128xf32>
      %16 = arith.addf %13, %15 : vector<16x128xf32>
      %cst_14 = arith.constant 0.000000e+00 : f32
      %17 = vector.broadcast %cst_14 : f32 to vector<16x128xf32>
      %18 = arith.maximumf %16, %17 : vector<16x128xf32>
      %c0_15 = arith.constant 0 : index
      %c0_16 = arith.constant 0 : index
      %19 = vector.load %arg4[%c0_15, %c0_16] : memref<16x128xf32, #tpu.memory_space<vmem>>, vector<16x128xf32>
      tpu.vector_store %arg4[%c0_15, %c0_16], %18 {strides = array<i32>} : memref<16x128xf32, #tpu.memory_space<vmem>>, vector<16x128xf32>,
    } else {
    }
    return
  }
  func.func @transform_0(%arg0: i32) -> (i32, i32) {
    %c0_i32 = arith.constant 0 : i32
    %c0_i32_0 = arith.constant 0 : i32
    return %c0_i32, %arg0 : i32, i32
  }
  func.func @transform_1(%arg0: i32) -> (i32, i32) {
    %c0_i32 = arith.constant 0 : i32
    %c0_i32_0 = arith.constant 0 : i32
    return %arg0, %c0_i32 : i32, i32
  }
  func.func @transform_2(%arg0: i32) -> (i32, i32) {
    %c0_i32 = arith.constant 0 : i32
    %c0_i32_0 = arith.constant 0 : i32
    %c0_i32_1 = arith.constant 0 : i32
    return %c0_i32, %c0_i32_0 : i32, i32
  }
  func.func @transform_3(%arg0: i32) -> (i32, i32) {
    %c0_i32 = arith.constant 0 : i32
    %c0_i32_0 = arith.constant 0 : i32
    %c0_i32_1 = arith.constant 0 : i32
    return %c0_i32, %c0_i32_0 : i32, i32
  }
}

module attributes {stable_mosaic.version = 11 : i64} {
  func.func @_linear_kernel(%arg0: i32, %arg1: memref<16x256xf32, #tpu.memory_space<vmem>>, %arg2: memref<256x128xbf16, #tpu.memory_space<vmem>>, %arg3: memref<1x128xf32, #tpu.memory_space<vmem>>, %arg4: memref<16x128xf32, #tpu.memory_space<vmem>>) attributes {dimension_semantics = [#tpu.dimension_semantics<arbitrary>], iteration_bounds = array<i64: 1>, scalar_prefetch = 0 : i64, scratch_operands = 0 : i64, tpu.core_type = #tpu.core_type<tc>, window_params = [{transform_indices = @transform_0, window_bounds = array<i64: 16, 256>}, {transform_indices = @transform_1, window_bounds = array<i64: 256, 128>}, {pipeline_mode = #tpu.pipeline_mode<synchronous>, transform_indices = @transform_2, window_bounds = array<i64: 1, 128>}, {pipeline_mode = #tpu.pipeline_mode<synchronous>, transform_indices = @transform_3, window_bounds = array<i64: 16, 128>}]} {
    %c0_i32 = arith.constant 0 : i32
    %0 = arith.cmpi eq, %arg0, %c0_i32 : i32
    %1 = arith.extui %0 : i1 to i32
    %c0_i32_0 = arith.constant 0 : i32
    %2 = arith.cmpi ne, %1, %c0_i32_0 : i32
    scf.if %2 {
      %cst_10 = arith.constant 0.000000e+00 : f32
      %13 = vector.broadcast %cst_10 : f32 to vector<16x128xf32>
      %c0_11 = arith.constant 0 : index
      %c0_12 = arith.constant 0 : index
      %14 = vector.load %arg4[%c0_11, %c0_12] : memref<16x128xf32, #tpu.memory_space<vmem>>, vector<16x128xf32>
      tpu.vector_store %arg4[%c0_11, %c0_12], %13 {strides = array<i32>} : memref<16x128xf32, #tpu.memory_space<vmem>>, vector<16x128xf32>,
    } else {
    }
    %c0 = arith.constant 0 : index
    %c0_1 = arith.constant 0 : index
    %3 = vector.load %arg4[%c0, %c0_1] : memref<16x128xf32, #tpu.memory_space<vmem>>, vector<16x128xf32>
    %c0_2 = arith.constant 0 : index
    %c0_3 = arith.constant 0 : index
    %4 = vector.load %arg1[%c0_2, %c0_3] : memref<16x256xf32, #tpu.memory_space<vmem>>, vector<16x256xf32>
    %c0_4 = arith.constant 0 : index
    %c0_5 = arith.constant 0 : index
    %5 = vector.load %arg2[%c0_4, %c0_5] : memref<256x128xbf16, #tpu.memory_space<vmem>>, vector<256x128xbf16>
    %6 = arith.truncf %4 : vector<16x256xf32> to vector<16x256xbf16>
    %cst = arith.constant dense<0.000000e+00> : vector<16x128xf32>
    %7 = tpu.matmul %6, %5, %cst {dimension_numbers = #tpu.dot_dimension_numbers<[1], [0], [0], [1], [0, 0, 1, 1], [], []>} : vector<16x256xbf16>, vector<256x128xbf16>, vector<16x128xf32> -> vector<16x128xf32>
    %8 = arith.addf %3, %7 : vector<16x128xf32>
    %c0_6 = arith.constant 0 : index
    %c0_7 = arith.constant 0 : index
    %9 = vector.load %arg4[%c0_6, %c0_7] : memref<16x128xf32, #tpu.memory_space<vmem>>, vector<16x128xf32>
    tpu.vector_store %arg4[%c0_6, %c0_7], %8 {strides = array<i32>} : memref<16x128xf32, #tpu.memory_space<vmem>>, vector<16x128xf32>,
    %c0_i32_8 = arith.constant 0 : i32
    %10 = arith.cmpi eq, %arg0, %c0_i32_8 : i32
    %11 = arith.extui %10 : i1 to i32
    %c0_i32_9 = arith.constant 0 : i32
    %12 = arith.cmpi ne, %11, %c0_i32_9 : i32
    scf.if %12 {
      %c0_10 = arith.constant 0 : index
      %c0_11 = arith.constant 0 : index
      %13 = vector.load %arg4[%c0_10, %c0_11] : memref<16x128xf32, #tpu.memory_space<vmem>>, vector<16x128xf32>
      %c0_12 = arith.constant 0 : index
      %c0_13 = arith.constant 0 : index
      %14 = vector.load %arg3[%c0_12, %c0_13] : memref<1x128xf32, #tpu.memory_space<vmem>>, vector<1x128xf32>
      %15 = vector.broadcast %14 : vector<1x128xf32> to vector<16x128xf32>
      %16 = arith.addf %13, %15 : vector<16x128xf32>
      %cst_14 = arith.constant 0.000000e+00 : f32
      %17 = vector.broadcast %cst_14 : f32 to vector<16x128xf32>
      %18 = arith.maximumf %16, %17 : vector<16x128xf32>
      %c0_15 = arith.constant 0 : index
      %c0_16 = arith.constant 0 : index
      %19 = vector.load %arg4[%c0_15, %c0_16] : memref<16x128xf32, #tpu.memory_space<vmem>>, vector<16x128xf32>
      tpu.vector_store %arg4[%c0_15, %c0_16], %18 {strides = array<i32>} : memref<16x128xf32, #tpu.memory_space<vmem>>, vector<16x128xf32>,
    } else {
    }
    return
  }
  func.func @transform_0(%arg0: i32) -> (i32, i32) {
    %c0_i32 = arith.constant 0 : i32
    %c0_i32_0 = arith.constant 0 : i32
    return %c0_i32, %arg0 : i32, i32
  }
  func.func @transform_1(%arg0: i32) -> (i32, i32) {
    %c0_i32 = arith.constant 0 : i32
    %c0_i32_0 = arith.constant 0 : i32
    return %arg0, %c0_i32 : i32, i32
  }
  func.func @transform_2(%arg0: i32) -> (i32, i32) {
    %c0_i32 = arith.constant 0 : i32
    %c0_i32_0 = arith.constant 0 : i32
    %c0_i32_1 = arith.constant 0 : i32
    return %c0_i32, %c0_i32_0 : i32, i32
  }
  func.func @transform_3(%arg0: i32) -> (i32, i32) {
    %c0_i32 = arith.constant 0 : i32
    %c0_i32_0 = arith.constant 0 : i32
    %c0_i32_1 = arith.constant 0 : i32
    return %c0_i32, %c0_i32_0 : i32, i32
  }
}

module attributes {stable_mosaic.version = 11 : i64} {
  func.func @_merge_kernel(%arg0: i32, %arg1: memref<16x128xf32, #tpu.memory_space<vmem>>, %arg2: memref<16x128xf32, #tpu.memory_space<vmem>>, %arg3: memref<128x128xbf16, #tpu.memory_space<vmem>>, %arg4: memref<128x128xbf16, #tpu.memory_space<vmem>>, %arg5: memref<1x128xf32, #tpu.memory_space<vmem>>, %arg6: memref<16x128xf32, #tpu.memory_space<vmem>>) attributes {dimension_semantics = [#tpu.dimension_semantics<arbitrary>], iteration_bounds = array<i64: 1>, scalar_prefetch = 0 : i64, scratch_operands = 0 : i64, tpu.core_type = #tpu.core_type<tc>, window_params = [{pipeline_mode = #tpu.pipeline_mode<synchronous>, transform_indices = @transform_0, window_bounds = array<i64: 16, 128>}, {pipeline_mode = #tpu.pipeline_mode<synchronous>, transform_indices = @transform_1, window_bounds = array<i64: 16, 128>}, {pipeline_mode = #tpu.pipeline_mode<synchronous>, transform_indices = @transform_2, window_bounds = array<i64: 128, 128>}, {pipeline_mode = #tpu.pipeline_mode<synchronous>, transform_indices = @transform_3, window_bounds = array<i64: 128, 128>}, {pipeline_mode = #tpu.pipeline_mode<synchronous>, transform_indices = @transform_4, window_bounds = array<i64: 1, 128>}, {pipeline_mode = #tpu.pipeline_mode<synchronous>, transform_indices = @transform_5, window_bounds = array<i64: 16, 128>}]} {
    %c0 = arith.constant 0 : index
    %c0_0 = arith.constant 0 : index
    %0 = vector.load %arg1[%c0, %c0_0] : memref<16x128xf32, #tpu.memory_space<vmem>>, vector<16x128xf32>
    %c0_1 = arith.constant 0 : index
    %c0_2 = arith.constant 0 : index
    %1 = vector.load %arg3[%c0_1, %c0_2] : memref<128x128xbf16, #tpu.memory_space<vmem>>, vector<128x128xbf16>
    %2 = arith.truncf %0 : vector<16x128xf32> to vector<16x128xbf16>
    %cst = arith.constant dense<0.000000e+00> : vector<16x128xf32>
    %3 = tpu.matmul %2, %1, %cst {dimension_numbers = #tpu.dot_dimension_numbers<[1], [0], [0], [1], [0, 0, 1, 1], [], []>} : vector<16x128xbf16>, vector<128x128xbf16>, vector<16x128xf32> -> vector<16x128xf32>
    %c0_3 = arith.constant 0 : index
    %c0_4 = arith.constant 0 : index
    %4 = vector.load %arg2[%c0_3, %c0_4] : memref<16x128xf32, #tpu.memory_space<vmem>>, vector<16x128xf32>
    %c0_5 = arith.constant 0 : index
    %c0_6 = arith.constant 0 : index
    %5 = vector.load %arg4[%c0_5, %c0_6] : memref<128x128xbf16, #tpu.memory_space<vmem>>, vector<128x128xbf16>
    %6 = arith.truncf %4 : vector<16x128xf32> to vector<16x128xbf16>
    %cst_7 = arith.constant dense<0.000000e+00> : vector<16x128xf32>
    %7 = tpu.matmul %6, %5, %cst_7 {dimension_numbers = #tpu.dot_dimension_numbers<[1], [0], [0], [1], [0, 0, 1, 1], [], []>} : vector<16x128xbf16>, vector<128x128xbf16>, vector<16x128xf32> -> vector<16x128xf32>
    %8 = arith.addf %3, %7 : vector<16x128xf32>
    %c0_8 = arith.constant 0 : index
    %c0_9 = arith.constant 0 : index
    %9 = vector.load %arg5[%c0_8, %c0_9] : memref<1x128xf32, #tpu.memory_space<vmem>>, vector<1x128xf32>
    %10 = vector.broadcast %9 : vector<1x128xf32> to vector<16x128xf32>
    %11 = arith.addf %8, %10 : vector<16x128xf32>
    %cst_10 = arith.constant 0.000000e+00 : f32
    %12 = vector.broadcast %cst_10 : f32 to vector<16x128xf32>
    %13 = arith.maximumf %11, %12 : vector<16x128xf32>
    %c0_11 = arith.constant 0 : index
    %c0_12 = arith.constant 0 : index
    %14 = vector.load %arg6[%c0_11, %c0_12] : memref<16x128xf32, #tpu.memory_space<vmem>>, vector<16x128xf32>
    tpu.vector_store %arg6[%c0_11, %c0_12], %13 {strides = array<i32>} : memref<16x128xf32, #tpu.memory_space<vmem>>, vector<16x128xf32>,
    return
  }
  func.func @transform_0(%arg0: i32) -> (i32, i32) {
    %c0_i32 = arith.constant 0 : i32
    %c0_i32_0 = arith.constant 0 : i32
    %c0_i32_1 = arith.constant 0 : i32
    return %c0_i32, %c0_i32_0 : i32, i32
  }
  func.func @transform_1(%arg0: i32) -> (i32, i32) {
    %c0_i32 = arith.constant 0 : i32
    %c0_i32_0 = arith.constant 0 : i32
    %c0_i32_1 = arith.constant 0 : i32
    return %c0_i32, %c0_i32_0 : i32, i32
  }
  func.func @transform_2(%arg0: i32) -> (i32, i32) {
    %c0_i32 = arith.constant 0 : i32
    %c0_i32_0 = arith.constant 0 : i32
    %c0_i32_1 = arith.constant 0 : i32
    return %c0_i32, %c0_i32_0 : i32, i32
  }
  func.func @transform_3(%arg0: i32) -> (i32, i32) {
    %c0_i32 = arith.constant 0 : i32
    %c0_i32_0 = arith.constant 0 : i32
    %c0_i32_1 = arith.constant 0 : i32
    return %c0_i32, %c0_i32_0 : i32, i32
  }
  func.func @transform_4(%arg0: i32) -> (i32, i32) {
    %c0_i32 = arith.constant 0 : i32
    %c0_i32_0 = arith.constant 0 : i32
    %c0_i32_1 = arith.constant 0 : i32
    return %c0_i32, %c0_i32_0 : i32, i32
  }
  func.func @transform_5(%arg0: i32) -> (i32, i32) {
    %c0_i32 = arith.constant 0 : i32
    %c0_i32_0 = arith.constant 0 : i32
    %c0_i32_1 = arith.constant 0 : i32
    return %c0_i32, %c0_i32_0 : i32, i32
  }
}

module attributes {stable_mosaic.version = 11 : i64} {
  func.func @_encoder_layer_kernel(%arg0: i32, %arg1: memref<16x128xf32, #tpu.memory_space<vmem>>, %arg2: memref<16x16xf32, #tpu.memory_space<vmem>>, %arg3: memref<1x128x384xbf16, #tpu.memory_space<vmem>>, %arg4: memref<1x1x384xf32, #tpu.memory_space<vmem>>, %arg5: memref<1x128x128xbf16, #tpu.memory_space<vmem>>, %arg6: memref<1x1x128xf32, #tpu.memory_space<vmem>>, %arg7: memref<1x1x128xf32, #tpu.memory_space<vmem>>, %arg8: memref<1x1x128xf32, #tpu.memory_space<vmem>>, %arg9: memref<1x128x512xbf16, #tpu.memory_space<vmem>>, %arg10: memref<1x1x512xf32, #tpu.memory_space<vmem>>, %arg11: memref<1x512x128xbf16, #tpu.memory_space<vmem>>, %arg12: memref<1x1x128xf32, #tpu.memory_space<vmem>>, %arg13: memref<1x1x128xf32, #tpu.memory_space<vmem>>, %arg14: memref<1x1x128xf32, #tpu.memory_space<vmem>>, %arg15: memref<16x128xf32, #tpu.memory_space<vmem>>) attributes {dimension_semantics = [#tpu.dimension_semantics<arbitrary>], iteration_bounds = array<i64: 2>, scalar_prefetch = 0 : i64, scratch_operands = 0 : i64, tpu.core_type = #tpu.core_type<tc>, window_params = [{pipeline_mode = #tpu.pipeline_mode<synchronous>, transform_indices = @transform_0, window_bounds = array<i64: 16, 128>}, {pipeline_mode = #tpu.pipeline_mode<synchronous>, transform_indices = @transform_1, window_bounds = array<i64: 16, 16>}, {transform_indices = @transform_2, window_bounds = array<i64: 1, 128, 384>}, {transform_indices = @transform_3, window_bounds = array<i64: 1, 1, 384>}, {transform_indices = @transform_4, window_bounds = array<i64: 1, 128, 128>}, {transform_indices = @transform_5, window_bounds = array<i64: 1, 1, 128>}, {transform_indices = @transform_6, window_bounds = array<i64: 1, 1, 128>}, {transform_indices = @transform_7, window_bounds = array<i64: 1, 1, 128>}, {transform_indices = @transform_8, window_bounds = array<i64: 1, 128, 512>}, {transform_indices = @transform_9, window_bounds = array<i64: 1, 1, 512>}, {transform_indices = @transform_10, window_bounds = array<i64: 1, 512, 128>}, {transform_indices = @transform_11, window_bounds = array<i64: 1, 1, 128>}, {transform_indices = @transform_12, window_bounds = array<i64: 1, 1, 128>}, {transform_indices = @transform_13, window_bounds = array<i64: 1, 1, 128>}, {pipeline_mode = #tpu.pipeline_mode<synchronous>, transform_indices = @transform_14, window_bounds = array<i64: 16, 128>}]} {
    %c0_i32 = arith.constant 0 : i32
    %0 = arith.cmpi eq, %arg0, %c0_i32 : i32
    %1 = arith.extui %0 : i1 to i32
    %c0_i32_0 = arith.constant 0 : i32
    %2 = arith.cmpi ne, %1, %c0_i32_0 : i32
    scf.if %2 {
      %c0_75 = arith.constant 0 : index
      %c0_76 = arith.constant 0 : index
      %175 = vector.load %arg1[%c0_75, %c0_76] : memref<16x128xf32, #tpu.memory_space<vmem>>, vector<16x128xf32>
      %c0_77 = arith.constant 0 : index
      %c0_78 = arith.constant 0 : index
      %176 = vector.load %arg15[%c0_77, %c0_78] : memref<16x128xf32, #tpu.memory_space<vmem>>, vector<16x128xf32>
      tpu.vector_store %arg15[%c0_77, %c0_78], %175 {strides = array<i32>} : memref<16x128xf32, #tpu.memory_space<vmem>>, vector<16x128xf32>,
    } else {
    }
    %c0 = arith.constant 0 : index
    %c0_1 = arith.constant 0 : index
    %3 = vector.load %arg15[%c0, %c0_1] : memref<16x128xf32, #tpu.memory_space<vmem>>, vector<16x128xf32>
    %c0_2 = arith.constant 0 : index
    %c0_3 = arith.constant 0 : index
    %c0_4 = arith.constant 0 : index
    %4 = vector.load %arg3[%c0_2, %c0_3, %c0_4] : memref<1x128x384xbf16, #tpu.memory_space<vmem>>, vector<1x128x384xbf16>
    %5 = vector.shape_cast %4 : vector<1x128x384xbf16> to vector<128x384xbf16>
    %6 = arith.truncf %3 : vector<16x128xf32> to vector<16x128xbf16>
    %cst = arith.constant dense<0.000000e+00> : vector<16x384xf32>
    %7 = tpu.matmul %6, %5, %cst {dimension_numbers = #tpu.dot_dimension_numbers<[1], [0], [0], [1], [0, 0, 1, 1], [], []>} : vector<16x128xbf16>, vector<128x384xbf16>, vector<16x384xf32> -> vector<16x384xf32>
    %c0_5 = arith.constant 0 : index
    %c0_6 = arith.constant 0 : index
    %c0_7 = arith.constant 0 : index
    %8 = vector.load %arg4[%c0_5, %c0_6, %c0_7] : memref<1x1x384xf32, #tpu.memory_space<vmem>>, vector<1x1x384xf32>
    %9 = vector.shape_cast %8 : vector<1x1x384xf32> to vector<1x384xf32>
    %10 = vector.broadcast %9 : vector<1x384xf32> to vector<16x384xf32>
    %11 = arith.addf %7, %10 : vector<16x384xf32>
    %12 = arith.truncf %11 : vector<16x384xf32> to vector<16x384xbf16>
    %c0_8 = arith.constant 0 : index
    %c0_9 = arith.constant 0 : index
    %13 = vector.load %arg2[%c0_8, %c0_9] : memref<16x16xf32, #tpu.memory_space<vmem>>, vector<16x16xf32>
    %14 = vector.extract_strided_slice %12 {offsets = [0, 0], sizes = [16, 32], strides = [1, 1]} : vector<16x384xbf16> to vector<16x32xbf16>
    %15 = vector.extract_strided_slice %12 {offsets = [0, 128], sizes = [16, 32], strides = [1, 1]} : vector<16x384xbf16> to vector<16x32xbf16>
    %16 = vector.extract_strided_slice %12 {offsets = [0, 256], sizes = [16, 32], strides = [1, 1]} : vector<16x384xbf16> to vector<16x32xbf16>
    %cst_10 = arith.constant dense<0.000000e+00> : vector<16x16xf32>
    %17 = tpu.matmul %14, %15, %cst_10 {dimension_numbers = #tpu.dot_dimension_numbers<[1], [1], [0], [0], [0, 0, 1, 0], [], []>} : vector<16x32xbf16>, vector<16x32xbf16>, vector<16x16xf32> -> vector<16x16xf32>
    %18 = arith.addf %17, %13 : vector<16x16xf32>
    %cst_11 = arith.constant dense<0xFF800000> : vector<16xf32>
    %19 = vector.multi_reduction <maximumf>, %18, %cst_11 [1] : vector<16x16xf32> to vector<16xf32>
    %20 = vector.shape_cast %19 : vector<16xf32> to vector<16x1xf32>
    %21 = vector.broadcast %20 : vector<16x1xf32> to vector<16x16xf32>
    %22 = arith.subf %18, %21 : vector<16x16xf32>
    %23 = math.exp %22 : vector<16x16xf32>
    %cst_12 = arith.constant dense<0.000000e+00> : vector<16xf32>
    %24 = vector.multi_reduction <add>, %23, %cst_12 [1] : vector<16x16xf32> to vector<16xf32>
    %25 = vector.shape_cast %24 : vector<16xf32> to vector<16x1xf32>
    %26 = tpu.reciprocal %25 {approx = true} : vector<16x1xf32> -> vector<16x1xf32>
    %27 = vector.broadcast %26 : vector<16x1xf32> to vector<16x16xf32>
    %28 = arith.mulf %23, %27 : vector<16x16xf32>
    %29 = arith.truncf %28 : vector<16x16xf32> to vector<16x16xbf16>
    %cst_13 = arith.constant dense<0.000000e+00> : vector<16x32xf32>
    %30 = tpu.matmul %29, %16, %cst_13 {dimension_numbers = #tpu.dot_dimension_numbers<[1], [0], [0], [1], [0, 0, 1, 1], [], []>} : vector<16x16xbf16>, vector<16x32xbf16>, vector<16x32xf32> -> vector<16x32xf32>
    %31 = vector.extract_strided_slice %12 {offsets = [0, 32], sizes = [16, 32], strides = [1, 1]} : vector<16x384xbf16> to vector<16x32xbf16>
    %32 = vector.extract_strided_slice %12 {offsets = [0, 160], sizes = [16, 32], strides = [1, 1]} : vector<16x384xbf16> to vector<16x32xbf16>
    %33 = vector.extract_strided_slice %12 {offsets = [0, 288], sizes = [16, 32], strides = [1, 1]} : vector<16x384xbf16> to vector<16x32xbf16>
    %cst_14 = arith.constant dense<0.000000e+00> : vector<16x16xf32>
    %34 = tpu.matmul %31, %32, %cst_14 {dimension_numbers = #tpu.dot_dimension_numbers<[1], [1], [0], [0], [0, 0, 1, 0], [], []>} : vector<16x32xbf16>, vector<16x32xbf16>, vector<16x16xf32> -> vector<16x16xf32>
    %35 = arith.addf %34, %13 : vector<16x16xf32>
    %cst_15 = arith.constant dense<0xFF800000> : vector<16xf32>
    %36 = vector.multi_reduction <maximumf>, %35, %cst_15 [1] : vector<16x16xf32> to vector<16xf32>
    %37 = vector.shape_cast %36 : vector<16xf32> to vector<16x1xf32>
    %38 = vector.broadcast %37 : vector<16x1xf32> to vector<16x16xf32>
    %39 = arith.subf %35, %38 : vector<16x16xf32>
    %40 = math.exp %39 : vector<16x16xf32>
    %cst_16 = arith.constant dense<0.000000e+00> : vector<16xf32>
    %41 = vector.multi_reduction <add>, %40, %cst_16 [1] : vector<16x16xf32> to vector<16xf32>
    %42 = vector.shape_cast %41 : vector<16xf32> to vector<16x1xf32>
    %43 = tpu.reciprocal %42 {approx = true} : vector<16x1xf32> -> vector<16x1xf32>
    %44 = vector.broadcast %43 : vector<16x1xf32> to vector<16x16xf32>
    %45 = arith.mulf %40, %44 : vector<16x16xf32>
    %46 = arith.truncf %45 : vector<16x16xf32> to vector<16x16xbf16>
    %cst_17 = arith.constant dense<0.000000e+00> : vector<16x32xf32>
    %47 = tpu.matmul %46, %33, %cst_17 {dimension_numbers = #tpu.dot_dimension_numbers<[1], [0], [0], [1], [0, 0, 1, 1], [], []>} : vector<16x16xbf16>, vector<16x32xbf16>, vector<16x32xf32> -> vector<16x32xf32>
    %48 = vector.extract_strided_slice %12 {offsets = [0, 64], sizes = [16, 32], strides = [1, 1]} : vector<16x384xbf16> to vector<16x32xbf16>
    %49 = vector.extract_strided_slice %12 {offsets = [0, 192], sizes = [16, 32], strides = [1, 1]} : vector<16x384xbf16> to vector<16x32xbf16>
    %50 = vector.extract_strided_slice %12 {offsets = [0, 320], sizes = [16, 32], strides = [1, 1]} : vector<16x384xbf16> to vector<16x32xbf16>
    %cst_18 = arith.constant dense<0.000000e+00> : vector<16x16xf32>
    %51 = tpu.matmul %48, %49, %cst_18 {dimension_numbers = #tpu.dot_dimension_numbers<[1], [1], [0], [0], [0, 0, 1, 0], [], []>} : vector<16x32xbf16>, vector<16x32xbf16>, vector<16x16xf32> -> vector<16x16xf32>
    %52 = arith.addf %51, %13 : vector<16x16xf32>
    %cst_19 = arith.constant dense<0xFF800000> : vector<16xf32>
    %53 = vector.multi_reduction <maximumf>, %52, %cst_19 [1] : vector<16x16xf32> to vector<16xf32>
    %54 = vector.shape_cast %53 : vector<16xf32> to vector<16x1xf32>
    %55 = vector.broadcast %54 : vector<16x1xf32> to vector<16x16xf32>
    %56 = arith.subf %52, %55 : vector<16x16xf32>
    %57 = math.exp %56 : vector<16x16xf32>
    %cst_20 = arith.constant dense<0.000000e+00> : vector<16xf32>
    %58 = vector.multi_reduction <add>, %57, %cst_20 [1] : vector<16x16xf32> to vector<16xf32>
    %59 = vector.shape_cast %58 : vector<16xf32> to vector<16x1xf32>
    %60 = tpu.reciprocal %59 {approx = true} : vector<16x1xf32> -> vector<16x1xf32>
    %61 = vector.broadcast %60 : vector<16x1xf32> to vector<16x16xf32>
    %62 = arith.mulf %57, %61 : vector<16x16xf32>
    %63 = arith.truncf %62 : vector<16x16xf32> to vector<16x16xbf16>
    %cst_21 = arith.constant dense<0.000000e+00> : vector<16x32xf32>
    %64 = tpu.matmul %63, %50, %cst_21 {dimension_numbers = #tpu.dot_dimension_numbers<[1], [0], [0], [1], [0, 0, 1, 1], [], []>} : vector<16x16xbf16>, vector<16x32xbf16>, vector<16x32xf32> -> vector<16x32xf32>
    %65 = vector.extract_strided_slice %12 {offsets = [0, 96], sizes = [16, 32], strides = [1, 1]} : vector<16x384xbf16> to vector<16x32xbf16>
    %66 = vector.extract_strided_slice %12 {offsets = [0, 224], sizes = [16, 32], strides = [1, 1]} : vector<16x384xbf16> to vector<16x32xbf16>
    %67 = vector.extract_strided_slice %12 {offsets = [0, 352], sizes = [16, 32], strides = [1, 1]} : vector<16x384xbf16> to vector<16x32xbf16>
    %cst_22 = arith.constant dense<0.000000e+00> : vector<16x16xf32>
    %68 = tpu.matmul %65, %66, %cst_22 {dimension_numbers = #tpu.dot_dimension_numbers<[1], [1], [0], [0], [0, 0, 1, 0], [], []>} : vector<16x32xbf16>, vector<16x32xbf16>, vector<16x16xf32> -> vector<16x16xf32>
    %69 = arith.addf %68, %13 : vector<16x16xf32>
    %cst_23 = arith.constant dense<0xFF800000> : vector<16xf32>
    %70 = vector.multi_reduction <maximumf>, %69, %cst_23 [1] : vector<16x16xf32> to vector<16xf32>
    %71 = vector.shape_cast %70 : vector<16xf32> to vector<16x1xf32>
    %72 = vector.broadcast %71 : vector<16x1xf32> to vector<16x16xf32>
    %73 = arith.subf %69, %72 : vector<16x16xf32>
    %74 = math.exp %73 : vector<16x16xf32>
    %cst_24 = arith.constant dense<0.000000e+00> : vector<16xf32>
    %75 = vector.multi_reduction <add>, %74, %cst_24 [1] : vector<16x16xf32> to vector<16xf32>
    %76 = vector.shape_cast %75 : vector<16xf32> to vector<16x1xf32>
    %77 = tpu.reciprocal %76 {approx = true} : vector<16x1xf32> -> vector<16x1xf32>
    %78 = vector.broadcast %77 : vector<16x1xf32> to vector<16x16xf32>
    %79 = arith.mulf %74, %78 : vector<16x16xf32>
    %80 = arith.truncf %79 : vector<16x16xf32> to vector<16x16xbf16>
    %cst_25 = arith.constant dense<0.000000e+00> : vector<16x32xf32>
    %81 = tpu.matmul %80, %67, %cst_25 {dimension_numbers = #tpu.dot_dimension_numbers<[1], [0], [0], [1], [0, 0, 1, 1], [], []>} : vector<16x16xbf16>, vector<16x32xbf16>, vector<16x32xf32> -> vector<16x32xf32>
    %82 = tpu.concatenate %30, %47, %64, %81 in 1 : vector<16x32xf32>, vector<16x32xf32>, vector<16x32xf32>, vector<16x32xf32> -> vector<16x128xf32>
    %c0_26 = arith.constant 0 : index
    %c0_27 = arith.constant 0 : index
    %c0_28 = arith.constant 0 : index
    %83 = vector.load %arg5[%c0_26, %c0_27, %c0_28] : memref<1x128x128xbf16, #tpu.memory_space<vmem>>, vector<1x128x128xbf16>
    %84 = vector.shape_cast %83 : vector<1x128x128xbf16> to vector<128x128xbf16>
    %85 = arith.truncf %82 : vector<16x128xf32> to vector<16x128xbf16>
    %cst_29 = arith.constant dense<0.000000e+00> : vector<16x128xf32>
    %86 = tpu.matmul %85, %84, %cst_29 {dimension_numbers = #tpu.dot_dimension_numbers<[1], [0], [0], [1], [0, 0, 1, 1], [], []>} : vector<16x128xbf16>, vector<128x128xbf16>, vector<16x128xf32> -> vector<16x128xf32>
    %c0_30 = arith.constant 0 : index
    %c0_31 = arith.constant 0 : index
    %c0_32 = arith.constant 0 : index
    %87 = vector.load %arg6[%c0_30, %c0_31, %c0_32] : memref<1x1x128xf32, #tpu.memory_space<vmem>>, vector<1x1x128xf32>
    %88 = vector.shape_cast %87 : vector<1x1x128xf32> to vector<1x128xf32>
    %89 = vector.broadcast %88 : vector<1x128xf32> to vector<16x128xf32>
    %90 = arith.addf %86, %89 : vector<16x128xf32>
    %91 = arith.addf %90, %3 : vector<16x128xf32>
    %c0_33 = arith.constant 0 : index
    %c0_34 = arith.constant 0 : index
    %c0_35 = arith.constant 0 : index
    %92 = vector.load %arg7[%c0_33, %c0_34, %c0_35] : memref<1x1x128xf32, #tpu.memory_space<vmem>>, vector<1x1x128xf32>
    %93 = vector.shape_cast %92 : vector<1x1x128xf32> to vector<1x128xf32>
    %c0_36 = arith.constant 0 : index
    %c0_37 = arith.constant 0 : index
    %c0_38 = arith.constant 0 : index
    %94 = vector.load %arg8[%c0_36, %c0_37, %c0_38] : memref<1x1x128xf32, #tpu.memory_space<vmem>>, vector<1x1x128xf32>
    %95 = vector.shape_cast %94 : vector<1x1x128xf32> to vector<1x128xf32>
    %cst_39 = arith.constant dense<0.000000e+00> : vector<16xf32>
    %96 = vector.multi_reduction <add>, %91, %cst_39 [1] : vector<16x128xf32> to vector<16xf32>
    %97 = vector.shape_cast %96 : vector<16xf32> to vector<16x1xf32>
    %cst_40 = arith.constant 1.280000e+02 : f32
    %98 = vector.broadcast %cst_40 : f32 to vector<16x1xf32>
    %99 = arith.divf %97, %98 : vector<16x1xf32>
    %100 = vector.broadcast %99 : vector<16x1xf32> to vector<16x128xf32>
    %101 = arith.subf %91, %100 : vector<16x128xf32>
    %102 = arith.mulf %101, %101 : vector<16x128xf32>
    %cst_41 = arith.constant dense<0.000000e+00> : vector<16xf32>
    %103 = vector.multi_reduction <add>, %102, %cst_41 [1] : vector<16x128xf32> to vector<16xf32>
    %104 = vector.shape_cast %103 : vector<16xf32> to vector<16x1xf32>
    %cst_42 = arith.constant 1.280000e+02 : f32
    %105 = vector.broadcast %cst_42 : f32 to vector<16x1xf32>
    %106 = arith.divf %104, %105 : vector<16x1xf32>
    %107 = vector.broadcast %99 : vector<16x1xf32> to vector<16x128xf32>
    %108 = arith.subf %91, %107 : vector<16x128xf32>
    %cst_43 = arith.constant 9.99999996E-13 : f32
    %109 = vector.broadcast %cst_43 : f32 to vector<16x1xf32>
    %110 = arith.addf %106, %109 : vector<16x1xf32>
    %111 = math.rsqrt %110 : vector<16x1xf32>
    %112 = vector.broadcast %111 : vector<16x1xf32> to vector<16x128xf32>
    %113 = arith.mulf %108, %112 : vector<16x128xf32>
    %114 = vector.broadcast %93 : vector<1x128xf32> to vector<16x128xf32>
    %115 = arith.mulf %113, %114 : vector<16x128xf32>
    %116 = vector.broadcast %95 : vector<1x128xf32> to vector<16x128xf32>
    %117 = arith.addf %115, %116 : vector<16x128xf32>
    %c0_44 = arith.constant 0 : index
    %c0_45 = arith.constant 0 : index
    %c0_46 = arith.constant 0 : index
    %118 = vector.load %arg9[%c0_44, %c0_45, %c0_46] : memref<1x128x512xbf16, #tpu.memory_space<vmem>>, vector<1x128x512xbf16>
    %119 = vector.shape_cast %118 : vector<1x128x512xbf16> to vector<128x512xbf16>
    %120 = arith.truncf %117 : vector<16x128xf32> to vector<16x128xbf16>
    %cst_47 = arith.constant dense<0.000000e+00> : vector<16x512xf32>
    %121 = tpu.matmul %120, %119, %cst_47 {dimension_numbers = #tpu.dot_dimension_numbers<[1], [0], [0], [1], [0, 0, 1, 1], [], []>} : vector<16x128xbf16>, vector<128x512xbf16>, vector<16x512xf32> -> vector<16x512xf32>
    %c0_48 = arith.constant 0 : index
    %c0_49 = arith.constant 0 : index
    %c0_50 = arith.constant 0 : index
    %122 = vector.load %arg10[%c0_48, %c0_49, %c0_50] : memref<1x1x512xf32, #tpu.memory_space<vmem>>, vector<1x1x512xf32>
    %123 = vector.shape_cast %122 : vector<1x1x512xf32> to vector<1x512xf32>
    %124 = vector.broadcast %123 : vector<1x512xf32> to vector<16x512xf32>
    %125 = arith.addf %121, %124 : vector<16x512xf32>
    %cst_51 = arith.constant 5.000000e-01 : f32
    %126 = vector.broadcast %cst_51 : f32 to vector<16x512xf32>
    %127 = arith.mulf %126, %125 : vector<16x512xf32>
    %cst_52 = arith.constant 4.471500e-02 : f32
    %128 = vector.broadcast %cst_52 : f32 to vector<16x512xf32>
    %129 = arith.mulf %128, %125 : vector<16x512xf32>
    %130 = arith.mulf %129, %125 : vector<16x512xf32>
    %131 = arith.mulf %130, %125 : vector<16x512xf32>
    %132 = arith.addf %125, %131 : vector<16x512xf32>
    %cst_53 = arith.constant 0.797884583 : f32
    %133 = vector.broadcast %cst_53 : f32 to vector<16x512xf32>
    %134 = arith.mulf %133, %132 : vector<16x512xf32>
    %135 = math.tanh %134 : vector<16x512xf32>
    %cst_54 = arith.constant 1.000000e+00 : f32
    %136 = vector.broadcast %cst_54 : f32 to vector<16x512xf32>
    %137 = arith.addf %136, %135 : vector<16x512xf32>
    %138 = arith.mulf %127, %137 : vector<16x512xf32>
    %c0_55 = arith.constant 0 : index
    %c0_56 = arith.constant 0 : index
    %c0_57 = arith.constant 0 : index
    %139 = vector.load %arg11[%c0_55, %c0_56, %c0_57] : memref<1x512x128xbf16, #tpu.memory_space<vmem>>, vector<1x512x128xbf16>
    %140 = vector.shape_cast %139 : vector<1x512x128xbf16> to vector<512x128xbf16>
    %141 = arith.truncf %138 : vector<16x512xf32> to vector<16x512xbf16>
    %cst_58 = arith.constant dense<0.000000e+00> : vector<16x128xf32>
    %142 = tpu.matmul %141, %140, %cst_58 {dimension_numbers = #tpu.dot_dimension_numbers<[1], [0], [0], [1], [0, 0, 1, 1], [], []>} : vector<16x512xbf16>, vector<512x128xbf16>, vector<16x128xf32> -> vector<16x128xf32>
    %c0_59 = arith.constant 0 : index
    %c0_60 = arith.constant 0 : index
    %c0_61 = arith.constant 0 : index
    %143 = vector.load %arg12[%c0_59, %c0_60, %c0_61] : memref<1x1x128xf32, #tpu.memory_space<vmem>>, vector<1x1x128xf32>
    %144 = vector.shape_cast %143 : vector<1x1x128xf32> to vector<1x128xf32>
    %145 = vector.broadcast %144 : vector<1x128xf32> to vector<16x128xf32>
    %146 = arith.addf %142, %145 : vector<16x128xf32>
    %147 = arith.addf %146, %117 : vector<16x128xf32>
    %c0_62 = arith.constant 0 : index
    %c0_63 = arith.constant 0 : index
    %c0_64 = arith.constant 0 : index
    %148 = vector.load %arg13[%c0_62, %c0_63, %c0_64] : memref<1x1x128xf32, #tpu.memory_space<vmem>>, vector<1x1x128xf32>
    %149 = vector.shape_cast %148 : vector<1x1x128xf32> to vector<1x128xf32>
    %c0_65 = arith.constant 0 : index
    %c0_66 = arith.constant 0 : index
    %c0_67 = arith.constant 0 : index
    %150 = vector.load %arg14[%c0_65, %c0_66, %c0_67] : memref<1x1x128xf32, #tpu.memory_space<vmem>>, vector<1x1x128xf32>
    %151 = vector.shape_cast %150 : vector<1x1x128xf32> to vector<1x128xf32>
    %cst_68 = arith.constant dense<0.000000e+00> : vector<16xf32>
    %152 = vector.multi_reduction <add>, %147, %cst_68 [1] : vector<16x128xf32> to vector<16xf32>
    %153 = vector.shape_cast %152 : vector<16xf32> to vector<16x1xf32>
    %cst_69 = arith.constant 1.280000e+02 : f32
    %154 = vector.broadcast %cst_69 : f32 to vector<16x1xf32>
    %155 = arith.divf %153, %154 : vector<16x1xf32>
    %156 = vector.broadcast %155 : vector<16x1xf32> to vector<16x128xf32>
    %157 = arith.subf %147, %156 : vector<16x128xf32>
    %158 = arith.mulf %157, %157 : vector<16x128xf32>
    %cst_70 = arith.constant dense<0.000000e+00> : vector<16xf32>
    %159 = vector.multi_reduction <add>, %158, %cst_70 [1] : vector<16x128xf32> to vector<16xf32>
    %160 = vector.shape_cast %159 : vector<16xf32> to vector<16x1xf32>
    %cst_71 = arith.constant 1.280000e+02 : f32
    %161 = vector.broadcast %cst_71 : f32 to vector<16x1xf32>
    %162 = arith.divf %160, %161 : vector<16x1xf32>
    %163 = vector.broadcast %155 : vector<16x1xf32> to vector<16x128xf32>
    %164 = arith.subf %147, %163 : vector<16x128xf32>
    %cst_72 = arith.constant 9.99999996E-13 : f32
    %165 = vector.broadcast %cst_72 : f32 to vector<16x1xf32>
    %166 = arith.addf %162, %165 : vector<16x1xf32>
    %167 = math.rsqrt %166 : vector<16x1xf32>
    %168 = vector.broadcast %167 : vector<16x1xf32> to vector<16x128xf32>
    %169 = arith.mulf %164, %168 : vector<16x128xf32>
    %170 = vector.broadcast %149 : vector<1x128xf32> to vector<16x128xf32>
    %171 = arith.mulf %169, %170 : vector<16x128xf32>
    %172 = vector.broadcast %151 : vector<1x128xf32> to vector<16x128xf32>
    %173 = arith.addf %171, %172 : vector<16x128xf32>
    %c0_73 = arith.constant 0 : index
    %c0_74 = arith.constant 0 : index
    %174 = vector.load %arg15[%c0_73, %c0_74] : memref<16x128xf32, #tpu.memory_space<vmem>>, vector<16x128xf32>
    tpu.vector_store %arg15[%c0_73, %c0_74], %173 {strides = array<i32>} : memref<16x128xf32, #tpu.memory_space<vmem>>, vector<16x128xf32>,
    return
  }
  func.func @transform_0(%arg0: i32) -> (i32, i32) {
    %c0_i32 = arith.constant 0 : i32
    %c0_i32_0 = arith.constant 0 : i32
    %c0_i32_1 = arith.constant 0 : i32
    return %c0_i32, %c0_i32_0 : i32, i32
  }
  func.func @transform_1(%arg0: i32) -> (i32, i32) {
    %c0_i32 = arith.constant 0 : i32
    %c0_i32_0 = arith.constant 0 : i32
    %c0_i32_1 = arith.constant 0 : i32
    return %c0_i32, %c0_i32_0 : i32, i32
  }
  func.func @transform_2(%arg0: i32) -> (i32, i32, i32) {
    %c0_i32 = arith.constant 0 : i32
    %c0_i32_0 = arith.constant 0 : i32
    %c0_i32_1 = arith.constant 0 : i32
    return %arg0, %c0_i32, %c0_i32_0 : i32, i32, i32
  }
  func.func @transform_3(%arg0: i32) -> (i32, i32, i32) {
    %c0_i32 = arith.constant 0 : i32
    %c0_i32_0 = arith.constant 0 : i32
    %c0_i32_1 = arith.constant 0 : i32
    return %arg0, %c0_i32, %c0_i32_0 : i32, i32, i32
  }
  func.func @transform_4(%arg0: i32) -> (i32, i32, i32) {
    %c0_i32 = arith.constant 0 : i32
    %c0_i32_0 = arith.constant 0 : i32
    %c0_i32_1 = arith.constant 0 : i32
    return %arg0, %c0_i32, %c0_i32_0 : i32, i32, i32
  }
  func.func @transform_5(%arg0: i32) -> (i32, i32, i32) {
    %c0_i32 = arith.constant 0 : i32
    %c0_i32_0 = arith.constant 0 : i32
    %c0_i32_1 = arith.constant 0 : i32
    return %arg0, %c0_i32, %c0_i32_0 : i32, i32, i32
  }
  func.func @transform_6(%arg0: i32) -> (i32, i32, i32) {
    %c0_i32 = arith.constant 0 : i32
    %c0_i32_0 = arith.constant 0 : i32
    %c0_i32_1 = arith.constant 0 : i32
    return %arg0, %c0_i32, %c0_i32_0 : i32, i32, i32
  }
  func.func @transform_7(%arg0: i32) -> (i32, i32, i32) {
    %c0_i32 = arith.constant 0 : i32
    %c0_i32_0 = arith.constant 0 : i32
    %c0_i32_1 = arith.constant 0 : i32
    return %arg0, %c0_i32, %c0_i32_0 : i32, i32, i32
  }
  func.func @transform_8(%arg0: i32) -> (i32, i32, i32) {
    %c0_i32 = arith.constant 0 : i32
    %c0_i32_0 = arith.constant 0 : i32
    %c0_i32_1 = arith.constant 0 : i32
    return %arg0, %c0_i32, %c0_i32_0 : i32, i32, i32
  }
  func.func @transform_9(%arg0: i32) -> (i32, i32, i32) {
    %c0_i32 = arith.constant 0 : i32
    %c0_i32_0 = arith.constant 0 : i32
    %c0_i32_1 = arith.constant 0 : i32
    return %arg0, %c0_i32, %c0_i32_0 : i32, i32, i32
  }
  func.func @transform_10(%arg0: i32) -> (i32, i32, i32) {
    %c0_i32 = arith.constant 0 : i32
    %c0_i32_0 = arith.constant 0 : i32
    %c0_i32_1 = arith.constant 0 : i32
    return %arg0, %c0_i32, %c0_i32_0 : i32, i32, i32
  }
  func.func @transform_11(%arg0: i32) -> (i32, i32, i32) {
    %c0_i32 = arith.constant 0 : i32
    %c0_i32_0 = arith.constant 0 : i32
    %c0_i32_1 = arith.constant 0 : i32
    return %arg0, %c0_i32, %c0_i32_0 : i32, i32, i32
  }
  func.func @transform_12(%arg0: i32) -> (i32, i32, i32) {
    %c0_i32 = arith.constant 0 : i32
    %c0_i32_0 = arith.constant 0 : i32
    %c0_i32_1 = arith.constant 0 : i32
    return %arg0, %c0_i32, %c0_i32_0 : i32, i32, i32
  }
  func.func @transform_13(%arg0: i32) -> (i32, i32, i32) {
    %c0_i32 = arith.constant 0 : i32
    %c0_i32_0 = arith.constant 0 : i32
    %c0_i32_1 = arith.constant 0 : i32
    return %arg0, %c0_i32, %c0_i32_0 : i32, i32, i32
  }
  func.func @transform_14(%arg0: i32) -> (i32, i32) {
    %c0_i32 = arith.constant 0 : i32
    %c0_i32_0 = arith.constant 0 : i32
    %c0_i32_1 = arith.constant 0 : i32
    return %c0_i32, %c0_i32_0 : i32, i32
  }
}

module attributes {stable_mosaic.version = 11 : i64} {
  func.func @_classifier_kernel(%arg0: i32, %arg1: memref<16x128xf32, #tpu.memory_space<vmem>>, %arg2: memref<128x128xbf16, #tpu.memory_space<vmem>>, %arg3: memref<1x128xf32, #tpu.memory_space<vmem>>, %arg4: memref<128x8xbf16, #tpu.memory_space<vmem>>, %arg5: memref<1x8xf32, #tpu.memory_space<vmem>>, %arg6: memref<16x8xf32, #tpu.memory_space<vmem>>) attributes {dimension_semantics = [#tpu.dimension_semantics<arbitrary>], iteration_bounds = array<i64: 1>, scalar_prefetch = 0 : i64, scratch_operands = 0 : i64, tpu.core_type = #tpu.core_type<tc>, window_params = [{pipeline_mode = #tpu.pipeline_mode<synchronous>, transform_indices = @transform_0, window_bounds = array<i64: 16, 128>}, {pipeline_mode = #tpu.pipeline_mode<synchronous>, transform_indices = @transform_1, window_bounds = array<i64: 128, 128>}, {pipeline_mode = #tpu.pipeline_mode<synchronous>, transform_indices = @transform_2, window_bounds = array<i64: 1, 128>}, {pipeline_mode = #tpu.pipeline_mode<synchronous>, transform_indices = @transform_3, window_bounds = array<i64: 128, 8>}, {pipeline_mode = #tpu.pipeline_mode<synchronous>, transform_indices = @transform_4, window_bounds = array<i64: 1, 8>}, {pipeline_mode = #tpu.pipeline_mode<synchronous>, transform_indices = @transform_5, window_bounds = array<i64: 16, 8>}]} {
    %c0 = arith.constant 0 : index
    %c0_0 = arith.constant 0 : index
    %0 = vector.load %arg1[%c0, %c0_0] : memref<16x128xf32, #tpu.memory_space<vmem>>, vector<16x128xf32>
    %c0_1 = arith.constant 0 : index
    %c0_2 = arith.constant 0 : index
    %1 = vector.load %arg2[%c0_1, %c0_2] : memref<128x128xbf16, #tpu.memory_space<vmem>>, vector<128x128xbf16>
    %2 = arith.truncf %0 : vector<16x128xf32> to vector<16x128xbf16>
    %cst = arith.constant dense<0.000000e+00> : vector<16x128xf32>
    %3 = tpu.matmul %2, %1, %cst {dimension_numbers = #tpu.dot_dimension_numbers<[1], [0], [0], [1], [0, 0, 1, 1], [], []>} : vector<16x128xbf16>, vector<128x128xbf16>, vector<16x128xf32> -> vector<16x128xf32>
    %c0_3 = arith.constant 0 : index
    %c0_4 = arith.constant 0 : index
    %4 = vector.load %arg3[%c0_3, %c0_4] : memref<1x128xf32, #tpu.memory_space<vmem>>, vector<1x128xf32>
    %5 = vector.broadcast %4 : vector<1x128xf32> to vector<16x128xf32>
    %6 = arith.addf %3, %5 : vector<16x128xf32>
    %cst_5 = arith.constant 0.000000e+00 : f32
    %7 = vector.broadcast %cst_5 : f32 to vector<16x128xf32>
    %8 = arith.maximumf %6, %7 : vector<16x128xf32>
    %c0_6 = arith.constant 0 : index
    %c0_7 = arith.constant 0 : index
    %9 = vector.load %arg4[%c0_6, %c0_7] : memref<128x8xbf16, #tpu.memory_space<vmem>>, vector<128x8xbf16>
    %10 = arith.truncf %8 : vector<16x128xf32> to vector<16x128xbf16>
    %cst_8 = arith.constant dense<0.000000e+00> : vector<16x8xf32>
    %11 = tpu.matmul %10, %9, %cst_8 {dimension_numbers = #tpu.dot_dimension_numbers<[1], [0], [0], [1], [0, 0, 1, 1], [], []>} : vector<16x128xbf16>, vector<128x8xbf16>, vector<16x8xf32> -> vector<16x8xf32>
    %c0_9 = arith.constant 0 : index
    %c0_10 = arith.constant 0 : index
    %12 = vector.load %arg5[%c0_9, %c0_10] : memref<1x8xf32, #tpu.memory_space<vmem>>, vector<1x8xf32>
    %13 = vector.broadcast %12 : vector<1x8xf32> to vector<16x8xf32>
    %14 = arith.addf %11, %13 : vector<16x8xf32>
    %c0_11 = arith.constant 0 : index
    %c0_12 = arith.constant 0 : index
    %15 = vector.load %arg6[%c0_11, %c0_12] : memref<16x8xf32, #tpu.memory_space<vmem>>, vector<16x8xf32>
    tpu.vector_store %arg6[%c0_11, %c0_12], %14 {strides = array<i32>} : memref<16x8xf32, #tpu.memory_space<vmem>>, vector<16x8xf32>,
    return
  }
  func.func @transform_0(%arg0: i32) -> (i32, i32) {
    %c0_i32 = arith.constant 0 : i32
    %c0_i32_0 = arith.constant 0 : i32
    %c0_i32_1 = arith.constant 0 : i32
    return %c0_i32, %c0_i32_0 : i32, i32
  }
  func.func @transform_1(%arg0: i32) -> (i32, i32) {
    %c0_i32 = arith.constant 0 : i32
    %c0_i32_0 = arith.constant 0 : i32
    %c0_i32_1 = arith.constant 0 : i32
    return %c0_i32, %c0_i32_0 : i32, i32
  }
  func.func @transform_2(%arg0: i32) -> (i32, i32) {
    %c0_i32 = arith.constant 0 : i32
    %c0_i32_0 = arith.constant 0 : i32
    %c0_i32_1 = arith.constant 0 : i32
    return %c0_i32, %c0_i32_0 : i32, i32
  }
  func.func @transform_3(%arg0: i32) -> (i32, i32) {
    %c0_i32 = arith.constant 0 : i32
    %c0_i32_0 = arith.constant 0 : i32
    %c0_i32_1 = arith.constant 0 : i32
    return %c0_i32, %c0_i32_0 : i32, i32
  }
  func.func @transform_4(%arg0: i32) -> (i32, i32) {
    %c0_i32 = arith.constant 0 : i32
    %c0_i32_0 = arith.constant 0 : i32
    %c0_i32_1 = arith.constant 0 : i32
    return %c0_i32, %c0_i32_0 : i32, i32
  }
  func.func @transform_5(%arg0: i32) -> (i32, i32) {
    %c0_i32 = arith.constant 0 : i32
    %c0_i32_0 = arith.constant 0 : i32
    %c0_i32_1 = arith.constant 0 : i32
    return %c0_i32, %c0_i32_0 : i32, i32
  }
}

</mosaic_0001>

<bundles_post_ra>
// kernel: forward.6
= control target key start
LH: loop header
LB: loop body
LE: loop exit
PB: predicated region body
PF: predicated region fallthrough
CT: control target
= control target key end

     0   :  { %s369_s1 = inlined_call_operand.vmem [shape: bf16[256,128], index: 1, kind: input, shape index: {}]   ;;  %s370_s0 = inlined_call_operand.vmem [shape: f32[16,256], index: 0, kind: input, shape index: {}]   ;;  %s371_s2 = inlined_call_operand.vmem [shape: f32[1,128], index: 2, kind: input, shape index: {}]   ;;  %s372_s3 = inlined_call_operand.vmem [shape: f32[16,128], index: 3, kind: output, shape index: {}]  }
   0x1   :  { %v264_v0 = vld [vmem:[%s369_s1 + $0x78] sm:$0xff]   ;;  %v266_v2 = vld [vmem:[%s369_s1 + $0x70] sm:$0xff]   ;;  %v268_v4 = vld [vmem:[%s369_s1 + $0x68] sm:$0xff]  }
   0x2   :  { %v265_v1 = vld [vmem:[%s369_s1 + $0x38] sm:$0xff]   ;;  %241 = vmatprep.subr.bf16.mxu0 %v264_v0  ;;  %v267_v3 = vld [vmem:[%s369_s1 + $0x30] sm:$0xff]   ;;  %v269_v5 = vld [vmem:[%s369_s1 + $0x28] sm:$0xff]  }
   0x3   :  { %242 = vmatpush3.bf16.msra.mxu0 %v265_v1  ;;  %v270_v6 = vld [vmem:[%s369_s1 + $0x60] sm:$0xff]   ;;  %v272_v8 = vld [vmem:[%s369_s1 + $0x58] sm:$0xff]   ;;  %v274_v10 = vld [vmem:[%s369_s1 + $0x50] sm:$0xff]  }
   0x4   :  { %243 = vmatprep.subr.bf16.mxu0 %v266_v2  ;;  %v271_v7 = vld [vmem:[%s369_s1 + $0x20] sm:$0xff]   ;;  %v273_v9 = vld [vmem:[%s369_s1 + $0x18] sm:$0xff]   ;;  %v24_v11 = vld [vmem:[%s370_s0 + $0x8] sm:$0xff] }
   0x5   :  { %v26_v12 = vld [vmem:[%s370_s0 + $0x18] sm:$0xff]  ;;  %v275_v14 = vld [vmem:[%s369_s1 + $0x10] sm:$0xff]   ;;  %v276_v15 = vld [vmem:[%s369_s1 + $0x48] sm:$0xff]  }
   0x6   :  { %v60_v13 = vpack.c.bf16 %v26_v12, %v24_v11  ;;  %v277_v16 = vld [vmem:[%s369_s1 + $0x8] sm:$0xff]   ;;  %v278_v17 = vld [vmem:[%s369_s1 + $0x40] sm:$0xff]   ;;  %v25_v20 = vld [vmem:[%s370_s0 + $0x10] sm:$0xff] }
   0x7   :  { %244 = vmatpush3.bf16.msra.mxu0 %v267_v3  ;;  %v279_v18 = vld [vmem:[%s369_s1] sm:$0xff]  }
   0x8   :  { %245 = vmatprep.subr.bf16.mxu0 %v268_v4  ;;  %189 = vmatprep.mubr.bf16.mxu0 %v60_v13  ;;  %v23_v19 = vld [vmem:[%s370_s0] sm:$0xff] }
   0x9   :  { %v59_v21 = vpack.c.bf16 %v25_v20, %v23_v19  ;;  %v240_v25 = vld [vmem:[%s371_s2] ss:$0 sm:$0xff] }
   0xb   :  { %246 = vmatpush3.bf16.msra.mxu0 %v269_v5 }
   0xc   :  { %247 = vmatprep.subr.bf16.mxu0 %v270_v6 }
   0xf   :  { %248 = vmatpush3.bf16.msra.mxu0 %v271_v7 }
  0x10   :  { %249 = vmatprep.subr.bf16.mxu0 %v272_v8 }
  0x13   :  { %250 = vmatpush3.bf16.msra.mxu0 %v273_v9 }
  0x14   :  { %251 = vmatprep.subr.bf16.mxu0 %v274_v10 }
  0x17   :  { %252 = vmatpush3.bf16.msra.mxu0 %v275_v14 }
  0x18   :  { %253 = vmatprep.subr.bf16.mxu0 %v276_v15 }
  0x1b   :  { %254 = vmatpush3.bf16.msra.mxu0 %v277_v16 }
  0x1c   :  { %255 = vmatprep.subr.bf16.mxu0 %v278_v17 }
  0x1f   :  { %256 = vmatpush3.bf16.msra.mxu0 %v279_v18 }
  0x22   :  { %190 = vmatmul.mubr.bf16.vlgmr.msra.gmra.mxu0 %v59_v21 }
  0xe2   :  { %v257_v22 = vpop.f32.mrf.mxu0 }
  0xe4   :  { %v258_v23 = vpop.f32.mrf.mxu0 }
  0xe5   :  { %v259_v24 = vadd.f32 %v258_v23, %v257_v22 }
  0xe6   :  { %v260_v26 = vpop.f32.mrf.mxu0 }
  0xe7   :  { %v214_v28 = vadd.f32 %v259_v24, %v240_v25 }
  0xe8   :  { %v261_v27 = vpop.f32.mrf.mxu0 }
  0xe9   :  { %v262_v29 = vadd.f32 %v261_v27, %v260_v26  ;;  %v216_v30 = vmax.f32 %v214_v28, 0.0 }
  0xeb   :  { %218 = vst [vmem:[%s372_s3] sm:$0xff] %v216_v30  ;;  %v215_v31 = vadd.f32 %v262_v29, %v240_v25 }
  0xed   :  { %v217_v32 = vmax.f32 %v215_v31, 0.0 }
  0xef   :  { %219 = vst [vmem:[%s372_s3 + $0x8] sm:$0xff] %v217_v32 }

// kernel: forward.7
= control target key start
LH: loop header
LB: loop body
LE: loop exit
PB: predicated region body
PF: predicated region fallthrough
CT: control target
= control target key end

     0   :  { %v347_v0 = vmov 0.0   ;;  %vm348_vm0 = vmmov 0   ;;  %s448_s3 = inlined_call_operand.vmem [shape: bf16[128,128], index: 3, kind: input, shape index: {}]   ;;  %s449_s2 = inlined_call_operand.vmem [shape: bf16[128,128], index: 2, kind: input, shape index: {}]   ;;  %s450_s1 = inlined_call_operand.vmem [shape: f32[16,128], index: 1, kind: input, shape index: {}]   ;;  %s451_s0 = inlined_call_operand.vmem [shape: f32[16,128], index: 0, kind: input, shape index: {}]   ;;  %s452_s4 = inlined_call_operand.vmem [shape: f32[1,128], index: 4, kind: input, shape index: {}]   ;;  %s453_s5 = inlined_call_operand.vmem [shape: f32[16,128], index: 5, kind: output, shape index: {}]  }
   0x1   :  { %289 = vmatprep.subr.bf16.mxu0 %v347_v0  ;;  %309 = vmatprep.subr.bf16.mxu1 %v347_v0  ;;  %v331_v1 = vld [vmem:[%s448_s3 + $0x38] sm:$0xff]   ;;  %v333_v3 = vld [vmem:[%s448_s3 + $0x30] sm:$0xff]   ;;  %v335_v5 = vld [vmem:[%s448_s3 + $0x28] sm:$0xff]  }
   0x2   :  { %v332_v2 = vld [vmem:[%s449_s2 + $0x38] sm:$0xff]   ;;  %305 = vmatprep.mubr.msk.bf16.mxu0 %vm348_vm0, %v347_v0  ;;  %325 = vmatprep.mubr.msk.bf16.mxu1 %vm348_vm0, %v347_v0  ;;  %v334_v4 = vld [vmem:[%s449_s2 + $0x30] sm:$0xff]   ;;  %v336_v6 = vld [vmem:[%s449_s2 + $0x28] sm:$0xff]  }
   0x3   :  { %290 = vmatpush3.bf16.msra.mxu0 %v331_v1  ;;  %310 = vmatpush3.bf16.msra.mxu1 %v332_v2  ;;  %v337_v7 = vld [vmem:[%s448_s3 + $0x20] sm:$0xff]   ;;  %v339_v9 = vld [vmem:[%s448_s3 + $0x18] sm:$0xff]   ;;  %v341_v11 = vld [vmem:[%s448_s3 + $0x10] sm:$0xff]  }
   0x4   :  { %291 = vmatprep.subr.bf16.mxu0 %v347_v0  ;;  %311 = vmatprep.subr.bf16.mxu1 %v347_v0  ;;  %v338_v8 = vld [vmem:[%s449_s2 + $0x20] sm:$0xff]   ;;  %v340_v10 = vld [vmem:[%s449_s2 + $0x18] sm:$0xff]   ;;  %v342_v12 = vld [vmem:[%s449_s2 + $0x10] sm:$0xff]  }
   0x5   :  { %v343_v13 = vld [vmem:[%s448_s3 + $0x8] sm:$0xff]   ;;  %v345_v15 = vld [vmem:[%s448_s3] sm:$0xff]  }
   0x6   :  { %v344_v14 = vld [vmem:[%s449_s2 + $0x8] sm:$0xff]   ;;  %v40_v16 = vld [vmem:[%s450_s1] sm:$0xff] }
   0x7   :  { %292 = vmatpush3.bf16.msra.mxu0 %v333_v3  ;;  %312 = vmatpush3.bf16.msra.mxu1 %v334_v4  ;;  %v41_v17 = vld [vmem:[%s450_s1 + $0x8] sm:$0xff]  ;;  %v346_v18 = vld [vmem:[%s449_s2] sm:$0xff]  }
   0x8   :  { %293 = vmatprep.subr.bf16.mxu0 %v347_v0  ;;  %313 = vmatprep.subr.bf16.mxu1 %v347_v0  ;;  %v21_v19 = vld [vmem:[%s451_s0] sm:$0xff]  ;;  %v22_v20 = vld [vmem:[%s451_s0 + $0x8] sm:$0xff]  ;;  %v58_v21 = vpack.c.bf16 %v41_v17, %v40_v16 }
   0x9   :  { %v39_v22 = vpack.c.bf16 %v22_v20, %v21_v19  ;;  %v270_v25 = vld [vmem:[%s452_s4] ss:$0 sm:$0xff] }
   0xb   :  { %294 = vmatpush3.bf16.msra.mxu0 %v335_v5  ;;  %314 = vmatpush3.bf16.msra.mxu1 %v336_v6 }
   0xc   :  { %295 = vmatprep.subr.bf16.mxu0 %v347_v0  ;;  %315 = vmatprep.subr.bf16.mxu1 %v347_v0 }
   0xf   :  { %296 = vmatpush3.bf16.msra.mxu0 %v337_v7  ;;  %316 = vmatpush3.bf16.msra.mxu1 %v338_v8 }
  0x10   :  { %297 = vmatprep.subr.bf16.mxu0 %v347_v0  ;;  %317 = vmatprep.subr.bf16.mxu1 %v347_v0 }
  0x13   :  { %298 = vmatpush3.bf16.msra.mxu0 %v339_v9  ;;  %318 = vmatpush3.bf16.msra.mxu1 %v340_v10 }
  0x14   :  { %299 = vmatprep.subr.bf16.mxu0 %v347_v0  ;;  %319 = vmatprep.subr.bf16.mxu1 %v347_v0 }
  0x17   :  { %300 = vmatpush3.bf16.msra.mxu0 %v341_v11  ;;  %320 = vmatpush3.bf16.msra.mxu1 %v342_v12 }
  0x18   :  { %301 = vmatprep.subr.bf16.mxu0 %v347_v0  ;;  %321 = vmatprep.subr.bf16.mxu1 %v347_v0 }
  0x1b   :  { %302 = vmatpush3.bf16.msra.mxu0 %v343_v13  ;;  %322 = vmatpush3.bf16.msra.mxu1 %v344_v14 }
  0x1c   :  { %303 = vmatprep.subr.bf16.mxu0 %v347_v0  ;;  %323 = vmatprep.subr.bf16.mxu1 %v347_v0 }
  0x1f   :  { %304 = vmatpush3.bf16.msra.mxu0 %v345_v15  ;;  %324 = vmatpush3.bf16.msra.mxu1 %v346_v18 }
  0x22   :  { %306 = vmatmul.mubr.bf16.vlgmr.msra.gmra.mxu0 %v58_v21  ;;  %326 = vmatmul.mubr.bf16.vlgmr.msra.gmra.mxu1 %v39_v22 }
  0xe2   :  { %v141_v23 = vpop.f32.mrf.mxu0  ;;  %v230_v24 = vpop.f32.mrf.mxu1 }
  0xe3   :  { %v231_v26 = vadd.f32 %v230_v24, %v141_v23 }
  0xe4   :  { %v307_v27 = vpop.f32.mrf.mxu0  ;;  %v327_v28 = vpop.f32.mrf.mxu1 }
  0xe5   :  { %v244_v29 = vadd.f32 %v270_v25, %v231_v26 }
  0xe6   :  { %v144_v30 = vpop.f32.mrf.mxu0  ;;  %v233_v31 = vpop.f32.mrf.mxu1 }
  0xe7   :  { %v246_v32 = vmax.f32 %v244_v29, 0.0  ;;  %v234_v33 = vadd.f32 %v233_v31, %v144_v30 }
  0xe8   :  { %v308_v34 = vpop.f32.mrf.mxu0  ;;  %v328_v35 = vpop.f32.mrf.mxu1 }
  0xe9   :  { %248 = vst [vmem:[%s453_s5] sm:$0xff] %v246_v32  ;;  %v245_v36 = vadd.f32 %v270_v25, %v234_v33 }
  0xeb   :  { %v247_v37 = vmax.f32 %v245_v36, 0.0 }
  0xed   :  { %249 = vst [vmem:[%s453_s5 + $0x8] sm:$0xff] %v247_v37 }

// kernel: forward.5
= control target key start
LH: loop header
LB: loop body
LE: loop exit
PB: predicated region body
PF: predicated region fallthrough
CT: control target
= control target key end

     0   :  { %vm1507_vm0 = vmmov 0   ;;  %vm846_vm1 = vcmask 261120   ;;  %s1909_s1 = inlined_call_operand.vmem [shape: bf16[1568,128], index: 1, kind: input, shape index: {}]   ;;  %s1910_s0 = inlined_call_operand.vmem [shape: f32[16,1568], index: 0, kind: input, shape index: {}]   ;;  %s1911_s2 = inlined_call_operand.vmem [shape: f32[1,128], index: 2, kind: input, shape index: {}]   ;;  %s1912_s3 = inlined_call_operand.vmem [shape: f32[16,128], index: 3, kind: output, shape index: {}]  }
   0x1   :  { %v1408_v0 = vld [vmem:[%s1909_s1 + $0x78] sm:$0xff]   ;;  %v1412_v4 = vld [vmem:[%s1909_s1 + $0x70] sm:$0xff]   ;;  %v1416_v8 = vld [vmem:[%s1909_s1 + $0x68] sm:$0xff]  }
   0x2   :  { %v1409_v1 = vld [vmem:[%s1909_s1 + $0xf8] sm:$0xff]   ;;  %1263 = vmatprep.subr.bf16.mxu0 %v1408_v0  ;;  %v1413_v5 = vld [vmem:[%s1909_s1 + $0xf0] sm:$0xff]   ;;  %v1417_v9 = vld [vmem:[%s1909_s1 + $0xe8] sm:$0xff]  }
   0x3   :  { %v1410_v2 = vld [vmem:[%s1909_s1 + $0x38] sm:$0xff]   ;;  %1285 = vmatprep.subr.bf16.mxu1 %v1409_v1  ;;  %v1414_v6 = vld [vmem:[%s1909_s1 + $0x30] sm:$0xff]   ;;  %v1418_v10 = vld [vmem:[%s1909_s1 + $0x28] sm:$0xff]  }
   0x4   :  { %v1411_v3 = vld [vmem:[%s1909_s1 + $0xb8] sm:$0xff]   ;;  %1264 = vmatpush3.bf16.msra.mxu0 %v1410_v2  ;;  %v1415_v7 = vld [vmem:[%s1909_s1 + $0xb0] sm:$0xff]   ;;  %v1419_v11 = vld [vmem:[%s1909_s1 + $0xa8] sm:$0xff]  }
   0x5   :  { %1286 = vmatpush3.bf16.msra.mxu1 %v1411_v3  ;;  %1265 = vmatprep.subr.bf16.mxu0 %v1412_v4  ;;  %v1420_v12 = vld [vmem:[%s1909_s1 + $0x60] sm:$0xff]   ;;  %v1424_v16 = vld [vmem:[%s1909_s1 + $0x58] sm:$0xff]   ;;  %v1428_v20 = vld [vmem:[%s1909_s1 + $0x50] sm:$0xff]  }
   0x6   :  { %1287 = vmatprep.subr.bf16.mxu1 %v1413_v5  ;;  %v1421_v13 = vld [vmem:[%s1909_s1 + $0xe0] sm:$0xff]   ;;  %v1425_v17 = vld [vmem:[%s1909_s1 + $0xd8] sm:$0xff]   ;;  %v1429_v21 = vld [vmem:[%s1909_s1 + $0xd0] sm:$0xff]  }
   0x7   :  { %v1422_v14 = vld [vmem:[%s1909_s1 + $0x20] sm:$0xff]   ;;  %v1426_v18 = vld [vmem:[%s1909_s1 + $0x18] sm:$0xff]   ;;  %v1430_v22 = vld [vmem:[%s1909_s1 + $0x10] sm:$0xff]  }
   0x8   :  { %1266 = vmatpush3.bf16.msra.mxu0 %v1414_v6  ;;  %v1423_v15 = vld [vmem:[%s1909_s1 + $0xa0] sm:$0xff]   ;;  %v1427_v19 = vld [vmem:[%s1909_s1 + $0x98] sm:$0xff]   ;;  %v1431_v23 = vld [vmem:[%s1909_s1 + $0x90] sm:$0xff]  }
   0x9   :  { %1288 = vmatpush3.bf16.msra.mxu1 %v1415_v7  ;;  %1267 = vmatprep.subr.bf16.mxu0 %v1416_v8  ;;  %v1432_v24 = vld [vmem:[%s1909_s1 + $0x48] sm:$0xff]   ;;  %v1436_v28 = vld [vmem:[%s1909_s1 + $0x40] sm:$0xff]   ;;  %v37_v33 = vld [vmem:[%s1910_s0 + $0x70] sm:$0xff] }
   0xa   :  { %1289 = vmatprep.subr.bf16.mxu1 %v1417_v9  ;;  %v1433_v25 = vld [vmem:[%s1909_s1 + $0xc8] sm:$0xff]   ;;  %v1437_v29 = vld [vmem:[%s1909_s1 + $0xc0] sm:$0xff]   ;;  %v26_v34 = vld [vmem:[%s1910_s0 + $0x18] sm:$0xff] }
   0xb   :  { %v1434_v26 = vld [vmem:[%s1909_s1 + $0x8] sm:$0xff]   ;;  %v1438_v30 = vld [vmem:[%s1909_s1] sm:$0xff]   ;;  %v25_v41 = vld [vmem:[%s1910_s0 + $0x10] sm:$0xff] }
   0xc   :  { %1268 = vmatpush3.bf16.msra.mxu0 %v1418_v10  ;;  %v1435_v27 = vld [vmem:[%s1909_s1 + $0x88] sm:$0xff]   ;;  %v1439_v31 = vld [vmem:[%s1909_s1 + $0x80] sm:$0xff]   ;;  %v38_v42 = vld [vmem:[%s1910_s0 + $0x78] sm:$0xff] }
   0xd   :  { %1290 = vmatpush3.bf16.msra.mxu1 %v1419_v11  ;;  %1269 = vmatprep.subr.bf16.mxu0 %v1420_v12  ;;  %v24_v32 = vld [vmem:[%s1910_s0 + $0x8] sm:$0xff]  ;;  %v39_v36 = vld [vmem:[%s1910_s0 + $0x80] sm:$0xff]  ;;  %v247_v43 = vpack.c.bf16 %v38_v42, %v25_v41  ;;  %v1440_v44 = vld [vmem:[%s1909_s1 + $0x178] sm:$0xff]  }
   0xe   :  { %1291 = vmatprep.subr.bf16.mxu1 %v1421_v13  ;;  %v246_v35 = vpack.c.bf16 %v37_v33, %v24_v32  ;;  %v23_v37 = vld [vmem:[%s1910_s0] sm:$0xff]  ;;  %v36_v38 = vld [vmem:[%s1910_s0 + $0x68] sm:$0xff]  ;;  %v248_v39 = vpack.c.bf16 %v39_v36, %v26_v34  ;;  %v1441_v45 = vld [vmem:[%s1909_s1 + $0x1f8] sm:$0xff]  }
   0xf   :  { %v245_v40 = vpack.c.bf16 %v36_v38, %v23_v37  ;;  %v1442_v46 = vld [vmem:[%s1909_s1 + $0x138] sm:$0xff]   ;;  %v1444_v48 = vld [vmem:[%s1909_s1 + $0x170] sm:$0xff]   ;;  %v1448_v52 = vld [vmem:[%s1909_s1 + $0x168] sm:$0xff]  }
  0x10   :  { %1270 = vmatpush3.bf16.msra.mxu0 %v1422_v14  ;;  %882 = vmatprep.mubr.bf16.mxu0 %v246_v35  ;;  %v1443_v47 = vld [vmem:[%s1909_s1 + $0x1b8] sm:$0xff]   ;;  %v1445_v49 = vld [vmem:[%s1909_s1 + $0x1f0] sm:$0xff]   ;;  %v1449_v53 = vld [vmem:[%s1909_s1 + $0x1e8] sm:$0xff]  }
  0x11   :  { %1292 = vmatpush3.bf16.msra.mxu1 %v1423_v15  ;;  %1271 = vmatprep.subr.bf16.mxu0 %v1424_v16  ;;  %v1446_v50 = vld [vmem:[%s1909_s1 + $0x130] sm:$0xff]   ;;  %v1450_v54 = vld [vmem:[%s1909_s1 + $0x128] sm:$0xff]   ;;  %v1452_v56 = vld [vmem:[%s1909_s1 + $0x160] sm:$0xff]  }
  0x12   :  { %1293 = vmatprep.subr.bf16.mxu1 %v1425_v17  ;;  %923 = vmatprep.mubr.bf16.mxu1 %v248_v39  ;;  %v1447_v51 = vld [vmem:[%s1909_s1 + $0x1b0] sm:$0xff]   ;;  %v1451_v55 = vld [vmem:[%s1909_s1 + $0x1a8] sm:$0xff]   ;;  %v1453_v57 = vld [vmem:[%s1909_s1 + $0x1e0] sm:$0xff]  }
  0x13   :  { %v1454_v58 = vld [vmem:[%s1909_s1 + $0x120] sm:$0xff]   ;;  %v1456_v60 = vld [vmem:[%s1909_s1 + $0x158] sm:$0xff]   ;;  %v1460_v0 = vld [vmem:[%s1909_s1 + $0x150] sm:$0xff]  }
  0x14   :  { %1272 = vmatpush3.bf16.msra.mxu0 %v1426_v18  ;;  %v1455_v59 = vld [vmem:[%s1909_s1 + $0x1a0] sm:$0xff]   ;;  %v1457_v61 = vld [vmem:[%s1909_s1 + $0x1d8] sm:$0xff]   ;;  %v1461_v1 = vld [vmem:[%s1909_s1 + $0x1d0] sm:$0xff]  }
  0x15   :  { %1294 = vmatpush3.bf16.msra.mxu1 %v1427_v19  ;;  %1273 = vmatprep.subr.bf16.mxu0 %v1428_v20  ;;  %v1458_v62 = vld [vmem:[%s1909_s1 + $0x118] sm:$0xff]   ;;  %v1462_v2 = vld [vmem:[%s1909_s1 + $0x110] sm:$0xff]   ;;  %v1464_v4 = vld [vmem:[%s1909_s1 + $0x148] sm:$0xff]  }
  0x16   :  { %1295 = vmatprep.subr.bf16.mxu1 %v1429_v21  ;;  %v1459_v63 = vld [vmem:[%s1909_s1 + $0x198] sm:$0xff]   ;;  %v1463_v3 = vld [vmem:[%s1909_s1 + $0x190] sm:$0xff]   ;;  %v1465_v5 = vld [vmem:[%s1909_s1 + $0x1c8] sm:$0xff]  }
  0x17   :  { %v1466_v6 = vld [vmem:[%s1909_s1 + $0x108] sm:$0xff]   ;;  %v1468_v8 = vld [vmem:[%s1909_s1 + $0x140] sm:$0xff]   ;;  %v41_v13 = vld [vmem:[%s1910_s0 + $0x90] sm:$0xff] }
  0x18   :  { %1274 = vmatpush3.bf16.msra.mxu0 %v1430_v22  ;;  %v1467_v7 = vld [vmem:[%s1909_s1 + $0x188] sm:$0xff]   ;;  %v1469_v9 = vld [vmem:[%s1909_s1 + $0x1c0] sm:$0xff]   ;;  %v30_v14 = vld [vmem:[%s1910_s0 + $0x38] sm:$0xff] }
  0x19   :  { %1296 = vmatpush3.bf16.msra.mxu1 %v1431_v23  ;;  %1275 = vmatprep.subr.bf16.mxu0 %v1432_v24  ;;  %v1470_v10 = vld [vmem:[%s1909_s1 + $0x100] sm:$0xff]   ;;  %v28_v12 = vld [vmem:[%s1910_s0 + $0x28] sm:$0xff]  ;;  %v29_v20 = vld [vmem:[%s1910_s0 + $0x30] sm:$0xff] }
  0x1a   :  { %1297 = vmatprep.subr.bf16.mxu1 %v1433_v25  ;;  %v1471_v11 = vld [vmem:[%s1909_s1 + $0x180] sm:$0xff]   ;;  %v250_v16 = vpack.c.bf16 %v41_v13, %v28_v12  ;;  %v40_v19 = vld [vmem:[%s1910_s0 + $0x88] sm:$0xff]  ;;  %v42_v22 = vld [vmem:[%s1910_s0 + $0x98] sm:$0xff] }
  0x1b   :  { %v43_v15 = vld [vmem:[%s1910_s0 + $0xa0] sm:$0xff]  ;;  %v251_v23 = vpack.c.bf16 %v42_v22, %v29_v20  ;;  %v1472_v24 = vld [vmem:[%s1909_s1 + $0x278] sm:$0xff]   ;;  %v1480_v32 = vld [vmem:[%s1909_s1 + $0x268] sm:$0xff]  }
  0x1c   :  { %1276 = vmatpush3.bf16.msra.mxu0 %v1434_v26  ;;  %v252_v17 = vpack.c.bf16 %v43_v15, %v30_v14  ;;  %v27_v18 = vld [vmem:[%s1910_s0 + $0x20] sm:$0xff]  ;;  %v1473_v25 = vld [vmem:[%s1909_s1 + $0x2f8] sm:$0xff]   ;;  %v1481_v33 = vld [vmem:[%s1909_s1 + $0x2e8] sm:$0xff]  }
  0x1d   :  { %1298 = vmatpush3.bf16.msra.mxu1 %v1435_v27  ;;  %1277 = vmatprep.subr.bf16.mxu0 %v1436_v28  ;;  %v249_v21 = vpack.c.bf16 %v40_v19, %v27_v18  ;;  %v1474_v26 = vld [vmem:[%s1909_s1 + $0x238] sm:$0xff]   ;;  %v1476_v28 = vld [vmem:[%s1909_s1 + $0x270] sm:$0xff]   ;;  %v1482_v34 = vld [vmem:[%s1909_s1 + $0x228] sm:$0xff]  }
  0x1e   :  { %1299 = vmatprep.subr.bf16.mxu1 %v1437_v29  ;;  %v1475_v27 = vld [vmem:[%s1909_s1 + $0x2b8] sm:$0xff]   ;;  %v1477_v29 = vld [vmem:[%s1909_s1 + $0x2f0] sm:$0xff]   ;;  %v1483_v35 = vld [vmem:[%s1909_s1 + $0x2a8] sm:$0xff]  }
  0x1f   :  { %v1484_v36 = vld [vmem:[%s1909_s1 + $0x260] sm:$0xff]   ;;  %v1489_v41 = vld [vmem:[%s1909_s1 + $0x2d8] sm:$0xff]  }
  0x20   :  { %1278 = vmatpush3.bf16.msra.mxu0 %v1438_v30  ;;  %v1478_v30 = vld [vmem:[%s1909_s1 + $0x230] sm:$0xff]   ;;  %v1485_v37 = vld [vmem:[%s1909_s1 + $0x2e0] sm:$0xff]   ;;  %v1490_v42 = vld [vmem:[%s1909_s1 + $0x218] sm:$0xff]  }
  0x21   :  { %1300 = vmatpush3.bf16.msra.mxu1 %v1439_v31  ;;  %1307 = vmatprep.subr.bf16.mxu0 %v1440_v44  ;;  %v1479_v31 = vld [vmem:[%s1909_s1 + $0x2b0] sm:$0xff]   ;;  %v1486_v38 = vld [vmem:[%s1909_s1 + $0x220] sm:$0xff]  }
  0x22   :  { %1329 = vmatprep.subr.bf16.mxu1 %v1441_v45  ;;  %v1487_v39 = vld [vmem:[%s1909_s1 + $0x2a0] sm:$0xff]   ;;  %v1492_v44 = vld [vmem:[%s1909_s1 + $0x250] sm:$0xff]  }
  0x23   :  { %883 = vmatmul.mubr.bf16.vlgmr.msra.gmra.mxu0 %v245_v40  ;;  %v1488_v40 = vld [vmem:[%s1909_s1 + $0x258] sm:$0xff]   ;;  %v1493_v45 = vld [vmem:[%s1909_s1 + $0x2d0] sm:$0xff]  }
  0x24   :  { %924 = vmatmul.mubr.bf16.vlgmr.msra.gmra.mxu1 %v247_v43  ;;  %1308 = vmatpush3.bf16.msra.mxu0 %v1442_v46  ;;  %v1491_v43 = vld [vmem:[%s1909_s1 + $0x298] sm:$0xff]   ;;  %v1494_v46 = vld [vmem:[%s1909_s1 + $0x210] sm:$0xff]  }
  0x25   :  { %1330 = vmatpush3.bf16.msra.mxu1 %v1443_v47  ;;  %1309 = vmatprep.subr.bf16.mxu0 %v1444_v48  ;;  %v1495_v47 = vld [vmem:[%s1909_s1 + $0x290] sm:$0xff]   ;;  %v1496_v48 = vld [vmem:[%s1909_s1 + $0x248] sm:$0xff]  }
  0x26   :  { %1331 = vmatprep.subr.bf16.mxu1 %v1445_v49  ;;  %964 = vmatprep.mubr.bf16.mxu0 %v250_v16  ;;  %v1497_v49 = vld [vmem:[%s1909_s1 + $0x2c8] sm:$0xff]  }
  0x27   :  { %1005 = vmatprep.mubr.bf16.mxu1 %v252_v17 }
  0x28   :  { %1310 = vmatpush3.bf16.msra.mxu0 %v1446_v50  ;;  %v1498_v50 = vld [vmem:[%s1909_s1 + $0x208] sm:$0xff]  }
  0x29   :  { %1332 = vmatpush3.bf16.msra.mxu1 %v1447_v51  ;;  %1311 = vmatprep.subr.bf16.mxu0 %v1448_v52  ;;  %v1499_v51 = vld [vmem:[%s1909_s1 + $0x288] sm:$0xff]   ;;  %v1500_v52 = vld [vmem:[%s1909_s1 + $0x240] sm:$0xff]  }
  0x2a   :  { %1333 = vmatprep.subr.bf16.mxu1 %v1449_v53  ;;  %v1501_v53 = vld [vmem:[%s1909_s1 + $0x2c0] sm:$0xff]  }
  0x2c   :  { %1312 = vmatpush3.bf16.msra.mxu0 %v1450_v54  ;;  %v1502_v54 = vld [vmem:[%s1909_s1 + $0x200] sm:$0xff]  }
  0x2d   :  { %1334 = vmatpush3.bf16.msra.mxu1 %v1451_v55  ;;  %1313 = vmatprep.subr.bf16.mxu0 %v1452_v56  ;;  %v1503_v55 = vld [vmem:[%s1909_s1 + $0x280] sm:$0xff]   ;;  %v32_v56 = vld [vmem:[%s1910_s0 + $0x48] sm:$0xff] }
  0x2e   :  { %1335 = vmatprep.subr.bf16.mxu1 %v1453_v57  ;;  %v45_v57 = vld [vmem:[%s1910_s0 + $0xb0] sm:$0xff] }
  0x30   :  { %1314 = vmatpush3.bf16.msra.mxu0 %v1454_v58  ;;  %v254_v58 = vpack.c.bf16 %v45_v57, %v32_v56  ;;  %v1262_v57 = vld [vmem:[%s1911_s2] ss:$0 sm:$0xff] }
  0x31   :  { %1336 = vmatpush3.bf16.msra.mxu1 %v1455_v59  ;;  %1315 = vmatprep.subr.bf16.mxu0 %v1456_v60  ;;  %v34_v59 = vld [vmem:[%s1910_s0 + $0x58] sm:$0xff]  ;;  %v47_v60 = vld [vmem:[%s1910_s0 + $0xc0] sm:$0xff] }
  0x32   :  { %1337 = vmatprep.subr.bf16.mxu1 %v1457_v61  ;;  %v31_v61 = vld [vmem:[%s1910_s0 + $0x40] sm:$0xff] }
  0x34   :  { %1316 = vmatpush3.bf16.msra.mxu0 %v1458_v62  ;;  %v256_v62 = vpack.c.bf16 %v47_v60, %v34_v59 }
  0x35   :  { %1338 = vmatpush3.bf16.msra.mxu1 %v1459_v63  ;;  %1317 = vmatprep.subr.bf16.mxu0 %v1460_v0  ;;  %v44_v63 = vld [vmem:[%s1910_s0 + $0xa8] sm:$0xff]  ;;  %v33_v0 = vld [vmem:[%s1910_s0 + $0x50] sm:$0xff] }
  0x36   :  { %1339 = vmatprep.subr.bf16.mxu1 %v1461_v1  ;;  %v46_v1 = vld [vmem:[%s1910_s0 + $0xb8] sm:$0xff] }
  0x38   :  { %1318 = vmatpush3.bf16.msra.mxu0 %v1462_v2  ;;  %v1506_v2 = vmov 0.0  }
  0x39   :  { %1340 = vmatpush3.bf16.msra.mxu1 %v1463_v3  ;;  %1319 = vmatprep.subr.bf16.mxu0 %v1464_v4  ;;  %v253_v3 = vpack.c.bf16 %v44_v63, %v31_v61  ;;  %v255_v4 = vpack.c.bf16 %v46_v1, %v33_v0 }
  0x3a   :  { %1341 = vmatprep.subr.bf16.mxu1 %v1465_v5  ;;  %v1504_v5 = vld [vmem:[%s1909_s1 + $0x308] sm:$0xff]  }
  0x3c   :  { %1320 = vmatpush3.bf16.msra.mxu0 %v1466_v6  ;;  %v1505_v6 = vld [vmem:[%s1909_s1 + $0x300] sm:$0xff]  }
  0x3d   :  { %1342 = vmatpush3.bf16.msra.mxu1 %v1467_v7  ;;  %1321 = vmatprep.subr.bf16.mxu0 %v1468_v8  ;;  %v35_v7 = vld [vmem:[%s1910_s0 + $0x60] sm:$0xff]  ;;  %v48_v8 = vld [vmem:[%s1910_s0 + $0xc8] sm:$0xff] }
  0x3e   :  { %1343 = vmatprep.subr.bf16.mxu1 %v1469_v9  ;;  %v257_v9 = vpack.c.bf16 %v48_v8, %v35_v7 }
  0x40   :  { %1322 = vmatpush3.bf16.msra.mxu0 %v1470_v10 }
  0x41   :  { %1344 = vmatpush3.bf16.msra.mxu1 %v1471_v11  ;;  %1351 = vmatprep.subr.bf16.mxu0 %v1472_v24 }
  0x42   :  { %1373 = vmatprep.subr.bf16.mxu1 %v1473_v25 }
  0x43   :  { %965 = vmatmul.mubr.bf16.vlgmr.msra.gmra.mxu0 %v249_v21 }
  0x44   :  { %1006 = vmatmul.mubr.bf16.vlgmr.msra.gmra.mxu1 %v251_v23  ;;  %1352 = vmatpush3.bf16.msra.mxu0 %v1474_v26 }
  0x45   :  { %1374 = vmatpush3.bf16.msra.mxu1 %v1475_v27  ;;  %1353 = vmatprep.subr.bf16.mxu0 %v1476_v28 }
  0x46   :  { %1375 = vmatprep.subr.bf16.mxu1 %v1477_v29  ;;  %1046 = vmatprep.mubr.bf16.mxu0 %v254_v58 }
  0x47   :  { %1087 = vmatprep.mubr.bf16.mxu1 %v256_v62 }
  0x48   :  { %1354 = vmatpush3.bf16.msra.mxu0 %v1478_v30 }
  0x49   :  { %1376 = vmatpush3.bf16.msra.mxu1 %v1479_v31  ;;  %1355 = vmatprep.subr.bf16.mxu0 %v1480_v32 }
  0x4a   :  { %1377 = vmatprep.subr.bf16.mxu1 %v1481_v33 }
  0x4c   :  { %1356 = vmatpush3.bf16.msra.mxu0 %v1482_v34 }
  0x4d   :  { %1378 = vmatpush3.bf16.msra.mxu1 %v1483_v35  ;;  %1357 = vmatprep.subr.bf16.mxu0 %v1484_v36 }
  0x4e   :  { %1379 = vmatprep.subr.bf16.mxu1 %v1485_v37 }
  0x50   :  { %1358 = vmatpush3.bf16.msra.mxu0 %v1486_v38 }
  0x51   :  { %1380 = vmatpush3.bf16.msra.mxu1 %v1487_v39  ;;  %1359 = vmatprep.subr.bf16.mxu0 %v1488_v40 }
  0x52   :  { %1381 = vmatprep.subr.bf16.mxu1 %v1489_v41 }
  0x54   :  { %1360 = vmatpush3.bf16.msra.mxu0 %v1490_v42 }
  0x55   :  { %1382 = vmatpush3.bf16.msra.mxu1 %v1491_v43  ;;  %1361 = vmatprep.subr.bf16.mxu0 %v1492_v44 }
  0x56   :  { %1383 = vmatprep.subr.bf16.mxu1 %v1493_v45 }
  0x58   :  { %1362 = vmatpush3.bf16.msra.mxu0 %v1494_v46 }
  0x59   :  { %1384 = vmatpush3.bf16.msra.mxu1 %v1495_v47  ;;  %1363 = vmatprep.subr.bf16.mxu0 %v1496_v48 }
  0x5a   :  { %1385 = vmatprep.subr.bf16.mxu1 %v1497_v49 }
  0x5c   :  { %1364 = vmatpush3.bf16.msra.mxu0 %v1498_v50 }
  0x5d   :  { %1386 = vmatpush3.bf16.msra.mxu1 %v1499_v51  ;;  %1365 = vmatprep.subr.bf16.mxu0 %v1500_v52 }
  0x5e   :  { %1387 = vmatprep.subr.bf16.mxu1 %v1501_v53 }
  0x60   :  { %1366 = vmatpush3.bf16.msra.mxu0 %v1502_v54 }
  0x61   :  { %1388 = vmatpush3.bf16.msra.mxu1 %v1503_v55  ;;  %1398 = vmatprep.subr.bf16.mxu0 %v1506_v2 }
  0x63   :  { %1047 = vmatmul.mubr.bf16.vlgmr.msra.gmra.mxu0 %v253_v3 }
  0x64   :  { %1088 = vmatmul.mubr.bf16.vlgmr.msra.gmra.mxu1 %v255_v4  ;;  %1399 = vmatpush3.bf16.msra.mxu0 %v1504_v5 }
  0x65   :  { %1402 = vmatprep.mubr.msk.bf16.mxu0 %vm1507_vm0, %v1506_v2  ;;  %1400 = vmatprep.subr.bf16.mxu0 %v1506_v2 }
  0x68   :  { %1401 = vmatpush3.bf16.msra.mxu0 %v1505_v6 }
  0x6b   :  { %1403 = vmatmul.mubr.msk.bf16.vlgmr.msra.gmra.mxu0 %vm846_vm1, %v257_v9 }
  0xe3   :  { %v1279_v10 = vpop.f32.mrf.mxu0 }
  0xe4   :  { %v1301_v11 = vpop.f32.mrf.mxu1 }
  0xe5   :  { %v1280_v12 = vpop.f32.mrf.mxu0 }
  0xe6   :  { %v1302_v13 = vpop.f32.mrf.mxu1  ;;  %v1281_v23 = vadd.f32 %v1280_v12, %v1279_v10 }
  0xe7   :  { %v1282_v14 = vpop.f32.mrf.mxu0  ;;  %v1303_v24 = vadd.f32 %v1302_v13, %v1301_v11 }
  0xe8   :  { %v1304_v15 = vpop.f32.mrf.mxu1 }
  0xe9   :  { %v1283_v16 = vpop.f32.mrf.mxu0  ;;  %v926_v28 = vadd.f32 %v1303_v24, %v1281_v23 }
  0xea   :  { %v1305_v17 = vpop.f32.mrf.mxu1  ;;  %v1284_v29 = vadd.f32 %v1283_v16, %v1282_v14 }
  0xeb   :  { %v1306_v30 = vadd.f32 %v1305_v17, %v1304_v15 }
  0xed   :  { %v929_v37 = vadd.f32 %v1306_v30, %v1284_v29 }
 0x103   :  { %v1323_v18 = vpop.f32.mrf.mxu0 }
 0x104   :  { %v1345_v19 = vpop.f32.mrf.mxu1 }
 0x105   :  { %v1324_v20 = vpop.f32.mrf.mxu0 }
 0x106   :  { %v1346_v21 = vpop.f32.mrf.mxu1  ;;  %v1325_v26 = vadd.f32 %v1324_v20, %v1323_v18 }
 0x107   :  { %v1326_v22 = vpop.f32.mrf.mxu0  ;;  %v1347_v33 = vadd.f32 %v1346_v21, %v1345_v19 }
 0x108   :  { %v1348_v25 = vpop.f32.mrf.mxu1  ;;  %v967_v32 = vadd.f32 %v1325_v26, %v926_v28 }
 0x109   :  { %v1327_v27 = vpop.f32.mrf.mxu0 }
 0x10a   :  { %v1349_v31 = vpop.f32.mrf.mxu1  ;;  %v1328_v34 = vadd.f32 %v1327_v27, %v1326_v22  ;;  %v1008_v40 = vadd.f32 %v1347_v33, %v967_v32 }
 0x10b   :  { %v1350_v45 = vadd.f32 %v1349_v31, %v1348_v25 }
 0x10c   :  { %v970_v41 = vadd.f32 %v1328_v34, %v929_v37 }
 0x10e   :  { %v1011_v50 = vadd.f32 %v1350_v45, %v970_v41 }
 0x123   :  { %v1367_v35 = vpop.f32.mrf.mxu0 }
 0x124   :  { %v1389_v36 = vpop.f32.mrf.mxu1 }
 0x125   :  { %v1368_v38 = vpop.f32.mrf.mxu0 }
 0x126   :  { %v1390_v39 = vpop.f32.mrf.mxu1  ;;  %v1369_v42 = vadd.f32 %v1368_v38, %v1367_v35 }
 0x127   :  { %v1370_v43 = vpop.f32.mrf.mxu0  ;;  %v1391_v47 = vadd.f32 %v1390_v39, %v1389_v36 }
 0x128   :  { %v1392_v44 = vpop.f32.mrf.mxu1  ;;  %v1049_v46 = vadd.f32 %v1369_v42, %v1008_v40 }
 0x129   :  { %v1371_v48 = vpop.f32.mrf.mxu0 }
 0x12a   :  { %v1393_v49 = vpop.f32.mrf.mxu1  ;;  %v1372_v51 = vadd.f32 %v1371_v48, %v1370_v43  ;;  %v1090_v52 = vadd.f32 %v1391_v47, %v1049_v46 }
 0x12b   :  { %v1130_v53 = vpop.f32.mrf.mxu0  ;;  %v1394_v55 = vadd.f32 %v1393_v49, %v1392_v44 }
 0x12c   :  { %v1052_v54 = vadd.f32 %v1372_v51, %v1011_v50  ;;  %v1131_v56 = vadd.f32 %v1130_v53, %v1090_v52 }
 0x12d   :  { %v1404_v58 = vpop.f32.mrf.mxu0 }
 0x12e   :  { %v1093_v59 = vadd.f32 %v1394_v55, %v1052_v54  ;;  %v1153_v61 = vadd.f32 %v1262_v57, %v1131_v56 }
 0x12f   :  { %v1133_v60 = vpop.f32.mrf.mxu0 }
 0x130   :  { %v1134_v62 = vadd.f32 %v1133_v60, %v1093_v59  ;;  %v1155_v0 = vmax.f32 %v1153_v61, 0.0 }
 0x131   :  { %v1405_v63 = vpop.f32.mrf.mxu0 }
 0x132   :  { %1157 = vst [vmem:[%s1912_s3] sm:$0xff] %v1155_v0  ;;  %v1154_v1 = vadd.f32 %v1262_v57, %v1134_v62 }
 0x134   :  { %v1156_v2 = vmax.f32 %v1154_v1, 0.0 }
 0x136   :  { %1158 = vst [vmem:[%s1912_s3 + $0x8] sm:$0xff] %v1156_v2 }

// kernel: forward.9
= control target key start
LH: loop header
LB: loop body
LE: loop exit
PB: predicated region body
PF: predicated region fallthrough
CT: control target
= control target key end

     0   :  { %v352_v0 = vmov 0.0   ;;  %vm353_vm0 = vmmov 0   ;;  %vm251_vm1 = vcmask 64512   ;;  %s450_s1 = inlined_call_operand.vmem [shape: bf16[128,128], index: 1, kind: input, shape index: {}]   ;;  %s451_s3 = inlined_call_operand.vmem [shape: bf16[128,8], index: 3, kind: input, shape index: {}]   ;;  %s452_s0 = inlined_call_operand.vmem [shape: f32[16,128], index: 0, kind: input, shape index: {}]   ;;  %s453_s2 = inlined_call_operand.vmem [shape: f32[1,128], index: 2, kind: input, shape index: {}]   ;;  %s454_s4 = inlined_call_operand.vmem [shape: f32[1,8], index: 4, kind: input, shape index: {}]   ;;  %s455_s5 = inlined_call_operand.vmem [shape: f32[16,8], index: 5, kind: output, shape index: {}]  }
   0x1   :  { %294 = vmatprep.subr.bf16.mxu0 %v352_v0  ;;  %v336_v1 = vld [vmem:[%s450_s1 + $0x38] sm:$0xff]   ;;  %310 = vmatprep.mubr.msk.bf16.mxu0 %vm353_vm0, %v352_v0  ;;  %v337_v2 = vld [vmem:[%s450_s1 + $0x30] sm:$0xff]   ;;  %v338_v3 = vld [vmem:[%s450_s1 + $0x28] sm:$0xff]  }
   0x2   :  { %314 = vmatprep.subr.bf16.mxu1 %v352_v0  ;;  %330 = vmatprep.mubr.msk.bf16.mxu1 %vm353_vm0, %v352_v0  ;;  %v344_v4 = vld [vmem:[%s451_s3 + $0x38] sm:$0xff]   ;;  %v339_v5 = vld [vmem:[%s450_s1 + $0x20] sm:$0xff]   ;;  %v345_v6 = vld [vmem:[%s451_s3 + $0x30] sm:$0xff]  }
   0x3   :  { %295 = vmatpush3.bf16.msra.mxu0 %v336_v1  ;;  %315 = vmatpush3.bf16.msra.mxu1 %v344_v4  ;;  %v340_v7 = vld [vmem:[%s450_s1 + $0x18] sm:$0xff]   ;;  %v346_v8 = vld [vmem:[%s451_s3 + $0x28] sm:$0xff]   ;;  %v341_v9 = vld [vmem:[%s450_s1 + $0x10] sm:$0xff]  }
   0x4   :  { %296 = vmatprep.subr.bf16.mxu0 %v352_v0  ;;  %316 = vmatprep.subr.bf16.mxu1 %v352_v0  ;;  %v347_v10 = vld [vmem:[%s451_s3 + $0x20] sm:$0xff]   ;;  %v342_v11 = vld [vmem:[%s450_s1 + $0x8] sm:$0xff]   ;;  %v348_v12 = vld [vmem:[%s451_s3 + $0x18] sm:$0xff]  }
   0x5   :  { %v343_v13 = vld [vmem:[%s450_s1] sm:$0xff]   ;;  %v22_v15 = vld [vmem:[%s452_s0 + $0x8] sm:$0xff]  ;;  %v349_v17 = vld [vmem:[%s451_s3 + $0x10] sm:$0xff]  }
   0x6   :  { %v21_v14 = vld [vmem:[%s452_s0] sm:$0xff]  ;;  %v350_v18 = vld [vmem:[%s451_s3 + $0x8] sm:$0xff]  }
   0x7   :  { %297 = vmatpush3.bf16.msra.mxu0 %v337_v2  ;;  %317 = vmatpush3.bf16.msra.mxu1 %v345_v6  ;;  %v39_v16 = vpack.c.bf16 %v22_v15, %v21_v14  ;;  %v351_v19 = vld [vmem:[%s451_s3] sm:$0xff]  }
   0x8   :  { %298 = vmatprep.subr.bf16.mxu0 %v352_v0  ;;  %318 = vmatprep.subr.bf16.mxu1 %v352_v0  ;;  %v258_v20 = vld [vmem:[%s453_s2] ss:$0 sm:$0xff] }
   0x9   :  { %v267_v30 = vld [vmem:[%s454_s4] ss:$0 sm:$0xff] }
   0xb   :  { %299 = vmatpush3.bf16.msra.mxu0 %v338_v3  ;;  %319 = vmatpush3.bf16.msra.mxu1 %v346_v8 }
   0xc   :  { %300 = vmatprep.subr.bf16.mxu0 %v352_v0  ;;  %320 = vmatprep.subr.bf16.mxu1 %v352_v0 }
   0xf   :  { %301 = vmatpush3.bf16.msra.mxu0 %v339_v5  ;;  %321 = vmatpush3.bf16.msra.mxu1 %v347_v10 }
  0x10   :  { %302 = vmatprep.subr.bf16.mxu0 %v352_v0  ;;  %322 = vmatprep.subr.bf16.mxu1 %v352_v0 }
  0x13   :  { %303 = vmatpush3.bf16.msra.mxu0 %v340_v7  ;;  %323 = vmatpush3.bf16.msra.mxu1 %v348_v12 }
  0x14   :  { %304 = vmatprep.subr.bf16.mxu0 %v352_v0  ;;  %324 = vmatprep.subr.bf16.mxu1 %v352_v0 }
  0x17   :  { %305 = vmatpush3.bf16.msra.mxu0 %v341_v9  ;;  %325 = vmatpush3.bf16.msra.mxu1 %v349_v17 }
  0x18   :  { %306 = vmatprep.subr.bf16.mxu0 %v352_v0  ;;  %326 = vmatprep.subr.bf16.mxu1 %v352_v0 }
  0x1b   :  { %307 = vmatpush3.bf16.msra.mxu0 %v342_v11  ;;  %327 = vmatpush3.bf16.msra.mxu1 %v350_v18 }
  0x1c   :  { %308 = vmatprep.subr.bf16.mxu0 %v352_v0  ;;  %328 = vmatprep.subr.bf16.mxu1 %v352_v0 }
  0x1f   :  { %309 = vmatpush3.bf16.msra.mxu0 %v343_v13  ;;  %329 = vmatpush3.bf16.msra.mxu1 %v351_v19 }
  0x22   :  { %311 = vmatmul.mubr.bf16.vlgmr.msra.gmra.mxu0 %v39_v16 }
  0xe2   :  { %v129_v21 = vpop.f32.mrf.mxu0 }
  0xe3   :  { %v130_v23 = vadd.f32 %v258_v20, %v129_v21 }
  0xe4   :  { %v312_v22 = vpop.f32.mrf.mxu0 }
  0xe5   :  { %v136_v27 = vmax.f32 %v130_v23, 0.0 }
  0xe6   :  { %v132_v24 = vpop.f32.mrf.mxu0 }
  0xe7   :  { %v133_v25 = vadd.f32 %v258_v20, %v132_v24 }
  0xe8   :  { %v313_v26 = vpop.f32.mrf.mxu0 }
  0xe9   :  { %v137_v28 = vmax.f32 %v133_v25, 0.0 }
  0xeb   :  { %v154_v29 = vpack.c.bf16 %v137_v28, %v136_v27 }
  0xed   :  { %331 = vmatmul.mubr.bf16.vlgmr.msra.gmra.mxu1 %v154_v29 }
 0x1ad   :  { %v244_v31 = vpop.f32.mrf.mxu1 }
 0x1ae   :  { %v245_v32 = vadd.f32 %v267_v30, %v244_v31 }
 0x1af   :  { %v332_v33 = vpop.f32.mrf.mxu1 }
 0x1b0   :  { %252 = vst.msk [vmem:[%s455_s5] sm:$0xff] %vm251_vm1, %v245_v32 }
 0x1b1   :  { %v247_v34 = vpop.f32.mrf.mxu1 }
 0x1b2   :  { %v248_v35 = vadd.f32 %v267_v30, %v247_v34 }
 0x1b3   :  { %v333_v36 = vpop.f32.mrf.mxu1 }
 0x1b4   :  { %253 = vst.msk [vmem:[%s455_s5 + $0x8] sm:$0xff] %vm251_vm1, %v248_v35 }

// kernel: forward.8
= control target key start
LH: loop header
LB: loop body
LE: loop exit
PB: predicated region body
PF: predicated region fallthrough
CT: control target
= control target key end

     0   :  { %s3077_s29 = smov 0   ;;  %s3492_s0 = inlined_call_operand.vmem [shape: f32[16,128], index: 0, kind: input, shape index: {}]   ;;  %s3493_s1 = inlined_call_operand.vmem [shape: f32[16,16], index: 1, kind: input, shape index: {}]   ;;  %s3494_s2 = inlined_call_operand.vmem [shape: bf16[2,128,384], index: 2, kind: input, shape index: {}]   ;;  %s3495_s3 = inlined_call_operand.vmem [shape: f32[2,1,384], index: 3, kind: input, shape index: {}]   ;;  %s3496_s4 = inlined_call_operand.vmem [shape: bf16[2,128,128], index: 4, kind: input, shape index: {}]   ;;  %s3497_s5 = inlined_call_operand.vmem [shape: f32[2,1,128], index: 5, kind: input, shape index: {}]   ;;  %s3498_s6 = inlined_call_operand.vmem [shape: f32[2,1,128], index: 6, kind: input, shape index: {}]   ;;  %s3499_s7 = inlined_call_operand.vmem [shape: f32[2,1,128], index: 7, kind: input, shape index: {}]   ;;  %s3500_s8 = inlined_call_operand.vmem [shape: bf16[2,128,512], index: 8, kind: input, shape index: {}]   ;;  %s3501_s9 = inlined_call_operand.vmem [shape: f32[2,1,512], index: 9, kind: input, shape index: {}]   ;;  %s3502_s10 = inlined_call_operand.vmem [shape: bf16[2,512,128], index: 10, kind: input, shape index: {}]   ;;  %s3503_s11 = inlined_call_operand.vmem [shape: f32[2,1,128], index: 11, kind: input, shape index: {}]   ;;  %s3504_s12 = inlined_call_operand.vmem [shape: f32[2,1,128], index: 12, kind: input, shape index: {}]   ;;  %s3505_s13 = inlined_call_operand.vmem [shape: f32[2,1,128], index: 13, kind: input, shape index: {}]   ;;  %s3506_s14 = inlined_call_operand.vmem [shape: f32[16,128], index: 14, kind: output, shape index: {}]  }
   0x1   :  { %3512 = sst [smem:[#allocation3_spill]] %s3492_s0 }
   0x2   :  { %3513 = sst [smem:[#allocation4_spill]] %s3493_s1 }
   0x3   :  { %3514 = sst [smem:[#allocation5_spill]] %s3494_s2 }
   0x4   :  { %3515 = sst [smem:[#allocation6_spill]] %s3495_s3 }
   0x5   :  { %3516 = sst [smem:[#allocation7_spill]] %s3496_s4 }
   0x6   :  { %3517 = sst [smem:[#allocation8_spill]] %s3500_s8 }
   0x7   :  { %3518 = sst [smem:[#allocation9_spill]] %s3506_s14 }
   0x8 LB: > { %3519 = sst [smem:[#allocation2_spill]] %s2994_s29  ;;  %s2487_s30 = sadd.s32 4294967295, %s2994_s29   ;;  %s2994_s29 = sphi %s3077_s29, %s24_s29  }
   0x9   : > { %p2490_p0 = scmp.ge.s32.totalorder %s2994_s29, 1  ;;  %p503_p1 = scmp.lt.s32.totalorder %s2994_s29, 3 }
   0xb   : > { %p504_p2 = pnand %p2490_p0, %p503_p1 }
   0xc   : > { %p585_p3 = scmp.lt.s32.totalorder (!%p504_p2), %s2487_s30, 1  ;;  %s3520_s4 = sld [smem:[#allocation7_spill]] (!%p504_p2) }
   0xd   : > { %507 = sbr.rel (%p504_p2) target bundleno = 2917 (0xb65), region = 76  ;;  %s3521_s2 = sld [smem:[#allocation5_spill]] (!%p504_p2) }
   0xe   : > { %s3522_s3 = sld [smem:[#allocation6_spill]] (!%p504_p2)  ;;  %p2499_p4 = scmp.ne.s32.totalorder (!%p504_p2), %s2487_s30, 0 }
   0xf   : > { %s3523_s8 = sld [smem:[#allocation8_spill]] (!%p504_p2) }
  0x12   : > { %s3085_s15 = scalar_select %p585_p3, %s2487_s30, 1 }
  0x13   : > { %s3524_s26 = sld [smem:[#allocation3_spill]] (!%p2499_p4) }
  0x14   : > { %s2781_s16 = smul.u32 192, %s3085_s15  ;;  %s2612_s17 = sshll.u32 %s3085_s15, 6 }
  0x15   : > { %s2782_s18 = smul.u32 3, %s3085_s15  ;;  %s3093_s21 = scalar_lea.vmem %s3520_s4, %s2612_s17 }
  0x16   : > { %s3098_s24 = scalar_lea.vmem %s3521_s2, %s2781_s16  ;;  %s2613_s22 = sshll.u32 %s3085_s15, 8 }
  0x17   : > { %s3107_s1 = scalar_lea.vmem %s3522_s3, %s2782_s18  ;;  %s3121_s2 = scalar_lea.vmem %s3523_s8, %s2613_s22 }
  0x18   : > { %s2496_s25 = sshll.u32 %s3085_s15, 2  ;;  %s3132_s0 = scalar_lea.vmem %s3502_s10, %s2613_s22 }
  0x19   : > { %s3127_s29 = scalar_lea.vmem %s3501_s9, %s2496_s25  ;;  %s624_s20 = scalar_lea.vmem %s3503_s11, %s3085_s15 }
  0x1a   : > { %s627_s16 = scalar_lea.vmem %s3504_s12, %s3085_s15  ;;  %s630_s8 = scalar_lea.vmem %s3505_s13, %s3085_s15 }
  0x1b   : > { %635 = sbr.rel (%p2499_p4) target bundleno = 34 (0x22), region = 80  ;;  %s3525_s17 = sld [smem:[#allocation9_spill]] (!%p2499_p4) }
  0x20   : > { %v636_v0 = vld [vmem:[%s3524_s26] sm:$0xff]  ;;  %v637_v1 = vld [vmem:[%s3524_s26 + $0x8] sm:$0xff] }
  0x21   : > { %638 = vst [vmem:[%s3525_s17] sm:$0xff] %v636_v0  ;;  %639 = vst [vmem:[%s3525_s17 + $0x8] sm:$0xff] %v637_v1 }
  0x22 PF: > { %v2812_v2 = vld [vmem:[%s3098_s24 + $0xac] ss:$12 sps:$4 sm:$0xff]   ;;  %v2814_v3 = vld [vmem:[%s3098_s24 + $0xa8] ss:$12 sps:$4 sm:$0xff]   ;;  %v2996_v4 = vmov 0   ;;  %v2997_v5 = vmov 0.0   ;;  %v677_v31 = vlaneseq  ;;  %s3528_s3 = scalar_lea.vmem %s3497_s5, %s3085_s15  ;;  %s3529_s27 = scalar_lea.vmem %s3498_s6, %s3085_s15 }
  0x23   : > { %852 = vmatprep.mubr.bf16.mxu0 %v2996_v4  ;;  %2693 = vmatprep.subr.bf16.mxu1 %v2997_v5  ;;  %v2815_v6 = vld [vmem:[%s3098_s24 + $0x94] ss:$12 sps:$4 sm:$0xff]   ;;  %v2817_v7 = vld [vmem:[%s3098_s24 + $0x90] ss:$12 sps:$4 sm:$0xff]   ;;  %v2820_v9 = vld [vmem:[%s3098_s24 + $0x78] ss:$12 sps:$4 sm:$0xff]  }
  0x24   : > { %820 = vmatprep.subr.bf16.mxu0 %v2812_v2  ;;  %v2818_v8 = vld [vmem:[%s3098_s24 + $0x7c] ss:$12 sps:$4 sm:$0xff]   ;;  %v2821_v10 = vld [vmem:[%s3098_s24 + $0x64] ss:$12 sps:$4 sm:$0xff]   ;;  %v2823_v11 = vld [vmem:[%s3098_s24 + $0x60] ss:$12 sps:$4 sm:$0xff]  }
  0x25   : > { %821 = vmatpush1.bf16.msra.mxu0 %v2814_v3  ;;  %v2824_v12 = vld [vmem:[%s3098_s24 + $0x4c] ss:$12 sps:$4 sm:$0xff]   ;;  %v2836_v13 = vld [vmem:[%s3098_s24 + $0xb0] ss:$12 sps:$4 sm:$0xff]   ;;  %v2826_v15 = vld [vmem:[%s3098_s24 + $0x48] ss:$12 sps:$4 sm:$0xff]  }
  0x26   : > { %822 = vmatprep.subr.bf16.mxu0 %v2815_v6  ;;  %2694 = vmatpush3.bf16.msra.mxu1 %v2836_v13  ;;  %v2837_v14 = vld [vmem:[%s3098_s24 + $0x98] ss:$12 sps:$4 sm:$0xff]   ;;  %v2827_v16 = vld [vmem:[%s3098_s24 + $0x34] ss:$12 sps:$4 sm:$0xff]   ;;  %v2829_v17 = vld [vmem:[%s3098_s24 + $0x30] ss:$12 sps:$4 sm:$0xff]  }
  0x27   : > { %2695 = vmatprep.subr.bf16.mxu1 %v2997_v5  ;;  %v2830_v18 = vld [vmem:[%s3098_s24 + $0x1c] ss:$12 sps:$4 sm:$0xff]   ;;  %v2838_v19 = vld [vmem:[%s3098_s24 + $0x80] ss:$12 sps:$4 sm:$0xff]   ;;  %v2832_v21 = vld [vmem:[%s3098_s24 + $0x18] ss:$12 sps:$4 sm:$0xff]  }
  0x28   : > { %v2839_v20 = vld [vmem:[%s3098_s24 + $0x68] ss:$12 sps:$4 sm:$0xff]   ;;  %v2833_v22 = vld [vmem:[%s3098_s24 + $0x4] ss:$12 sps:$4 sm:$0xff]   ;;  %v2835_v24 = vld [vmem:[%s3098_s24] ss:$12 sps:$4 sm:$0xff]  }
  0x29   : > { %823 = vmatpush1.bf16.msra.mxu0 %v2817_v7  ;;  %v2840_v23 = vld [vmem:[%s3098_s24 + $0x50] ss:$12 sps:$4 sm:$0xff]   ;;  %s3526_s23 = sld [smem:[#allocation9_spill]]  ;;  %v2841_v27 = vld [vmem:[%s3098_s24 + $0x38] ss:$12 sps:$4 sm:$0xff]   ;;  %vm2998_vm0 = vmmov 0  }
  0x2a   : > { %824 = vmatprep.subr.bf16.mxu0 %v2818_v8  ;;  %2696 = vmatpush3.bf16.msra.mxu1 %v2837_v14  ;;  %v2842_v29 = vld [vmem:[%s3098_s24 + $0x20] ss:$12 sps:$4 sm:$0xff]   ;;  %v2843_v30 = vld [vmem:[%s3098_s24 + $0x8] ss:$12 sps:$4 sm:$0xff]   ;;  %v3211_v32 = vshrl.u32 %v677_v31, 7  ;;  %vm909_vm1 = vcmask 261120   ;;  %s3530_s24 = scalar_lea.vmem %s3499_s7, %s3085_s15 }
  0x2b   : > { %2697 = vmatprep.subr.bf16.mxu1 %v2997_v5  ;;  %2709 = vmatprep.mubr.msk.bf16.mxu1 %vm2998_vm0, %v2997_v5  ;;  %v675_v35 = vld [vmem:[%s3107_s1] sm:$0x7]  ;;  %s3527_s22 = sld [smem:[#allocation4_spill]]  ;;  %vm957_vm2 = vcmask 130048   ;;  %s2999_s14 = smov 96   ;;  %vm1417_vm3 = vcmask 523264  }
  0x2c   : > { %v683_v33 = vsub.s32 1, %v3211_v32  ;;  %v679_v40 = vsub.s32 0, %v3211_v32  ;;  %v687_v49 = vsub.s32 2, %v3211_v32  ;;  %s3000_s17 = smov 32   ;;  %s3001_s4 = smov 64   ;;  %vm1420_vm4 = vcmask 785408  }
  0x2d   : > { %825 = vmatpush1.bf16.msra.mxu0 %v2820_v9 }
  0x2e   : > { %826 = vmatprep.subr.bf16.mxu0 %v2821_v10  ;;  %2698 = vmatpush3.bf16.msra.mxu1 %v2838_v19  ;;  %v684_v37 = vrot.slane %v675_v35, %v683_v33  ;;  %v680_v44 = vrot.slane %v675_v35, %v679_v40  ;;  %v688_v50 = vrot.slane %v675_v35, %v687_v49 }
  0x2f   : > { %2699 = vmatprep.subr.bf16.mxu1 %v2997_v5  ;;  %v3187_v25 = vld [vmem:[%s3526_s23] sm:$0xff]  ;;  %v3192_v26 = vld [vmem:[%s3526_s23 + $0x8] sm:$0xff] }
  0x30   : > { %v674_v28 = vpack.c.bf16 %v3192_v26, %v3187_v25 }
  0x31   : > { %827 = vmatpush1.bf16.msra.mxu0 %v2823_v11  ;;  %v3235_v58 = vld [vmem:[%s3527_s22] sm:$0xff]  ;;  %v3241_v62 = vld [vmem:[%s3527_s22 + $0x8] sm:$0xff] }
  0x32   : > { %828 = vmatprep.subr.bf16.mxu0 %v2824_v12  ;;  %2700 = vmatpush3.bf16.msra.mxu1 %v2839_v20 }
  0x33   : > { %2701 = vmatprep.subr.bf16.mxu1 %v2997_v5 }
  0x35   : > { %829 = vmatpush1.bf16.msra.mxu0 %v2826_v15 }
  0x36   : > { %830 = vmatprep.subr.bf16.mxu0 %v2827_v16  ;;  %2702 = vmatpush3.bf16.msra.mxu1 %v2840_v23 }
  0x37   : > { %2703 = vmatprep.subr.bf16.mxu1 %v2997_v5 }
  0x39   : > { %831 = vmatpush1.bf16.msra.mxu0 %v2829_v17 }
  0x3a   : > { %832 = vmatprep.subr.bf16.mxu0 %v2830_v18  ;;  %2704 = vmatpush3.bf16.msra.mxu1 %v2841_v27 }
  0x3b   : > { %2705 = vmatprep.subr.bf16.mxu1 %v2997_v5 }
  0x3d   : > { %833 = vmatpush1.bf16.msra.mxu0 %v2832_v21 }
  0x3e   : > { %834 = vmatprep.subr.bf16.mxu0 %v2833_v22  ;;  %2706 = vmatpush3.bf16.msra.mxu1 %v2842_v29 }
  0x3f   : > { %2707 = vmatprep.subr.bf16.mxu1 %v2997_v5 }
  0x41   : > { %835 = vmatpush1.bf16.msra.mxu0 %v2835_v24 }
  0x42   : > { %2737 = vmatprep.subr.bf16.mxu0 %v2997_v5  ;;  %2708 = vmatpush3.bf16.msra.mxu1 %v2843_v30 }
  0x43   : > { %2713 = vmatprep.subr.bf16.mxu1 %v2997_v5 }
  0x44   : > { %853 = vmatmul.mubr.bf16.vlgmr.msra.gmra.mxu0 %v674_v28 }
  0x45   : > { %2739 = vmatprep.mubr.msk.bf16.mxu0 %vm2998_vm0, %v2997_v5  ;;  %2710 = vmatmul.mubr.bf16.vlgmr.msra.gmra.mxu1 %v674_v28 }
  0x46   : > { %2715 = vmatprep.mubr.msk.bf16.mxu1 %vm2998_vm0, %v2997_v5 }
 0x104   : > { %v854_v34 = vpop.f32.mrf.mxu0 }
 0x105   : > { %v855_v47 = vadd.f32 %v854_v34, %v680_v44  ;;  %v897_v51 = vpop.f32.mrf.mxu1 }
 0x106   : > { %v856_v36 = vpop.f32.mrf.mxu0  ;;  %v898_v53 = vadd.f32 %v897_v51, %v688_v50 }
 0x107   : > { %v857_v41 = vadd.f32 %v856_v36, %v684_v37  ;;  %v2711_v52 = vpop.f32.mrf.mxu1 }
 0x108   : > { %v858_v38 = vpop.f32.mrf.mxu0 }
 0x109   : > { %v859_v46 = vadd.f32 %v858_v38, %v680_v44  ;;  %v900_v54 = vpop.f32.mrf.mxu1 }
 0x10a   : > { %v860_v39 = vpop.f32.mrf.mxu0  ;;  %v901_v55 = vadd.f32 %v900_v54, %v688_v50 }
 0x10b   : > { %v861_v42 = vadd.f32 %v860_v39, %v684_v37  ;;  %v904_v48 = vpack.c.bf16 %v859_v46, %v855_v47  ;;  %v2712_v56 = vpop.f32.mrf.mxu1 }
 0x10c   : > { %v3228_v57 = vpack.c.bf16 %v901_v55, %v898_v53 }
 0x10d   : > { %v905_v43 = vpack.c.bf16 %v861_v42, %v857_v41 }
 0x10f   : > { %v914_v45 = vsel %vm909_vm1, %v905_v43, 0 }
 0x110   : > { %2714 = vmatpush3.bf16.xpose.msra.mxu1 %v914_v45 }
 0x111   : > { %2719 = vmatprep.subr.bf16.mxu1 %v2997_v5 }
 0x117   : > { %2716 = vmatmul.mubr.msk.bf16.vlgmr.msra.gmra.mxu1 %vm909_vm1, %v904_v48 }
 0x118   : > { %2721 = vmatprep.mubr.msk.bf16.mxu1 %vm2998_vm0, %v2997_v5  ;;  %2720 = vmatpush3.bf16.msra.mxu1 %v3228_v57 }
 0x119   : > { %2725 = vmatprep.subr.bf16.mxu1 %v2997_v5 }
 0x1d7   : > { %v950_v59 = vpop.f32.mrf.mxu1 }
 0x1d8   : > { %v951_v60 = vadd.f32 %v950_v59, %v3235_v58 }
 0x1d9   : > { %v2717_v61 = vpop.f32.mrf.mxu1 }
 0x1da   : > { %v958_v63 = vsel %vm957_vm2, %v951_v60, -inf }
 0x1db   : > { %959 = vmax.xlane.f32.xlu0 %v958_v63  ;;  %v953_v0 = vpop.f32.mrf.mxu1 }
 0x1dc   : > { %v954_v1 = vadd.f32 %v953_v0, %v3241_v62 }
 0x1dd   : > { %v2718_v2 = vpop.f32.mrf.mxu1 }
 0x1de   : > { %v961_v3 = vsel %vm957_vm2, %v954_v1, -inf }
 0x1df   : > { %962 = vmax.xlane.f32.xlu0 %v961_v3 }
 0x1f5   : > { %1029 = vrot.lane.b32.xlu0 %v905_v43, %s2999_s14 }
 0x1f9   : > { %1272 = vrot.lane.b32.xlu0 %v905_v43, %s3000_s17 }
 0x264   : > { %v960_v6 = vpop.xlane.xlu0 %959 }
 0x265   : > { %v964_v7 = vsub.f32 %v951_v60, %v960_v6 }
 0x267   : > { %v966_v8 = vmul.f32 1.442695, %v964_v7 }
 0x268   : > { %v963_v9 = vpop.xlane.xlu0 %962 }
 0x269   : > { %2932 = vpow2.f32 %v966_v8  ;;  %v965_v10 = vsub.f32 %v954_v1, %v963_v9 }
 0x26b   : > { %v968_v11 = vmul.f32 1.442695, %v965_v10 }
 0x26c   : > { %v1030_v19 = vpop.permute.xlu0 %1029 }
 0x26d   : > { %2934 = vpow2.f32 %v968_v11  ;;  %v1035_v34 = vsel %vm909_vm1, %v1030_v19, 0 }
 0x270   : > { %v1273_v24 = vpop.permute.xlu0 %1272 }
 0x271   : > { %v1278_v30 = vsel %vm909_vm1, %v1273_v24, 0 }
 0x276   : > { %v2933_v12 = vpop.eup %2932 }
 0x277   : > { %v970_v13 = vsel %vm957_vm2, %v2933_v12, 0.0 }
 0x278   : > { %971 = vadd.xlane.f32.xlu1 %v970_v13 }
 0x27a   : > { %v2935_v14 = vpop.eup %2934 }
 0x27b   : > { %v973_v15 = vsel %vm957_vm2, %v2935_v14, 0.0 }
 0x27c   : > { %974 = vadd.xlane.f32.xlu1 %v973_v15 }
 0x28d   : > { %1026 = vrot.lane.b32.xlu1 %v904_v48, %s2999_s14 }
 0x291   : > { %1151 = vrot.lane.b32.xlu1 %v905_v43, %s3001_s4 }
 0x295   : > { %1149 = vrot.lane.b32.xlu1 %v904_v48, %s3001_s4 }
 0x299   : > { %1270 = vrot.lane.b32.xlu1 %v904_v48, %s3000_s17 }
 0x301   : > { %v972_v16 = vpop.xlane.xlu1 %971 }
 0x302   : > { %2936 = vrcp.f32 %v972_v16 }
 0x305   : > { %v975_v17 = vpop.xlane.xlu1 %974 }
 0x306   : > { %2938 = vrcp.f32 %v975_v17 }
 0x309   : > { %v1027_v18 = vpop.permute.xlu1 %1026 }
 0x30d   : > { %v1152_v20 = vpop.permute.xlu1 %1151 }
 0x30e   : > { %v1157_v21 = vsel %vm909_vm1, %v1152_v20, 0 }
 0x30f   : > { %2738 = vmatpush3.bf16.xpose.msra.mxu0 %v1157_v21  ;;  %v2937_v22 = vpop.eup %2936 }
 0x310   : > { %2749 = vmatprep.subr.bf16.mxu0 %v2997_v5  ;;  %v978_v27 = vmul.f32 %v2937_v22, %v2933_v12 }
 0x311   : > { %v1150_v29 = vpop.permute.xlu1 %1149 }
 0x313   : > { %v2939_v23 = vpop.eup %2938 }
 0x314   : > { %v979_v28 = vmul.f32 %v2939_v23, %v2935_v14 }
 0x315   : > { %v1271_v35 = vpop.permute.xlu1 %1270 }
 0x316   : > { %2740 = vmatmul.mubr.msk.bf16.vlgmr.msra.gmra.mxu0 %vm909_vm1, %v1150_v29  ;;  %v980_v31 = vpack.c.bf16 %v979_v28, %v978_v27 }
 0x317   : > { %2750 = vmatpush3.bf16.xpose.msra.mxu0 %v1278_v30  ;;  %2751 = vmatprep.mubr.msk.bf16.mxu0 %vm2998_vm0, %v2997_v5 }
 0x318   : > { %2722 = vmatmul.mubr.msk.bf16.vlgmr.msra.gmra.mxu1 %vm957_vm2, %v980_v31  ;;  %2761 = vmatprep.subr.bf16.mxu0 %v2997_v5 }
 0x319   : > { %2726 = vmatpush3.bf16.xpose.msra.mxu1 %v1035_v34  ;;  %2727 = vmatprep.mubr.msk.bf16.mxu1 %vm2998_vm0, %v2997_v5 }
 0x31a   : > { %2731 = vmatprep.subr.bf16.mxu1 %v2997_v5 }
 0x31e   : > { %2752 = vmatmul.mubr.msk.bf16.vlgmr.msra.gmra.mxu0 %vm909_vm1, %v1271_v35 }
 0x31f   : > { %2777 = vmatprep.mubr.msk.bf16.mxu0 %vm2998_vm0, %v2997_v5 }
 0x320   : > { %2728 = vmatmul.mubr.msk.bf16.vlgmr.msra.gmra.mxu1 %vm909_vm1, %v1027_v18 }
 0x321   : > { %2733 = vmatprep.mubr.msk.bf16.mxu1 %vm2998_vm0, %v2997_v5 }
 0x3d6   : > { %v1193_v36 = vpop.f32.mrf.mxu0 }
 0x3d7   : > { %v1194_v52 = vadd.f32 %v1193_v36, %v3235_v58 }
 0x3d8   : > { %v3272_v37 = vpop.f32.mrf.mxu1  ;;  %v2741_v38 = vpop.f32.mrf.mxu0 }
 0x3d9   : > { %v1200_v63 = vsel %vm957_vm2, %v1194_v52, -inf }
 0x3da   : > { %v2723_v39 = vpop.f32.mrf.mxu1  ;;  %v1196_v41 = vpop.f32.mrf.mxu0 }
 0x3db   : > { %v1197_v60 = vadd.f32 %v1196_v41, %v3241_v62 }
 0x3dc   : > { %v3274_v42 = vpop.f32.mrf.mxu1  ;;  %v2742_v43 = vpop.f32.mrf.mxu0 }
 0x3dd   : > { %v1203_v2 = vsel %vm957_vm2, %v1197_v60, -inf }
 0x3de   : > { %v2724_v44 = vpop.f32.mrf.mxu1  ;;  %v1314_v45 = vpop.f32.mrf.mxu0 }
 0x3df   : > { %v1315_v1 = vadd.f32 %v1314_v45, %v3235_v58 }
 0x3e0   : > { %v1071_v46 = vpop.f32.mrf.mxu1  ;;  %v2753_v47 = vpop.f32.mrf.mxu0 }
 0x3e1   : > { %v1072_v48 = vadd.f32 %v1071_v46, %v3235_v58  ;;  %v1321_v6 = vsel %vm957_vm2, %v1315_v1, -inf }
 0x3e2   : > { %v2729_v50 = vpop.f32.mrf.mxu1  ;;  %v1317_v51 = vpop.f32.mrf.mxu0 }
 0x3e3   : > { %v1078_v53 = vsel %vm957_vm2, %v1072_v48, -inf  ;;  %v1318_v61 = vadd.f32 %v1317_v51, %v3241_v62 }
 0x3e4   : > { %v2754_v54 = vpop.f32.mrf.mxu0  ;;  %1079 = vmax.xlane.f32.xlu0 %v1078_v53  ;;  %v1074_v55 = vpop.f32.mrf.mxu1 }
 0x3e5   : > { %v1075_v56 = vadd.f32 %v1074_v55, %v3241_v62  ;;  %v1324_v3 = vsel %vm957_vm2, %v1318_v61, -inf }
 0x3e6   : > { %v2730_v59 = vpop.f32.mrf.mxu1 }
 0x3e7   : > { %v1081_v0 = vsel %vm957_vm2, %v1075_v56, -inf }
 0x3e8   : > { %1201 = vmax.xlane.f32.xlu0 %v1200_v63  ;;  %1082 = vmax.xlane.f32.xlu1 %v1081_v0 }
 0x3ec   : > { %1204 = vmax.xlane.f32.xlu0 %v1203_v2  ;;  %1325 = vmax.xlane.f32.xlu1 %v1324_v3 }
 0x3f0   : > { %1322 = vmax.xlane.f32.xlu0 %v1321_v6 }
 0x46d   : > { %v1080_v7 = vpop.xlane.xlu0 %1079 }
 0x46e   : > { %v1084_v58 = vsub.f32 %v1072_v48, %v1080_v7  ;;  %v2844_v7 = vld [vmem:[%s3093_s21 + $0x38] sm:$0xff]  }
 0x46f   : > { %2762 = vmatpush3.bf16.msra.mxu0 %v2844_v7  ;;  %v2860_v7 = vld [vmem:[%s3121_s2 + $0xc4] ss:$16 sps:$4 sm:$0xff]  }
 0x470   : > { %v1086_v20 = vmul.f32 1.442695, %v1084_v58  ;;  %2763 = vmatprep.subr.bf16.mxu0 %v2997_v5 }
 0x471   : > { %v1202_v8 = vpop.xlane.xlu0 %1201  ;;  %v1083_v62 = vpop.xlane.xlu1 %1082 }
 0x472   : > { %v1206_v9 = vsub.f32 %v1194_v52, %v1202_v8  ;;  %v1085_v15 = vsub.f32 %v1075_v56, %v1083_v62  ;;  %v2845_v8 = vld [vmem:[%s3093_s21 + $0x30] sm:$0xff]   ;;  %v2846_v62 = vld [vmem:[%s3093_s21 + $0x28] sm:$0xff]  }
 0x473   : > { %2764 = vmatpush3.bf16.msra.mxu0 %v2845_v8  ;;  %v2863_v8 = vld [vmem:[%s3121_s2 + $0xcc] ss:$16 sps:$4 sm:$0xff]  }
 0x474   : > { %v1208_v10 = vmul.f32 1.442695, %v1206_v9  ;;  %v1088_v21 = vmul.f32 1.442695, %v1085_v15  ;;  %2765 = vmatprep.subr.bf16.mxu0 %v2997_v5  ;;  %v2847_v9 = vld [vmem:[%s3093_s21 + $0x20] sm:$0xff]   ;;  %v2850_v15 = vld [vmem:[%s3093_s21 + $0x8] sm:$0xff]  }
 0x475   : > { %v1205_v11 = vpop.xlane.xlu0 %1204  ;;  %v1326_v12 = vpop.xlane.xlu1 %1325 }
 0x476   : > { %2940 = vpow2.f32 %v1208_v10  ;;  %v1207_v13 = vsub.f32 %v1197_v60, %v1205_v11  ;;  %v1328_v14 = vsub.f32 %v1318_v61, %v1326_v12  ;;  %v2848_v10 = vld [vmem:[%s3093_s21 + $0x18] sm:$0xff]  }
 0x477   : > { %2766 = vmatpush3.bf16.msra.mxu0 %v2846_v62  ;;  %v2858_v62 = vld [vmem:[%s3121_s2 + $0xc0] ss:$16 sps:$4 sm:$0xff]  }
 0x478   : > { %v1210_v16 = vmul.f32 1.442695, %v1207_v13  ;;  %v1331_v17 = vmul.f32 1.442695, %v1328_v14  ;;  %2767 = vmatprep.subr.bf16.mxu0 %v2997_v5  ;;  %v2849_v13 = vld [vmem:[%s3093_s21 + $0x10] sm:$0xff]  }
 0x479   : > { %v1323_v18 = vpop.xlane.xlu0 %1322 }
 0x47a   : > { %2942 = vpow2.f32 %v1210_v16  ;;  %v1327_v19 = vsub.f32 %v1315_v1, %v1323_v18 }
 0x47b   : > { %2944 = vpow2.f32 %v1331_v17  ;;  %2768 = vmatpush3.bf16.msra.mxu0 %v2847_v9  ;;  %v2861_v9 = vld [vmem:[%s3121_s2 + $0xc8] ss:$16 sps:$4 sm:$0xff]  }
 0x47c   : > { %v1329_v22 = vmul.f32 1.442695, %v1327_v19  ;;  %2769 = vmatprep.subr.bf16.mxu0 %v2997_v5  ;;  %v2851_v19 = vld [vmem:[%s3093_s21] sm:$0xff]  }
 0x47e   : > { %2946 = vpow2.f32 %v1329_v22 }
 0x47f   : > { %2948 = vpow2.f32 %v1086_v20  ;;  %2770 = vmatpush3.bf16.msra.mxu0 %v2848_v10  ;;  %v2866_v10 = vld [vmem:[%s3121_s2 + $0xa4] ss:$16 sps:$4 sm:$0xff]  }
 0x480   : > { %2950 = vpow2.f32 %v1088_v21  ;;  %2771 = vmatprep.subr.bf16.mxu0 %v2997_v5 }
 0x483   : > { %v2941_v23 = vpop.eup %2940  ;;  %2772 = vmatpush3.bf16.msra.mxu0 %v2849_v13  ;;  %v2867_v13 = vld [vmem:[%s3121_s2 + $0xa8] ss:$16 sps:$4 sm:$0xff]  }
 0x484   : > { %v1212_v24 = vsel %vm957_vm2, %v2941_v23, 0.0  ;;  %2773 = vmatprep.subr.bf16.mxu0 %v2997_v5 }
 0x485   : > { %1213 = vadd.xlane.f32.xlu0 %v1212_v24 }
 0x487   : > { %v2943_v27 = vpop.eup %2942  ;;  %2774 = vmatpush3.bf16.msra.mxu0 %v2850_v15  ;;  %v2873_v15 = vld [vmem:[%s3121_s2 + $0x88] ss:$16 sps:$4 sm:$0xff]  }
 0x488   : > { %v1215_v28 = vsel %vm957_vm2, %v2943_v27, 0.0  ;;  %v2945_v29 = vpop.eup %2944  ;;  %2775 = vmatprep.subr.bf16.mxu0 %v2997_v5 }
 0x489   : > { %1216 = vadd.xlane.f32.xlu1 %v1215_v28  ;;  %v1336_v35 = vsel %vm957_vm2, %v2945_v29, 0.0 }
 0x48b   : > { %v2947_v30 = vpop.eup %2946  ;;  %2776 = vmatpush3.bf16.msra.mxu0 %v2851_v19  ;;  %v2876_v19 = vld [vmem:[%s3121_s2 + $0x60] ss:$16 sps:$4 sm:$0xff]  }
 0x48c   : > { %v2949_v31 = vpop.eup %2948  ;;  %v1333_v34 = vsel %vm957_vm2, %v2947_v30, 0.0 }
 0x48d   : > { %v2951_v36 = vpop.eup %2950  ;;  %1334 = vadd.xlane.f32.xlu0 %v1333_v34  ;;  %1337 = vadd.xlane.f32.xlu1 %v1336_v35  ;;  %v1090_v38 = vsel %vm957_vm2, %v2949_v31, 0.0 }
 0x48e   : > { %v1093_v39 = vsel %vm957_vm2, %v2951_v36, 0.0 }
 0x491   : > { %1091 = vadd.xlane.f32.xlu0 %v1090_v38  ;;  %1094 = vadd.xlane.f32.xlu1 %v1093_v39 }
 0x4a2   : > { %1223 = vrot.lane.b32.xlu1 %v3228_v57, %s3001_s4 }
 0x4a6   : > { %1344 = vrot.lane.b32.xlu1 %v3228_v57, %s3000_s17 }
 0x4a7   : > { %1102 = vrot.lane.b32.xlu0 %v3228_v57, %s2999_s14 }
 0x50e   : > { %v1214_v41 = vpop.xlane.xlu0 %1213 }
 0x512   : > { %v1217_v43 = vpop.xlane.xlu1 %1216 }
 0x516   : > { %v1335_v44 = vpop.xlane.xlu0 %1334  ;;  %v1338_v45 = vpop.xlane.xlu1 %1337 }
 0x51a   : > { %v1092_v46 = vpop.xlane.xlu0 %1091  ;;  %v1095_v47 = vpop.xlane.xlu1 %1094 }
 0x51b   : > { %2952 = vrcp.f32 %v1092_v46 }
 0x51c   : > { %2954 = vrcp.f32 %v1095_v47 }
 0x51d   : > { %2956 = vrcp.f32 %v1217_v43 }
 0x51e   : > { %v1103_v48 = vpop.permute.xlu0 %1102  ;;  %2958 = vrcp.f32 %v1214_v41  ;;  %v1224_v55 = vpop.permute.xlu1 %1223 }
 0x51f   : > { %2732 = vmatpush3.bf16.msra.mxu1 %v1103_v48  ;;  %2960 = vrcp.f32 %v1335_v44 }
 0x520   : > { %2743 = vmatprep.subr.bf16.mxu1 %v2997_v5  ;;  %2962 = vrcp.f32 %v1338_v45 }
 0x522   : > { %v1345_v1 = vpop.permute.xlu1 %1344 }
 0x528   : > { %v2953_v50 = vpop.eup %2952 }
 0x529   : > { %v2955_v51 = vpop.eup %2954  ;;  %v1098_v52 = vmul.f32 %v2953_v50, %v2949_v31 }
 0x52a   : > { %v1099_v57 = vmul.f32 %v2955_v51, %v2951_v36  ;;  %v2957_v54 = vpop.eup %2956 }
 0x52b   : > { %v2959_v56 = vpop.eup %2958  ;;  %v1221_v59 = vmul.f32 %v2957_v54, %v2943_v27 }
 0x52c   : > { %v1100_v53 = vpack.c.bf16 %v1099_v57, %v1098_v52  ;;  %v1220_v60 = vmul.f32 %v2959_v56, %v2941_v23  ;;  %v2961_v61 = vpop.eup %2960 }
 0x52d   : > { %v2963_v0 = vpop.eup %2962  ;;  %v1341_v2 = vmul.f32 %v2961_v61, %v2947_v30  ;;  %v2857_v61 = vld [vmem:[%s3121_s2 + $0xec] ss:$16 sps:$4 sm:$0xff]  }
 0x52e   : > { %2734 = vmatmul.mubr.msk.bf16.vlgmr.msra.gmra.mxu1 %vm957_vm2, %v1100_v53  ;;  %v1222_v63 = vpack.c.bf16 %v1221_v59, %v1220_v60  ;;  %v1342_v3 = vmul.f32 %v2963_v0, %v2945_v29  ;;  %v2852_v59 = vld [vmem:[%s3121_s2 + $0xe0] ss:$16 sps:$4 sm:$0xff]   ;;  %v2854_v60 = vld [vmem:[%s3121_s2 + $0xe4] ss:$16 sps:$4 sm:$0xff]   ;;  %1837 = vmatprep.subr.bf16.mxu0 %v2857_v61 }
 0x52f   : > { %2744 = vmatpush3.bf16.msra.mxu1 %v1224_v55  ;;  %2745 = vmatprep.mubr.msk.bf16.mxu1 %vm2998_vm0, %v2997_v5  ;;  %v2906_v61 = vld [vmem:[%s3132_s0 + $0x30] sm:$0xff]  }
 0x530   : > { %2755 = vmatprep.subr.bf16.mxu1 %v2997_v5  ;;  %v1343_v6 = vpack.c.bf16 %v1342_v3, %v1341_v2 }
 0x536   : > { %2746 = vmatmul.mubr.msk.bf16.vlgmr.msra.gmra.mxu1 %vm957_vm2, %v1222_v63 }
 0x537   : > { %2756 = vmatpush3.bf16.msra.mxu1 %v1345_v1  ;;  %2757 = vmatprep.mubr.msk.bf16.mxu1 %vm2998_vm0, %v2997_v5 }
 0x538   : > { %1794 = vmatprep.subr.bf16.mxu1 %v2854_v60  ;;  %v2904_v60 = vld [vmem:[%s3132_s0 + $0x70] sm:$0xff]  }
 0x53e   : > { %2758 = vmatmul.mubr.msk.bf16.vlgmr.msra.gmra.mxu1 %vm957_vm2, %v1343_v6 }
 0x53f   : > { %1826 = vmatprep.mubr.bf16.mxu1 %v2996_v4  ;;  %1795 = vmatpush1.bf16.msra.mxu1 %v2852_v59  ;;  %v2903_v59 = vld [vmem:[%s3132_s0 + $0xb8] sm:$0xff]  }
 0x540   : > { %1796 = vmatprep.subr.bf16.mxu1 %v2860_v7  ;;  %v2915_v7 = vld [vmem:[%s3132_s0 + $0xa0] sm:$0xff]  }
 0x543   : > { %1797 = vmatpush1.bf16.msra.mxu1 %v2858_v62  ;;  %v2917_v62 = vld [vmem:[%s3132_s0 + $0xd8] sm:$0xff]  }
 0x544   : > { %1798 = vmatprep.subr.bf16.mxu1 %v2866_v10  ;;  %v2919_v10 = vld [vmem:[%s3132_s0 + $0x98] sm:$0xff]  }
 0x5ee   : > { %v1142_v11 = vpop.f32.mrf.mxu1 }
 0x5f0   : > { %v2735_v12 = vpop.f32.mrf.mxu1 }
 0x5f1   : > { %v2864_v12 = vld [vmem:[%s3121_s2 + $0xa0] ss:$16 sps:$4 sm:$0xff]  }
 0x5f2   : > { %v1145_v14 = vpop.f32.mrf.mxu1  ;;  %1799 = vmatpush1.bf16.msra.mxu1 %v2864_v12  ;;  %v2921_v12 = vld [vmem:[%s3132_s0 + $0xd0] sm:$0xff]  }
 0x5f3   : > { %v2797_v58 = vpack.i.bf16 %v1145_v14, %v1142_v11  ;;  %v2869_v11 = vld [vmem:[%s3121_s2 + $0xac] ss:$16 sps:$4 sm:$0xff]   ;;  %v2870_v14 = vld [vmem:[%s3121_s2 + $0x80] ss:$16 sps:$4 sm:$0xff]  }
 0x5f4   : > { %v2736_v16 = vpop.f32.mrf.mxu1 }
 0x5f5   : > { %2798 = vrot.lane.b32.xlu1 %v2797_v58, %s3000_s17  ;;  %v2872_v58 = vld [vmem:[%s3121_s2 + $0x84] ss:$16 sps:$4 sm:$0xff]   ;;  %v2875_v16 = vld [vmem:[%s3121_s2 + $0x8c] ss:$16 sps:$4 sm:$0xff]  }
 0x5f6   : > { %v1263_v17 = vpop.f32.mrf.mxu1  ;;  %1800 = vmatprep.subr.bf16.mxu1 %v2872_v58  ;;  %v2924_v58 = vld [vmem:[%s3132_s0 + $0x48] sm:$0xff]  }
 0x5f7   : > { %1801 = vmatpush1.bf16.msra.mxu1 %v2870_v14  ;;  %v2923_v14 = vld [vmem:[%s3132_s0 + $0x90] sm:$0xff]  }
 0x5f8   : > { %v2747_v18 = vpop.f32.mrf.mxu1 }
 0x5f9   : > { %v2881_v18 = vld [vmem:[%s3121_s2 + $0x6c] ss:$16 sps:$4 sm:$0xff]  }
 0x5fa   : > { %v1266_v20 = vpop.f32.mrf.mxu1 }
 0x5fb   : > { %v2802_v21 = vpack.i.bf16 %v1266_v20, %v1263_v17  ;;  %v2878_v17 = vld [vmem:[%s3121_s2 + $0x64] ss:$16 sps:$4 sm:$0xff]   ;;  %v2879_v20 = vld [vmem:[%s3121_s2 + $0x68] ss:$16 sps:$4 sm:$0xff]  }
 0x5fc   : > { %v2748_v22 = vpop.f32.mrf.mxu1  ;;  %1802 = vmatprep.subr.bf16.mxu1 %v2878_v17  ;;  %v2927_v17 = vld [vmem:[%s3132_s0 + $0x88] sm:$0xff]  }
 0x5fd   : > { %2803 = vrot.lane.b32.xlu0 %v2802_v21, %s3001_s4  ;;  %v2884_v21 = vld [vmem:[%s3121_s2 + $0x44] ss:$16 sps:$4 sm:$0xff]   ;;  %v2887_v22 = vld [vmem:[%s3121_s2 + $0x4c] ss:$16 sps:$4 sm:$0xff]   ;;  %1803 = vmatpush1.bf16.msra.mxu1 %v2876_v19 }
 0x5fe   : > { %v1384_v23 = vpop.f32.mrf.mxu1  ;;  %1804 = vmatprep.subr.bf16.mxu1 %v2884_v21  ;;  %v2929_v19 = vld [vmem:[%s3132_s0 + $0xc0] sm:$0xff]  }
 0x5ff   : > { %v2931_v21 = vld [vmem:[%s3132_s0 + $0x80] sm:$0xff]  }
 0x600   : > { %v2759_v24 = vpop.f32.mrf.mxu1 }
 0x601   : > { %v2885_v24 = vld [vmem:[%s3121_s2 + $0x48] ss:$16 sps:$4 sm:$0xff]  }
 0x602   : > { %v1387_v27 = vpop.f32.mrf.mxu1 }
 0x603   : > { %v2807_v28 = vpack.i.bf16 %v1387_v27, %v1384_v23  ;;  %v2882_v23 = vld [vmem:[%s3121_s2 + $0x40] ss:$16 sps:$4 sm:$0xff]   ;;  %v2890_v27 = vld [vmem:[%s3121_s2 + $0x24] ss:$16 sps:$4 sm:$0xff]  }
 0x604   : > { %v2760_v29 = vpop.f32.mrf.mxu1  ;;  %1805 = vmatpush1.bf16.msra.mxu1 %v2882_v23  ;;  %v1628_v23 = vsub.s32 3, %v3211_v32 }
 0x605   : > { %2808 = vrot.lane.b32.xlu1 %v2807_v28, %s2999_s14  ;;  %v2893_v28 = vld [vmem:[%s3121_s2 + $0x2c] ss:$16 sps:$4 sm:$0xff]   ;;  %v2888_v29 = vld [vmem:[%s3121_s2 + $0x20] ss:$16 sps:$4 sm:$0xff]   ;;  %1806 = vmatprep.subr.bf16.mxu1 %v2890_v27 }
 0x608   : > { %1807 = vmatpush1.bf16.msra.mxu1 %v2888_v29 }
 0x667   : > { %v2799_v30 = vpop.permute.xlu1 %2798 }
 0x668   : > { %v2801_v34 = vunpack.i.h.bf16 %v2799_v30  ;;  %v2800_v35 = vunpack.i.l.bf16 %v2799_v30  ;;  %v2891_v30 = vld [vmem:[%s3121_s2 + $0x28] ss:$16 sps:$4 sm:$0xff]  }
 0x66a   : > { %v1416_v39 = vsel %vm909_vm1, %v3274_v42, %v2801_v34  ;;  %v1415_v41 = vsel %vm909_vm1, %v3272_v37, %v2800_v35  ;;  %v2532_v42 = vld [vmem:[%s3528_s3] ss:$0 sm:$0xff]  ;;  %v2899_v34 = vld [vmem:[%s3121_s2 + $0xc] ss:$16 sps:$4 sm:$0xff]  }
 0x66b   : > { %v2894_v35 = vld [vmem:[%s3121_s2] ss:$16 sps:$4 sm:$0xff]  }
 0x66f   : > { %v2804_v31 = vpop.permute.xlu0 %2803 }
 0x670   : > { %v2806_v36 = vunpack.i.h.bf16 %v2804_v31  ;;  %v2805_v5 = vunpack.i.l.bf16 %v2804_v31  ;;  %v2896_v31 = vld [vmem:[%s3121_s2 + $0x4] ss:$16 sps:$4 sm:$0xff]  }
 0x671   : > { %1808 = vmatprep.subr.bf16.mxu1 %v2896_v31 }
 0x672   : > { %v1419_v45 = vsel %vm1417_vm3, %v1416_v39, %v2806_v36  ;;  %v1418_v46 = vsel %vm1417_vm3, %v1415_v41, %v2805_v5  ;;  %v2897_v36 = vld [vmem:[%s3121_s2 + $0x8] ss:$16 sps:$4 sm:$0xff]   ;;  %1809 = vmatpush1.bf16.msra.mxu1 %v2894_v35 }
 0x677   : > { %v2809_v38 = vpop.permute.xlu1 %2808 }
 0x678   : > { %v2811_v43 = vunpack.i.h.bf16 %v2809_v38  ;;  %v2810_v44 = vunpack.i.l.bf16 %v2809_v38 }
 0x67a   : > { %v1422_v47 = vsel %vm1420_vm4, %v1419_v45, %v2811_v43  ;;  %v1421_v48 = vsel %vm1420_vm4, %v1418_v46, %v2810_v44 }
 0x67b   : > { %v1439_v50 = vpack.c.bf16 %v1422_v47, %v1421_v48  ;;  %v2541_v47 = vld [vmem:[%s3529_s27] ss:$0 sm:$0xff] }
 0x67d   : > { %2778 = vmatmul.mubr.bf16.vlgmr.msra.gmra.mxu0 %v1439_v50 }
 0x67e   : > { %1869 = vmatprep.mubr.bf16.mxu0 %v2996_v4  ;;  %v2855_v4 = vld [vmem:[%s3121_s2 + $0xe8] ss:$16 sps:$4 sm:$0xff]  }
 0x67f   : > { %1838 = vmatpush1.bf16.msra.mxu0 %v2855_v4  ;;  %v2905_v4 = vld [vmem:[%s3132_s0 + $0xf0] sm:$0xff]  }
 0x680   : > { %1839 = vmatprep.subr.bf16.mxu0 %v2863_v8  ;;  %v2916_v8 = vld [vmem:[%s3132_s0 + $0x58] sm:$0xff]  }
 0x683   : > { %1840 = vmatpush1.bf16.msra.mxu0 %v2861_v9  ;;  %v2918_v9 = vld [vmem:[%s3132_s0 + $0x18] sm:$0xff]  }
 0x684   : > { %1841 = vmatprep.subr.bf16.mxu0 %v2869_v11  ;;  %v2920_v11 = vld [vmem:[%s3132_s0 + $0x50] sm:$0xff]  }
 0x687   : > { %1842 = vmatpush1.bf16.msra.mxu0 %v2867_v13  ;;  %v2922_v13 = vld [vmem:[%s3132_s0 + $0x10] sm:$0xff]  }
 0x688   : > { %1843 = vmatprep.subr.bf16.mxu0 %v2875_v16  ;;  %v2926_v16 = vld [vmem:[%s3132_s0 + $0x8] sm:$0xff]  }
 0x68b   : > { %1844 = vmatpush1.bf16.msra.mxu0 %v2873_v15  ;;  %v2925_v15 = vld [vmem:[%s3132_s0 + $0xc8] sm:$0xff]  }
 0x68c   : > { %1845 = vmatprep.subr.bf16.mxu0 %v2881_v18  ;;  %v2928_v18 = vld [vmem:[%s3132_s0 + $0x40] sm:$0xff]  }
 0x68f   : > { %1846 = vmatpush1.bf16.msra.mxu0 %v2879_v20  ;;  %v2930_v20 = vld [vmem:[%s3132_s0] sm:$0xff]  }
 0x690   : > { %1847 = vmatprep.subr.bf16.mxu0 %v2887_v22  ;;  %v1612_v22 = vld [vmem:[%s3127_s29] sm:$0xf] }
 0x691   : > { %v1625_v27 = vrot.slane %v1612_v22, %v687_v49  ;;  %v1629_v29 = vrot.slane %v1612_v22, %v1628_v23 }
 0x693   : > { %1848 = vmatpush1.bf16.msra.mxu0 %v2885_v24  ;;  %v1617_v24 = vrot.slane %v1612_v22, %v679_v40 }
 0x694   : > { %1849 = vmatprep.subr.bf16.mxu0 %v2893_v28  ;;  %v1621_v28 = vrot.slane %v1612_v22, %v683_v33 }
 0x697   : > { %1850 = vmatpush1.bf16.msra.mxu0 %v2891_v30 }
 0x698   : > { %1851 = vmatprep.subr.bf16.mxu0 %v2899_v34 }
 0x69b   : > { %1852 = vmatpush1.bf16.msra.mxu0 %v2897_v36 }
 0x73d   : > { %v1529_v37 = vpop.f32.mrf.mxu0 }
 0x73e   : > { %v1530_v51 = vadd.f32 %v2532_v42, %v1529_v37  ;;  %v2542_v37 = vld [vmem:[%s3530_s24] ss:$0 sm:$0xff] }
 0x73f   : > { %v2779_v52 = vpop.f32.mrf.mxu0 }
 0x740   : > { %v1536_v57 = vadd.f32 %v1530_v51, %v3187_v25 }
 0x741   : > { %v1532_v53 = vpop.f32.mrf.mxu0 }
 0x742   : > { %v1533_v54 = vadd.f32 %v2532_v42, %v1532_v53  ;;  %1540 = vadd.xlane.f32.xlu0 %v1536_v57 }
 0x743   : > { %v2780_v55 = vpop.f32.mrf.mxu0 }
 0x744   : > { %v1537_v56 = vadd.f32 %v1533_v54, %v3192_v26  ;;  %v2900_v54 = vld [vmem:[%s3132_s0 + $0x78] sm:$0xff]  }
 0x745   : > { %v2901_v55 = vld [vmem:[%s3132_s0 + $0xf8] sm:$0xff]   ;;  %2649 = vmatprep.subr.bf16.mxu1 %v2900_v54 }
 0x746   : > { %1542 = vadd.xlane.f32.xlu1 %v1537_v56  ;;  %2671 = vmatprep.subr.bf16.mxu0 %v2901_v55 }
 0x7cb   : > { %v1541_v25 = vpop.xlane.xlu0 %1540 }
 0x7cc   : > { %v1545_v63 = vmul.f32 0.0078125, %v1541_v25  ;;  %v2907_v25 = vld [vmem:[%s3132_s0 + $0xb0] sm:$0xff]  }
 0x7ce   : > { %v3344_v0 = vsub.f32 %v1536_v57, %v1545_v63  ;;  %v2908_v63 = vld [vmem:[%s3132_s0 + $0x68] sm:$0xff]  }
 0x7cf   : > { %v1543_v1 = vpop.xlane.xlu1 %1542 }
 0x7d0   : > { %v1546_v26 = vmul.f32 0.0078125, %v1543_v1  ;;  %v1549_v2 = vmul.f32 %v3344_v0, %v3344_v0  ;;  %v2910_v1 = vld [vmem:[%s3132_s0 + $0x28] sm:$0xff]  }
 0x7d2   : > { %v3348_v3 = vsub.f32 %v1537_v56, %v1546_v26  ;;  %1551 = vadd.xlane.f32.xlu0 %v1549_v2  ;;  %v2902_v56 = vld [vmem:[%s3132_s0 + $0x38] sm:$0xff]   ;;  %v2911_v26 = vld [vmem:[%s3132_s0 + $0xa8] sm:$0xff]   ;;  %v2912_v2 = vld [vmem:[%s3132_s0 + $0x60] sm:$0xff]  }
 0x7d4   : > { %v1550_v6 = vmul.f32 %v3348_v3, %v3348_v3 }
 0x7d6   : > { %1553 = vadd.xlane.f32.xlu0 %v1550_v6  ;;  %v2914_v6 = vld [vmem:[%s3132_s0 + $0x20] sm:$0xff]  }
 0x85b   : > { %v1552_v5 = vpop.xlane.xlu0 %1551 }
 0x85c   : > { %v1555_v38 = vmul.f32 0.0078125, %v1552_v5 }
 0x85e   : > { %v1557_v39 = vadd.f32 1e-12, %v1555_v38 }
 0x85f   : > { %v1554_v41 = vpop.xlane.xlu0 %1553 }
 0x860   : > { %2964 = vrsqrt.f32 %v1557_v39  ;;  %v1556_v43 = vmul.f32 0.0078125, %v1554_v41 }
 0x862   : > { %v1558_v44 = vadd.f32 1e-12, %v1556_v43 }
 0x864   : > { %2966 = vrsqrt.f32 %v1558_v44 }
 0x86d   : > { %v2965_v45 = vpop.eup %2964 }
 0x86e   : > { %v1561_v46 = vmul.f32 %v2965_v45, %v3344_v0  ;;  %v2909_v0 = vld [vmem:[%s3132_s0 + $0xe8] sm:$0xff]  }
 0x870   : > { %v1569_v42 = vmul.f32 %v2541_v47, %v1561_v46 }
 0x871   : > { %v2967_v48 = vpop.eup %2966 }
 0x872   : > { %v1562_v50 = vmul.f32 %v2967_v48, %v3348_v3  ;;  %v3392_v52 = vadd.f32 %v2542_v37, %v1569_v42  ;;  %v2913_v3 = vld [vmem:[%s3132_s0 + $0xe0] sm:$0xff]  }
 0x874   : > { %v1570_v51 = vmul.f32 %v2541_v47, %v1562_v50 }
 0x876   : > { %v3394_v57 = vadd.f32 %v2542_v37, %v1570_v51 }
 0x878   : > { %v1611_v53 = vpack.c.bf16 %v3394_v57, %v3392_v52 }
 0x87a   : > { %1827 = vmatmul.mubr.bf16.vlgmr.msra.gmra.mxu1 %v1611_v53  ;;  %1870 = vmatmul.mubr.bf16.vlgmr.msra.gmra.mxu0 %v1611_v53 }
 0x87b   : > { %2650 = vmatpush3.bf16.msra.mxu1 %v2902_v56  ;;  %2672 = vmatpush3.bf16.msra.mxu0 %v2903_v59 }
 0x87c   : > { %2651 = vmatprep.subr.bf16.mxu1 %v2904_v60  ;;  %2673 = vmatprep.subr.bf16.mxu0 %v2905_v4 }
 0x87f   : > { %2652 = vmatpush3.bf16.msra.mxu1 %v2906_v61  ;;  %2674 = vmatpush3.bf16.msra.mxu0 %v2907_v25 }
 0x880   : > { %2653 = vmatprep.subr.bf16.mxu1 %v2908_v63  ;;  %2675 = vmatprep.subr.bf16.mxu0 %v2909_v0 }
 0x883   : > { %2654 = vmatpush3.bf16.msra.mxu1 %v2910_v1  ;;  %2676 = vmatpush3.bf16.msra.mxu0 %v2911_v26 }
 0x884   : > { %2655 = vmatprep.subr.bf16.mxu1 %v2912_v2  ;;  %2677 = vmatprep.subr.bf16.mxu0 %v2913_v3 }
 0x887   : > { %2656 = vmatpush3.bf16.msra.mxu1 %v2914_v6  ;;  %2678 = vmatpush3.bf16.msra.mxu0 %v2915_v7 }
 0x888   : > { %2657 = vmatprep.subr.bf16.mxu1 %v2916_v8  ;;  %2679 = vmatprep.subr.bf16.mxu0 %v2917_v62 }
 0x88b   : > { %2658 = vmatpush3.bf16.msra.mxu1 %v2918_v9  ;;  %2680 = vmatpush3.bf16.msra.mxu0 %v2919_v10 }
 0x88c   : > { %2659 = vmatprep.subr.bf16.mxu1 %v2920_v11  ;;  %2681 = vmatprep.subr.bf16.mxu0 %v2921_v12 }
 0x88f   : > { %2660 = vmatpush3.bf16.msra.mxu1 %v2922_v13  ;;  %2682 = vmatpush3.bf16.msra.mxu0 %v2923_v14 }
 0x890   : > { %2661 = vmatprep.subr.bf16.mxu1 %v2924_v58  ;;  %2683 = vmatprep.subr.bf16.mxu0 %v2925_v15 }
 0x893   : > { %2662 = vmatpush3.bf16.msra.mxu1 %v2926_v16  ;;  %2684 = vmatpush3.bf16.msra.mxu0 %v2927_v17 }
 0x894   : > { %2663 = vmatprep.subr.bf16.mxu1 %v2928_v18  ;;  %2685 = vmatprep.subr.bf16.mxu0 %v2929_v19 }
 0x897   : > { %2664 = vmatpush3.bf16.msra.mxu1 %v2930_v20  ;;  %2686 = vmatpush3.bf16.msra.mxu0 %v2931_v21 }
 0x93a   : > { %v1828_v30 = vpop.f32.mrf.mxu1  ;;  %v1871_v31 = vpop.f32.mrf.mxu0 }
 0x93b   : > { %v3438_v34 = vadd.f32 %v1828_v30, %v1617_v24  ;;  %v3440_v35 = vadd.f32 %v1871_v31, %v1625_v27 }
 0x93c   : > { %v1830_v36 = vpop.f32.mrf.mxu1  ;;  %v1873_v5 = vpop.f32.mrf.mxu0 }
 0x93d   : > { %v1888_v38 = vmul.f32 0.044715, %v3438_v34  ;;  %v1890_v39 = vmul.f32 0.044715, %v3440_v35  ;;  %v1831_v40 = vadd.f32 %v1830_v36, %v1621_v28  ;;  %v3444_v41 = vadd.f32 %v1873_v5, %v1629_v29 }
 0x93e   : > { %v1832_v49 = vpop.f32.mrf.mxu1  ;;  %v1875_v43 = vpop.f32.mrf.mxu0  ;;  %v1880_v36 = vmul.f32 0.5, %v3438_v34 }
 0x93f   : > { %v1896_v32 = vmul.f32 %v1888_v38, %v3438_v34  ;;  %v1898_v33 = vmul.f32 %v1890_v39, %v3440_v35  ;;  %v1889_v44 = vmul.f32 0.044715, %v1831_v40  ;;  %v1891_v45 = vmul.f32 0.044715, %v3444_v41 }
 0x940   : > { %v1833_v46 = vadd.f32 %v1832_v49, %v1617_v24  ;;  %v3449_v47 = vadd.f32 %v1875_v43, %v1625_v27  ;;  %v1834_v48 = vpop.f32.mrf.mxu1  ;;  %v1877_v50 = vpop.f32.mrf.mxu0  ;;  %v1881_v30 = vmul.f32 0.5, %v1831_v40 }
 0x941   : > { %v1904_v42 = vmul.f32 %v1896_v32, %v3438_v34  ;;  %v1906_v37 = vmul.f32 %v1898_v33, %v3440_v35  ;;  %v1897_v51 = vmul.f32 %v1889_v44, %v1831_v40  ;;  %v1899_v53 = vmul.f32 %v1891_v45, %v3444_v41 }
 0x942   : > { %v1892_v54 = vmul.f32 0.044715, %v1833_v46  ;;  %v1894_v55 = vmul.f32 0.044715, %v3449_v47  ;;  %v1835_v56 = vadd.f32 %v1834_v48, %v1621_v28  ;;  %v1878_v59 = vadd.f32 %v1877_v50, %v1629_v29 }
 0x943   : > { %v1912_v60 = vadd.f32 %v1904_v42, %v3438_v34  ;;  %v1914_v4 = vadd.f32 %v1906_v37, %v3440_v35  ;;  %v1905_v61 = vmul.f32 %v1897_v51, %v1831_v40  ;;  %v1907_v25 = vmul.f32 %v1899_v53, %v3444_v41 }
 0x944   : > { %v1900_v63 = vmul.f32 %v1892_v54, %v1833_v46  ;;  %v1902_v0 = vmul.f32 %v1894_v55, %v3449_v47  ;;  %v1893_v1 = vmul.f32 0.044715, %v1835_v56  ;;  %v1895_v26 = vmul.f32 0.044715, %v1878_v59 }
 0x945   : > { %v1920_v2 = vmul.f32 0.7978846, %v1912_v60  ;;  %v1922_v3 = vmul.f32 0.7978846, %v1914_v4  ;;  %v1913_v6 = vadd.f32 %v1905_v61, %v1831_v40  ;;  %v1915_v11 = vadd.f32 %v1907_v25, %v3444_v41 }
 0x946   : > { %v1908_v7 = vmul.f32 %v1900_v63, %v1833_v46  ;;  %v1910_v8 = vmul.f32 %v1902_v0, %v3449_v47  ;;  %v1901_v62 = vmul.f32 %v1893_v1, %v1835_v56  ;;  %v1903_v9 = vmul.f32 %v1895_v26, %v1878_v59 }
 0x947   : > { %v1921_v10 = vmul.f32 0.7978846, %v1913_v6  ;;  %2968 = vtanh.f32 %v1920_v2  ;;  %v1923_v15 = vmul.f32 0.7978846, %v1915_v11  ;;  %v1884_v49 = vmul.f32 0.5, %v1833_v46 }
 0x948   : > { %v1916_v12 = vadd.f32 %v1908_v7, %v1833_v46  ;;  %v1918_v13 = vadd.f32 %v1910_v8, %v3449_v47  ;;  %v1909_v14 = vmul.f32 %v1901_v62, %v1835_v56  ;;  %2970 = vtanh.f32 %v1922_v3 }
 0x949   : > { %v1911_v58 = vmul.f32 %v1903_v9, %v1878_v59  ;;  %2972 = vtanh.f32 %v1921_v10  ;;  %v1885_v44 = vmul.f32 0.5, %v1835_v56  ;;  %v1886_v48 = vmul.f32 0.5, %v3449_v47 }
 0x94a   : > { %v1924_v16 = vmul.f32 0.7978846, %v1916_v12  ;;  %v1926_v17 = vmul.f32 0.7978846, %v1918_v13  ;;  %v1917_v18 = vadd.f32 %v1909_v14, %v1835_v56  ;;  %2974 = vtanh.f32 %v1923_v15 }
 0x94b   : > { %v1919_v19 = vadd.f32 %v1911_v58, %v1878_v59  ;;  %v1883_v42 = vmul.f32 0.5, %v3444_v41  ;;  %v1887_v37 = vmul.f32 0.5, %v1878_v59  ;;  %v1882_v34 = vmul.f32 0.5, %v3440_v35  ;;  %v2575_v35 = vld [vmem:[%s624_s20] ss:$0 sm:$0xff] }
 0x94c   : > { %2976 = vtanh.f32 %v1924_v16  ;;  %v1925_v20 = vmul.f32 0.7978846, %v1917_v18 }
 0x94d   : > { %2978 = vtanh.f32 %v1926_v17  ;;  %v1927_v21 = vmul.f32 0.7978846, %v1919_v19 }
 0x94e   : > { %2980 = vtanh.f32 %v1925_v20 }
 0x94f   : > { %2982 = vtanh.f32 %v1927_v21 }
 0x954   : > { %v2969_v22 = vpop.eup %2968 }
 0x955   : > { %v2971_v23 = vpop.eup %2970  ;;  %v1936_v43 = vadd.f32 1.0, %v2969_v22 }
 0x956   : > { %v2973_v24 = vpop.eup %2972  ;;  %v1938_v50 = vadd.f32 1.0, %v2971_v23 }
 0x957   : > { %v2975_v27 = vpop.eup %2974  ;;  %v1937_v31 = vadd.f32 1.0, %v2973_v24  ;;  %v1944_v4 = vmul.f32 %v1936_v43, %v1880_v36  ;;  %v2609_v36 = vld [vmem:[%s630_s8] ss:$0 sm:$0xff] }
 0x958   : > { %v1939_v39 = vadd.f32 1.0, %v2975_v27  ;;  %v1946_v56 = vmul.f32 %v1938_v50, %v1882_v34 }
 0x959   : > { %v2977_v28 = vpop.eup %2976  ;;  %v1945_v53 = vmul.f32 %v1937_v31, %v1881_v30  ;;  %v2608_v30 = vld [vmem:[%s627_s16] ss:$0 sm:$0xff] }
 0x95a   : > { %v2979_v29 = vpop.eup %2978  ;;  %v1940_v5 = vadd.f32 1.0, %v2977_v28  ;;  %v1947_v46 = vmul.f32 %v1939_v39, %v1883_v42 }
 0x95b   : > { %v2981_v38 = vpop.eup %2980  ;;  %v1942_v32 = vadd.f32 1.0, %v2979_v29 }
 0x95c   : > { %v2983_v33 = vpop.eup %2982  ;;  %v1941_v45 = vadd.f32 1.0, %v2981_v38  ;;  %v1948_v40 = vmul.f32 %v1940_v5, %v1884_v49 }
 0x95d   : > { %v1943_v51 = vadd.f32 1.0, %v2983_v33  ;;  %v1950_v55 = vmul.f32 %v1942_v32, %v1886_v48 }
 0x95e   : > { %v1949_v54 = vmul.f32 %v1941_v45, %v1885_v44  ;;  %v2016_v63 = vpack.c.bf16 %v1948_v40, %v1944_v4 }
 0x95f   : > { %v1951_v60 = vmul.f32 %v1943_v51, %v1887_v37  ;;  %v2018_v47 = vpack.c.bf16 %v1950_v55, %v1946_v56 }
 0x960   : > { %v2017_v61 = vpack.c.bf16 %v1949_v54, %v1945_v53 }
 0x961   : > { %v2019_v25 = vpack.c.bf16 %v1951_v60, %v1947_v46 }
 0x962   : > { %2251 = vmatprep.mubr.bf16.mxu1 %v2017_v61 }
 0x963   : > { %2292 = vmatprep.mubr.bf16.mxu0 %v2019_v25  ;;  %2252 = vmatmul.mubr.bf16.vlgmr.msra.gmra.mxu1 %v2016_v63 }
 0x964   : > { %2293 = vmatmul.mubr.bf16.vlgmr.msra.gmra.mxu0 %v2018_v47 }
 0xa23   : > { %v2665_v41 = vpop.f32.mrf.mxu1 }
 0xa24   : > { %v2687_v59 = vpop.f32.mrf.mxu0 }
 0xa25   : > { %v2666_v0 = vpop.f32.mrf.mxu1 }
 0xa26   : > { %v2667_v1 = vadd.f32 %v2666_v0, %v2665_v41  ;;  %v2688_v26 = vpop.f32.mrf.mxu0 }
 0xa27   : > { %v2668_v2 = vpop.f32.mrf.mxu1  ;;  %v2689_v6 = vadd.f32 %v2688_v26, %v2687_v59 }
 0xa28   : > { %v2254_v3 = vadd.f32 %v2667_v1, %v2575_v35  ;;  %v2690_v7 = vpop.f32.mrf.mxu0 }
 0xa29   : > { %v2669_v8 = vpop.f32.mrf.mxu1 }
 0xa2a   : > { %v2295_v62 = vadd.f32 %v2689_v6, %v2254_v3  ;;  %v2670_v9 = vadd.f32 %v2669_v8, %v2668_v2  ;;  %v2691_v10 = vpop.f32.mrf.mxu0 }
 0xa2b   : > { %v2692_v12 = vadd.f32 %v2691_v10, %v2690_v7 }
 0xa2c   : > { %v2257_v11 = vadd.f32 %v2670_v9, %v2575_v35  ;;  %v2301_v13 = vadd.f32 %v2295_v62, %v3392_v52 }
 0xa2e   : > { %v2298_v14 = vadd.f32 %v2692_v12, %v2257_v11  ;;  %2305 = vadd.xlane.f32.xlu0 %v2301_v13 }
 0xa30   : > { %v2302_v58 = vadd.f32 %v2298_v14, %v3394_v57 }
 0xa32   : > { %2307 = vadd.xlane.f32.xlu1 %v2302_v58 }
 0xab7   : > { %v2306_v15 = vpop.xlane.xlu0 %2305 }
 0xab8   : > { %v2309_v16 = vmul.f32 0.0078125, %v2306_v15 }
 0xaba   : > { %v2311_v17 = vsub.f32 %v2301_v13, %v2309_v16 }
 0xabb   : > { %v2308_v18 = vpop.xlane.xlu1 %2307 }
 0xabc   : > { %v2310_v19 = vmul.f32 0.0078125, %v2308_v18  ;;  %v2313_v20 = vmul.f32 %v2311_v17, %v2311_v17 }
 0xabe   : > { %v2312_v21 = vsub.f32 %v2302_v58, %v2310_v19  ;;  %2315 = vadd.xlane.f32.xlu0 %v2313_v20 }
 0xac0   : > { %v2314_v22 = vmul.f32 %v2312_v21, %v2312_v21 }
 0xac2   : > { %2317 = vadd.xlane.f32.xlu1 %v2314_v22 }
 0xb47   : > { %v2316_v23 = vpop.xlane.xlu0 %2315 }
 0xb48   : > { %v2319_v24 = vmul.f32 0.0078125, %v2316_v23 }
 0xb4a   : > { %v2321_v52 = vadd.f32 1e-12, %v2319_v24 }
 0xb4b   : > { %v2318_v27 = vpop.xlane.xlu1 %2317 }
 0xb4c   : > { %2984 = vrsqrt.f32 %v2321_v52  ;;  %v2320_v28 = vmul.f32 0.0078125, %v2318_v27 }
 0xb4e   : > { %v2322_v57 = vadd.f32 1e-12, %v2320_v28 }
 0xb50   : > { %2986 = vrsqrt.f32 %v2322_v57 }
 0xb59   : > { %v2985_v29 = vpop.eup %2984 }
 0xb5a   : > { %v2325_v31 = vmul.f32 %v2985_v29, %v2311_v17 }
 0xb5c   : > { %v2333_v5 = vmul.f32 %v2608_v30, %v2325_v31 }
 0xb5d   : > { %v2987_v38 = vpop.eup %2986 }
 0xb5e   : > { %v2341_v39 = vadd.f32 %v2609_v36, %v2333_v5  ;;  %v2326_v49 = vmul.f32 %v2987_v38, %v2312_v21 }
 0xb60   : > { %2343 = vst [vmem:[%s3526_s23] sm:$0xff] %v2341_v39  ;;  %v2334_v43 = vmul.f32 %v2608_v30, %v2326_v49 }
 0xb62   : > { %v2342_v32 = vadd.f32 %v2609_v36, %v2334_v43 }
 0xb64   : > { %2344 = vst [vmem:[%s3526_s23 + $0x8] sm:$0xff] %v2342_v32 }
 0xb65 PF: > { %s3531_s16 = sld [smem:[#allocation2_spill]] }
 0xb6b   : > { %s24_s29 = sadd.s32 1, %s3531_s16  }
 0xb6c   : > { %p21_p5 = scmp.ge.s32.totalorder %s24_s29, 4  }
 0xb6e   :  { %23 = sbr.rel (!%p21_p5) target bundleno = 8 (0x8), region = 139 }

</bundles_post_ra>
